<compile_context>
chip_gen: v7x
topology: tpu7x:2x2x1
jax: 0.10.0
libtpu: 0.0.40
codegen_flags: <defaults>
</compile_context>

<pallas_src>
import jax
import jax.numpy as jnp
from jax import lax
from jax.experimental import pallas as pl
from jax.experimental.pallas import tpu as pltpu


# ---------------------------------------------------------------------------
# Pallas kernel: full PasaNet forward for ONE batch tile per grid step.
# Data layout inside the kernel: 2-D matrices (rows = (image, padded row),
# lanes = flattened (w, channel)).  All ops are 2-D dots, unit-stride row
# slices and element-wise max/add/mul -> no reshapes, concats or scratch.
# ---------------------------------------------------------------------------
def pasanet_kernel(x_ref,
                   band1_ref, bias1_ref, scale1_ref, shift1_ref, pe1_ref, po1_ref, sel1_ref,
                   band2_ref, bias2_ref, scale2_ref, shift2_ref, pe2_ref, po2_ref, sel2_ref,
                   band3_ref, bias3_ref, scale3_ref, shift3_ref, pe3_ref, po3_ref, selfc_ref,
                   wfc_ref, bfc_ref,
                   out_ref):
    f32 = jnp.float32

    def conv_rows(d, band_ref):
        # d: (R, Win*Cin); band_ref: (3, Win*Cin, Wout*Cout).
        # Vertical tap dh -> shifted row slice; horizontal taps + W-padding +
        # channel contraction are folded into the banded weight matrix.
        r_out = d.shape[0] - 2
        acc = jnp.dot(d[0:r_out, :], band_ref[0], preferred_element_type=f32)
        acc = acc + jnp.dot(d[1:r_out + 1, :], band_ref[1], preferred_element_type=f32)
        acc = acc + jnp.dot(d[2:r_out + 2, :], band_ref[2], preferred_element_type=f32)
        return acc

    def relu_bn(y, bias_ref, scale_ref, shift_ref):
        # conv bias -> ReLU -> folded eval-mode BatchNorm (per-channel vectors
        # pre-tiled along the (w, c) lane axis in the wrapper).
        return jnp.maximum(y + bias_ref[...], 0.0) * scale_ref[...] + shift_ref[...]

    def pool_rows_cols(z, pe_ref, po_ref):
        # 2x2 max-pool: row-pair max (values only), then even/odd column
        # selection via 0/1 matmuls (lane-dense, no masked stores).
        m = jnp.maximum(z[:-1, :], z[1:, :])
        return jnp.maximum(jnp.dot(m, pe_ref[...], preferred_element_type=f32),
                           jnp.dot(m, po_ref[...], preferred_element_type=f32))

    # --- block 1: Conv2d(1->8, k=3, pad=2) + ReLU + BN + MaxPool ------------
    d1 = x_ref[...]                                             # (TB*36, 36)
    z1 = relu_bn(conv_rows(d1, band1_ref), bias1_ref, scale1_ref, shift1_ref)
    p1 = pool_rows_cols(z1, pe1_ref, po1_ref)                   # (TB*36-3, 17*8)
    # row compaction + H zero-padding for conv2, as one selection matmul
    d2 = jnp.dot(sel1_ref[...], p1, preferred_element_type=f32)  # (TB*19, 136)

    # --- block 2: Conv2d(8->32, k=3, pad=1) + ReLU + BN + MaxPool -----------
    z2 = relu_bn(conv_rows(d2, band2_ref), bias2_ref, scale2_ref, shift2_ref)
    p2 = pool_rows_cols(z2, pe2_ref, po2_ref)                   # (TB*19-3, 8*32)
    d3 = jnp.dot(sel2_ref[...], p2, preferred_element_type=f32)  # (TB*10, 256)

    # --- block 3: Conv2d(32->16, k=3, pad=1) + ReLU + BN + MaxPool ----------
    z3 = relu_bn(conv_rows(d3, band3_ref), bias3_ref, scale3_ref, shift3_ref)
    p3 = pool_rows_cols(z3, pe3_ref, po3_ref)                   # (TB*10-3, 4*16)

    # --- fc: flatten + Linear(256 -> 4) + ReLU ------------------------------
    # out[b,f] = sum_h (row-select h of p3) @ Wfc_h ; flatten order matches
    # PyTorch's NCHW flatten because Wfc_h is pre-permuted in the wrapper.
    tb = out_ref.shape[0]
    acc = jnp.zeros((tb, 4), f32)
    for h in range(4):
        feat_h = jnp.dot(selfc_ref[h], p3, preferred_element_type=f32)      # (TB, 64)
        acc = acc + jnp.dot(feat_h, wfc_ref[h], preferred_element_type=f32)  # (TB, 4)
    out_ref[...] = jnp.maximum(acc + bfc_ref[...], 0.0)


# ---------------------------------------------------------------------------
# Wrapper-side operand construction (pure JAX, outside the kernel)
# ---------------------------------------------------------------------------
def _band_matrices(w_oihw, w_in, w_out, pad):
    """(O,I,3,3) conv weight -> 3 banded matrices of shape (w_in*I, w_out*O)."""
    O, I, KH, KW = w_oihw.shape
    wo = jnp.arange(w_out)
    mats = []
    for dh in range(KH):
        bd = jnp.zeros((w_in, w_out, I, O), jnp.float32)
        for dw in range(KW):
            wi = wo + dw - pad
            valid = (wi >= 0) & (wi < w_in)
            wi_c = jnp.clip(wi, 0, w_in - 1)
            tap = w_oihw[:, :, dh, dw].T                     # (I, O)
            contrib = jnp.where(valid[:, None, None], tap[None, :, :], 0.0)
            bd = bd.at[wi_c, wo].add(contrib)                # (w_out, I, O) scatter
        mats.append(jnp.transpose(bd, (0, 2, 1, 3)).reshape(w_in * I, w_out * O))
    return jnp.stack(mats)                                   # (3, w_in*I, w_out*O)


def _pool_col_mats(w, c):
    """0/1 matrices selecting even / odd w-blocks: (w*c, (w//2)*c)."""
    wp = w // 2
    eye_c = jnp.eye(c, dtype=jnp.float32)
    base = jnp.zeros((w, wp), jnp.float32)
    sel_e = base.at[2 * jnp.arange(wp), jnp.arange(wp)].set(1.0)
    sel_o = base.at[2 * jnp.arange(wp) + 1, jnp.arange(wp)].set(1.0)
    return jnp.kron(sel_e, eye_c), jnp.kron(sel_o, eye_c)


def _row_select(tb, rows_in, n_in, n_out, n_valid, pad_top):
    """0/1 matrix: out row b*n_out+pad_top+i  <-  in row b*n_in+2*i."""
    s = jnp.zeros((tb * n_out, rows_in), jnp.float32)
    b = jnp.arange(tb)[:, None]
    i = jnp.arange(n_valid)[None, :]
    out_r = (b * n_out + pad_top + i).reshape(-1)
    in_r = (b * n_in + 2 * i).reshape(-1)
    return s.at[out_r, in_r].set(1.0)


def _tile_vec(v, w):
    """Per-channel (C,) vector -> (1, w*C) lane vector matching col = w*C + c."""
    return jnp.tile(v, (w,)).reshape(1, -1).astype(jnp.float32)


def _build_operands(pt, tb):
    (w1, b1, s1, t1, w2, b2, s2, t2, w3, b3, s3, t3, wfc, bfc) = pt
    band1 = _band_matrices(w1, 36, 34, 0)     # (3,  36, 272)  input already W-padded by 2
    band2 = _band_matrices(w2, 17, 17, 1)     # (3, 136, 544)
    band3 = _band_matrices(w3, 8, 8, 1)       # (3, 256, 128)
    pe1, po1 = _pool_col_mats(34, 8)          # (272, 136)
    pe2, po2 = _pool_col_mats(17, 32)         # (544, 256)
    pe3, po3 = _pool_col_mats(8, 16)          # (128,  64)
    sel1 = _row_select(tb, tb * 36 - 3, 36, 19, 17, 1)   # pool1 rows + conv2 H-pad
    sel2 = _row_select(tb, tb * 19 - 3, 19, 10, 8, 1)    # pool2 rows + conv3 H-pad
    # FC row selectors: selfc[h, b, b*10 + 2*h] = 1  (pool3 row of feature-row h)
    selfc = jnp.zeros((4, tb, tb * 10 - 3), jnp.float32)
    hh = jnp.broadcast_to(jnp.arange(4)[:, None], (4, tb))
    bb = jnp.broadcast_to(jnp.arange(tb)[None, :], (4, tb))
    selfc = selfc.at[hh, bb, bb * 10 + 2 * hh].set(1.0)
    # wfc (4,256) [f, c*16+h*4+w] -> (4, 64, 4) [h, w*16+c, f] to match our lanes
    wfc_h = jnp.transpose(wfc.reshape(4, 16, 4, 4), (2, 3, 1, 0)).reshape(4, 64, 4)
    return (band1, _tile_vec(b1, 34), _tile_vec(s1, 34), _tile_vec(t1, 34), pe1, po1, sel1,
            band2, _tile_vec(b2, 17), _tile_vec(s2, 17), _tile_vec(t2, 17), pe2, po2, sel2,
            band3, _tile_vec(b3, 8), _tile_vec(s3, 8), _tile_vec(t3, 8), pe3, po3, selfc,
            wfc_h, bfc.reshape(1, 4).astype(jnp.float32))


# ---------------------------------------------------------------------------
# Wrapper: batch tiling, BlockSpecs, grid over batch tiles
# ---------------------------------------------------------------------------
def pasanet_forward(x_nchw, pt_params):
    n = x_nchw.shape[0]
    # Even batch tile keeps the (TB*36, 36) block sublane-aligned; cap keeps
    # all operands + intermediates a few MB of VMEM (safe on v7x's 64 MiB too).
    tb = 8 if n >= 8 else n + (n % 2)
    n_pad = ((n + tb - 1) // tb) * tb

    x = x_nchw[:, 0].astype(jnp.float32)                        # (n, 32, 32)
    x = jnp.pad(x, ((0, n_pad - n), (2, 2), (2, 2)))            # batch pad + conv1 pad=2
    x2d = x.reshape(n_pad * 36, 36)                             # rows=(image,row), lanes=W

    operands = _build_operands(pt_params, tb)

    def full_spec(a):
        nd = a.ndim
        return pl.BlockSpec(a.shape, lambda i, _nd=nd: (0,) * _nd)

    in_specs = [pl.BlockSpec((tb * 36, 36), lambda i: (i, 0))]
    in_specs += [full_spec(a) for a in operands]

    out = pl.pallas_call(
        pasanet_kernel,
        out_shape=jax.ShapeDtypeStruct((n_pad, 4), jnp.float32),
        grid=(n_pad // tb,),
        in_specs=in_specs,
        out_specs=pl.BlockSpec((tb, 4), lambda i: (i, 0)),
        compiler_params=pltpu.CompilerParams(
            dimension_semantics=("parallel",)),   # batch tiles are independent
    )(x2d, *operands)
    return out[:n]


# ---------------------------------------------------------------------------
# Deterministic PyTorch-layout parameters + pure-JAX reference
# ---------------------------------------------------------------------------
def make_params(key):
    ks = jax.random.split(key, 20)

    def nrm(k, shape, s=0.1):
        return (s * jax.random.normal(k, shape)).astype(jnp.float32)

    eps = 1e-5
    w1, b1 = nrm(ks[0], (8, 1, 3, 3)), nrm(ks[1], (8,))
    w2, b2 = nrm(ks[2], (32, 8, 3, 3)), nrm(ks[3], (32,))
    w3, b3 = nrm(ks[4], (16, 32, 3, 3)), nrm(ks[5], (16,))
    wfc, bfc = nrm(ks[6], (4, 256)), nrm(ks[7], (4,))

    def bn(kg, kb, km, kv, c):
        gamma = 1.0 + nrm(kg, (c,))
        beta = nrm(kb, (c,))
        mean = nrm(km, (c,))
        var = jax.random.uniform(kv, (c,), jnp.float32, 0.5, 1.5)
        scale = gamma / jnp.sqrt(var + eps)       # folded eval-mode BatchNorm
        shift = beta - mean * scale
        return scale, shift

    s1, t1 = bn(ks[8], ks[9], ks[10], ks[11], 8)
    s2, t2 = bn(ks[12], ks[13], ks[14], ks[15], 32)
    s3, t3 = bn(ks[16], ks[17], ks[18], ks[19], 16)
    return (w1, b1, s1, t1, w2, b2, s2, t2, w3, b3, s3, t3, wfc, bfc)


def reference_forward(x_nchw, pt):
    (w1, b1, s1, t1, w2, b2, s2, t2, w3, b3, s3, t3, wfc, bfc) = pt

    def conv(x, w, b, pad):
        y = lax.conv_general_dilated(
            x, w, window_strides=(1, 1), padding=[(pad, pad), (pad, pad)],
            dimension_numbers=("NCHW", "OIHW", "NCHW"))
        return y + b.reshape(1, -1, 1, 1)

    def bn(x, s, t):
        return x * s.reshape(1, -1, 1, 1) + t.reshape(1, -1, 1, 1)

    def pool(x):
        return lax.reduce_window(x, -jnp.inf, lax.max,
                                 (1, 1, 2, 2), (1, 1, 2, 2), "VALID")

    y = pool(bn(jax.nn.relu(conv(x_nchw, w1, b1, 2)), s1, t1))
    y = pool(bn(jax.nn.relu(conv(y, w2, b2, 1)), s2, t2))
    y = pool(bn(jax.nn.relu(conv(y, w3, b3, 1)), s3, t3))
    y = y.reshape(y.shape[0], -1)
    return jax.nn.relu(y @ wfc.T + bfc)


if __name__ == "__main__":
    key = jax.random.PRNGKey(0)
    kx, kp = jax.random.split(key)
    x = jax.random.normal(kx, (2, 1, 32, 32), dtype=jnp.float32)
    pt_params = make_params(kp)

    y = jax.block_until_ready(pasanet_forward(x, pt_params))
    y_ref = jax.block_until_ready(reference_forward(x, pt_params))

    err = float(jnp.max(jnp.abs(y - y_ref)))
    assert y.shape == (2, 4), y.shape
    assert err < 1e-3, f"mismatch vs JAX reference: max abs err = {err}"
    print("KERNEL_OK")
</pallas_src>

<mosaic_0001>
module attributes {stable_mosaic.version = 11 : i64} {
  func.func @pasanet_kernel(%arg0: i32, %arg1: memref<72x36xf32, #tpu.memory_space<vmem>>, %arg2: memref<3x36x272xf32, #tpu.memory_space<vmem>>, %arg3: memref<1x272xf32, #tpu.memory_space<vmem>>, %arg4: memref<1x272xf32, #tpu.memory_space<vmem>>, %arg5: memref<1x272xf32, #tpu.memory_space<vmem>>, %arg6: memref<272x136xf32, #tpu.memory_space<vmem>>, %arg7: memref<272x136xf32, #tpu.memory_space<vmem>>, %arg8: memref<38x69xf32, #tpu.memory_space<vmem>>, %arg9: memref<3x136x544xf32, #tpu.memory_space<vmem>>, %arg10: memref<1x544xf32, #tpu.memory_space<vmem>>, %arg11: memref<1x544xf32, #tpu.memory_space<vmem>>, %arg12: memref<1x544xf32, #tpu.memory_space<vmem>>, %arg13: memref<544x256xf32, #tpu.memory_space<vmem>>, %arg14: memref<544x256xf32, #tpu.memory_space<vmem>>, %arg15: memref<20x35xf32, #tpu.memory_space<vmem>>, %arg16: memref<3x256x128xf32, #tpu.memory_space<vmem>>, %arg17: memref<1x128xf32, #tpu.memory_space<vmem>>, %arg18: memref<1x128xf32, #tpu.memory_space<vmem>>, %arg19: memref<1x128xf32, #tpu.memory_space<vmem>>, %arg20: memref<128x64xf32, #tpu.memory_space<vmem>>, %arg21: memref<128x64xf32, #tpu.memory_space<vmem>>, %arg22: memref<4x2x17xf32, #tpu.memory_space<vmem>>, %arg23: memref<4x64x4xf32, #tpu.memory_space<vmem>>, %arg24: memref<1x4xf32, #tpu.memory_space<vmem>>, %arg25: memref<2x4xf32, #tpu.memory_space<vmem>>) attributes {dimension_semantics = [#tpu.dimension_semantics<parallel>], iteration_bounds = array<i64: 1>, scalar_prefetch = 0 : i64, scratch_operands = 0 : i64, tpu.core_type = #tpu.core_type<tc>, window_params = [{transform_indices = @transform_0, window_bounds = array<i64: 72, 36>}, {pipeline_mode = #tpu.pipeline_mode<synchronous>, transform_indices = @transform_1, window_bounds = array<i64: 3, 36, 272>}, {pipeline_mode = #tpu.pipeline_mode<synchronous>, transform_indices = @transform_2, window_bounds = array<i64: 1, 272>}, {pipeline_mode = #tpu.pipeline_mode<synchronous>, transform_indices = @transform_3, window_bounds = array<i64: 1, 272>}, {pipeline_mode = #tpu.pipeline_mode<synchronous>, transform_indices = @transform_4, window_bounds = array<i64: 1, 272>}, {pipeline_mode = #tpu.pipeline_mode<synchronous>, transform_indices = @transform_5, window_bounds = array<i64: 272, 136>}, {pipeline_mode = #tpu.pipeline_mode<synchronous>, transform_indices = @transform_6, window_bounds = array<i64: 272, 136>}, {pipeline_mode = #tpu.pipeline_mode<synchronous>, transform_indices = @transform_7, window_bounds = array<i64: 38, 69>}, {pipeline_mode = #tpu.pipeline_mode<synchronous>, transform_indices = @transform_8, window_bounds = array<i64: 3, 136, 544>}, {pipeline_mode = #tpu.pipeline_mode<synchronous>, transform_indices = @transform_9, window_bounds = array<i64: 1, 544>}, {pipeline_mode = #tpu.pipeline_mode<synchronous>, transform_indices = @transform_10, window_bounds = array<i64: 1, 544>}, {pipeline_mode = #tpu.pipeline_mode<synchronous>, transform_indices = @transform_11, window_bounds = array<i64: 1, 544>}, {pipeline_mode = #tpu.pipeline_mode<synchronous>, transform_indices = @transform_12, window_bounds = array<i64: 544, 256>}, {pipeline_mode = #tpu.pipeline_mode<synchronous>, transform_indices = @transform_13, window_bounds = array<i64: 544, 256>}, {pipeline_mode = #tpu.pipeline_mode<synchronous>, transform_indices = @transform_14, window_bounds = array<i64: 20, 35>}, {pipeline_mode = #tpu.pipeline_mode<synchronous>, transform_indices = @transform_15, window_bounds = array<i64: 3, 256, 128>}, {pipeline_mode = #tpu.pipeline_mode<synchronous>, transform_indices = @transform_16, window_bounds = array<i64: 1, 128>}, {pipeline_mode = #tpu.pipeline_mode<synchronous>, transform_indices = @transform_17, window_bounds = array<i64: 1, 128>}, {pipeline_mode = #tpu.pipeline_mode<synchronous>, transform_indices = @transform_18, window_bounds = array<i64: 1, 128>}, {pipeline_mode = #tpu.pipeline_mode<synchronous>, transform_indices = @transform_19, window_bounds = array<i64: 128, 64>}, {pipeline_mode = #tpu.pipeline_mode<synchronous>, transform_indices = @transform_20, window_bounds = array<i64: 128, 64>}, {pipeline_mode = #tpu.pipeline_mode<synchronous>, transform_indices = @transform_21, window_bounds = array<i64: 4, 2, 17>}, {pipeline_mode = #tpu.pipeline_mode<synchronous>, transform_indices = @transform_22, window_bounds = array<i64: 4, 64, 4>}, {pipeline_mode = #tpu.pipeline_mode<synchronous>, transform_indices = @transform_23, window_bounds = array<i64: 1, 4>}, {transform_indices = @transform_24, window_bounds = array<i64: 2, 4>}]} {
    %c0 = arith.constant 0 : index
    %c0_0 = arith.constant 0 : index
    %0 = vector.load %arg1[%c0, %c0_0] : memref<72x36xf32, #tpu.memory_space<vmem>>, vector<72x36xf32>
    %1 = vector.extract_strided_slice %0 {offsets = [0, 0], sizes = [70, 36], strides = [1, 1]} : vector<72x36xf32> to vector<70x36xf32>
    %c0_1 = arith.constant 0 : index
    %c0_2 = arith.constant 0 : index
    %c0_3 = arith.constant 0 : index
    %2 = vector.load %arg2[%c0_1, %c0_2, %c0_3] : memref<3x36x272xf32, #tpu.memory_space<vmem>>, vector<1x36x272xf32>
    %3 = vector.shape_cast %2 : vector<1x36x272xf32> to vector<36x272xf32>
    %cst = arith.constant dense<0.000000e+00> : vector<70x272xf32>
    %4 = tpu.matmul %1, %3, %cst {dimension_numbers = #tpu.dot_dimension_numbers<[1], [0], [0], [1], [0, 0, 1, 1], [], []>} : vector<70x36xf32>, vector<36x272xf32>, vector<70x272xf32> -> vector<70x272xf32>
    %5 = vector.extract_strided_slice %0 {offsets = [1, 0], sizes = [70, 36], strides = [1, 1]} : vector<72x36xf32> to vector<70x36xf32>
    %c1 = arith.constant 1 : index
    %c0_4 = arith.constant 0 : index
    %c0_5 = arith.constant 0 : index
    %6 = vector.load %arg2[%c1, %c0_4, %c0_5] : memref<3x36x272xf32, #tpu.memory_space<vmem>>, vector<1x36x272xf32>
    %7 = vector.shape_cast %6 : vector<1x36x272xf32> to vector<36x272xf32>
    %cst_6 = arith.constant dense<0.000000e+00> : vector<70x272xf32>
    %8 = tpu.matmul %5, %7, %cst_6 {dimension_numbers = #tpu.dot_dimension_numbers<[1], [0], [0], [1], [0, 0, 1, 1], [], []>} : vector<70x36xf32>, vector<36x272xf32>, vector<70x272xf32> -> vector<70x272xf32>
    %9 = arith.addf %4, %8 : vector<70x272xf32>
    %10 = vector.extract_strided_slice %0 {offsets = [2, 0], sizes = [70, 36], strides = [1, 1]} : vector<72x36xf32> to vector<70x36xf32>
    %c2 = arith.constant 2 : index
    %c0_7 = arith.constant 0 : index
    %c0_8 = arith.constant 0 : index
    %11 = vector.load %arg2[%c2, %c0_7, %c0_8] : memref<3x36x272xf32, #tpu.memory_space<vmem>>, vector<1x36x272xf32>
    %12 = vector.shape_cast %11 : vector<1x36x272xf32> to vector<36x272xf32>
    %cst_9 = arith.constant dense<0.000000e+00> : vector<70x272xf32>
    %13 = tpu.matmul %10, %12, %cst_9 {dimension_numbers = #tpu.dot_dimension_numbers<[1], [0], [0], [1], [0, 0, 1, 1], [], []>} : vector<70x36xf32>, vector<36x272xf32>, vector<70x272xf32> -> vector<70x272xf32>
    %14 = arith.addf %9, %13 : vector<70x272xf32>
    %c0_10 = arith.constant 0 : index
    %c0_11 = arith.constant 0 : index
    %15 = vector.load %arg3[%c0_10, %c0_11] : memref<1x272xf32, #tpu.memory_space<vmem>>, vector<1x272xf32>
    %16 = vector.broadcast %15 : vector<1x272xf32> to vector<70x272xf32>
    %17 = arith.addf %14, %16 : vector<70x272xf32>
    %cst_12 = arith.constant 0.000000e+00 : f32
    %18 = vector.broadcast %cst_12 : f32 to vector<70x272xf32>
    %19 = arith.maximumf %17, %18 : vector<70x272xf32>
    %c0_13 = arith.constant 0 : index
    %c0_14 = arith.constant 0 : index
    %20 = vector.load %arg4[%c0_13, %c0_14] : memref<1x272xf32, #tpu.memory_space<vmem>>, vector<1x272xf32>
    %21 = vector.broadcast %20 : vector<1x272xf32> to vector<70x272xf32>
    %22 = arith.mulf %19, %21 : vector<70x272xf32>
    %c0_15 = arith.constant 0 : index
    %c0_16 = arith.constant 0 : index
    %23 = vector.load %arg5[%c0_15, %c0_16] : memref<1x272xf32, #tpu.memory_space<vmem>>, vector<1x272xf32>
    %24 = vector.broadcast %23 : vector<1x272xf32> to vector<70x272xf32>
    %25 = arith.addf %22, %24 : vector<70x272xf32>
    %26 = vector.extract_strided_slice %25 {offsets = [0, 0], sizes = [69, 272], strides = [1, 1]} : vector<70x272xf32> to vector<69x272xf32>
    %27 = vector.extract_strided_slice %25 {offsets = [1, 0], sizes = [69, 272], strides = [1, 1]} : vector<70x272xf32> to vector<69x272xf32>
    %28 = arith.maximumf %26, %27 : vector<69x272xf32>
    %c0_17 = arith.constant 0 : index
    %c0_18 = arith.constant 0 : index
    %29 = vector.load %arg6[%c0_17, %c0_18] : memref<272x136xf32, #tpu.memory_space<vmem>>, vector<272x136xf32>
    %cst_19 = arith.constant dense<0.000000e+00> : vector<69x136xf32>
    %30 = tpu.matmul %28, %29, %cst_19 {dimension_numbers = #tpu.dot_dimension_numbers<[1], [0], [0], [1], [0, 0, 1, 1], [], []>} : vector<69x272xf32>, vector<272x136xf32>, vector<69x136xf32> -> vector<69x136xf32>
    %c0_20 = arith.constant 0 : index
    %c0_21 = arith.constant 0 : index
    %31 = vector.load %arg7[%c0_20, %c0_21] : memref<272x136xf32, #tpu.memory_space<vmem>>, vector<272x136xf32>
    %cst_22 = arith.constant dense<0.000000e+00> : vector<69x136xf32>
    %32 = tpu.matmul %28, %31, %cst_22 {dimension_numbers = #tpu.dot_dimension_numbers<[1], [0], [0], [1], [0, 0, 1, 1], [], []>} : vector<69x272xf32>, vector<272x136xf32>, vector<69x136xf32> -> vector<69x136xf32>
    %33 = arith.maximumf %30, %32 : vector<69x136xf32>
    %c0_23 = arith.constant 0 : index
    %c0_24 = arith.constant 0 : index
    %34 = vector.load %arg8[%c0_23, %c0_24] : memref<38x69xf32, #tpu.memory_space<vmem>>, vector<38x69xf32>
    %cst_25 = arith.constant dense<0.000000e+00> : vector<38x136xf32>
    %35 = tpu.matmul %34, %33, %cst_25 {dimension_numbers = #tpu.dot_dimension_numbers<[1], [0], [0], [1], [0, 0, 1, 1], [], []>} : vector<38x69xf32>, vector<69x136xf32>, vector<38x136xf32> -> vector<38x136xf32>
    %36 = vector.extract_strided_slice %35 {offsets = [0, 0], sizes = [36, 136], strides = [1, 1]} : vector<38x136xf32> to vector<36x136xf32>
    %c0_26 = arith.constant 0 : index
    %c0_27 = arith.constant 0 : index
    %c0_28 = arith.constant 0 : index
    %37 = vector.load %arg9[%c0_26, %c0_27, %c0_28] : memref<3x136x544xf32, #tpu.memory_space<vmem>>, vector<1x136x544xf32>
    %38 = vector.shape_cast %37 : vector<1x136x544xf32> to vector<136x544xf32>
    %cst_29 = arith.constant dense<0.000000e+00> : vector<36x544xf32>
    %39 = tpu.matmul %36, %38, %cst_29 {dimension_numbers = #tpu.dot_dimension_numbers<[1], [0], [0], [1], [0, 0, 1, 1], [], []>} : vector<36x136xf32>, vector<136x544xf32>, vector<36x544xf32> -> vector<36x544xf32>
    %40 = vector.extract_strided_slice %35 {offsets = [1, 0], sizes = [36, 136], strides = [1, 1]} : vector<38x136xf32> to vector<36x136xf32>
    %c1_30 = arith.constant 1 : index
    %c0_31 = arith.constant 0 : index
    %c0_32 = arith.constant 0 : index
    %41 = vector.load %arg9[%c1_30, %c0_31, %c0_32] : memref<3x136x544xf32, #tpu.memory_space<vmem>>, vector<1x136x544xf32>
    %42 = vector.shape_cast %41 : vector<1x136x544xf32> to vector<136x544xf32>
    %cst_33 = arith.constant dense<0.000000e+00> : vector<36x544xf32>
    %43 = tpu.matmul %40, %42, %cst_33 {dimension_numbers = #tpu.dot_dimension_numbers<[1], [0], [0], [1], [0, 0, 1, 1], [], []>} : vector<36x136xf32>, vector<136x544xf32>, vector<36x544xf32> -> vector<36x544xf32>
    %44 = arith.addf %39, %43 : vector<36x544xf32>
    %45 = vector.extract_strided_slice %35 {offsets = [2, 0], sizes = [36, 136], strides = [1, 1]} : vector<38x136xf32> to vector<36x136xf32>
    %c2_34 = arith.constant 2 : index
    %c0_35 = arith.constant 0 : index
    %c0_36 = arith.constant 0 : index
    %46 = vector.load %arg9[%c2_34, %c0_35, %c0_36] : memref<3x136x544xf32, #tpu.memory_space<vmem>>, vector<1x136x544xf32>
    %47 = vector.shape_cast %46 : vector<1x136x544xf32> to vector<136x544xf32>
    %cst_37 = arith.constant dense<0.000000e+00> : vector<36x544xf32>
    %48 = tpu.matmul %45, %47, %cst_37 {dimension_numbers = #tpu.dot_dimension_numbers<[1], [0], [0], [1], [0, 0, 1, 1], [], []>} : vector<36x136xf32>, vector<136x544xf32>, vector<36x544xf32> -> vector<36x544xf32>
    %49 = arith.addf %44, %48 : vector<36x544xf32>
    %c0_38 = arith.constant 0 : index
    %c0_39 = arith.constant 0 : index
    %50 = vector.load %arg10[%c0_38, %c0_39] : memref<1x544xf32, #tpu.memory_space<vmem>>, vector<1x544xf32>
    %51 = vector.broadcast %50 : vector<1x544xf32> to vector<36x544xf32>
    %52 = arith.addf %49, %51 : vector<36x544xf32>
    %cst_40 = arith.constant 0.000000e+00 : f32
    %53 = vector.broadcast %cst_40 : f32 to vector<36x544xf32>
    %54 = arith.maximumf %52, %53 : vector<36x544xf32>
    %c0_41 = arith.constant 0 : index
    %c0_42 = arith.constant 0 : index
    %55 = vector.load %arg11[%c0_41, %c0_42] : memref<1x544xf32, #tpu.memory_space<vmem>>, vector<1x544xf32>
    %56 = vector.broadcast %55 : vector<1x544xf32> to vector<36x544xf32>
    %57 = arith.mulf %54, %56 : vector<36x544xf32>
    %c0_43 = arith.constant 0 : index
    %c0_44 = arith.constant 0 : index
    %58 = vector.load %arg12[%c0_43, %c0_44] : memref<1x544xf32, #tpu.memory_space<vmem>>, vector<1x544xf32>
    %59 = vector.broadcast %58 : vector<1x544xf32> to vector<36x544xf32>
    %60 = arith.addf %57, %59 : vector<36x544xf32>
    %61 = vector.extract_strided_slice %60 {offsets = [0, 0], sizes = [35, 544], strides = [1, 1]} : vector<36x544xf32> to vector<35x544xf32>
    %62 = vector.extract_strided_slice %60 {offsets = [1, 0], sizes = [35, 544], strides = [1, 1]} : vector<36x544xf32> to vector<35x544xf32>
    %63 = arith.maximumf %61, %62 : vector<35x544xf32>
    %c0_45 = arith.constant 0 : index
    %c0_46 = arith.constant 0 : index
    %64 = vector.load %arg13[%c0_45, %c0_46] : memref<544x256xf32, #tpu.memory_space<vmem>>, vector<544x256xf32>
    %cst_47 = arith.constant dense<0.000000e+00> : vector<35x256xf32>
    %65 = tpu.matmul %63, %64, %cst_47 {dimension_numbers = #tpu.dot_dimension_numbers<[1], [0], [0], [1], [0, 0, 1, 1], [], []>} : vector<35x544xf32>, vector<544x256xf32>, vector<35x256xf32> -> vector<35x256xf32>
    %c0_48 = arith.constant 0 : index
    %c0_49 = arith.constant 0 : index
    %66 = vector.load %arg14[%c0_48, %c0_49] : memref<544x256xf32, #tpu.memory_space<vmem>>, vector<544x256xf32>
    %cst_50 = arith.constant dense<0.000000e+00> : vector<35x256xf32>
    %67 = tpu.matmul %63, %66, %cst_50 {dimension_numbers = #tpu.dot_dimension_numbers<[1], [0], [0], [1], [0, 0, 1, 1], [], []>} : vector<35x544xf32>, vector<544x256xf32>, vector<35x256xf32> -> vector<35x256xf32>
    %68 = arith.maximumf %65, %67 : vector<35x256xf32>
    %c0_51 = arith.constant 0 : index
    %c0_52 = arith.constant 0 : index
    %69 = vector.load %arg15[%c0_51, %c0_52] : memref<20x35xf32, #tpu.memory_space<vmem>>, vector<20x35xf32>
    %cst_53 = arith.constant dense<0.000000e+00> : vector<20x256xf32>
    %70 = tpu.matmul %69, %68, %cst_53 {dimension_numbers = #tpu.dot_dimension_numbers<[1], [0], [0], [1], [0, 0, 1, 1], [], []>} : vector<20x35xf32>, vector<35x256xf32>, vector<20x256xf32> -> vector<20x256xf32>
    %71 = vector.extract_strided_slice %70 {offsets = [0, 0], sizes = [18, 256], strides = [1, 1]} : vector<20x256xf32> to vector<18x256xf32>
    %c0_54 = arith.constant 0 : index
    %c0_55 = arith.constant 0 : index
    %c0_56 = arith.constant 0 : index
    %72 = vector.load %arg16[%c0_54, %c0_55, %c0_56] : memref<3x256x128xf32, #tpu.memory_space<vmem>>, vector<1x256x128xf32>
    %73 = vector.shape_cast %72 : vector<1x256x128xf32> to vector<256x128xf32>
    %cst_57 = arith.constant dense<0.000000e+00> : vector<18x128xf32>
    %74 = tpu.matmul %71, %73, %cst_57 {dimension_numbers = #tpu.dot_dimension_numbers<[1], [0], [0], [1], [0, 0, 1, 1], [], []>} : vector<18x256xf32>, vector<256x128xf32>, vector<18x128xf32> -> vector<18x128xf32>
    %75 = vector.extract_strided_slice %70 {offsets = [1, 0], sizes = [18, 256], strides = [1, 1]} : vector<20x256xf32> to vector<18x256xf32>
    %c1_58 = arith.constant 1 : index
    %c0_59 = arith.constant 0 : index
    %c0_60 = arith.constant 0 : index
    %76 = vector.load %arg16[%c1_58, %c0_59, %c0_60] : memref<3x256x128xf32, #tpu.memory_space<vmem>>, vector<1x256x128xf32>
    %77 = vector.shape_cast %76 : vector<1x256x128xf32> to vector<256x128xf32>
    %cst_61 = arith.constant dense<0.000000e+00> : vector<18x128xf32>
    %78 = tpu.matmul %75, %77, %cst_61 {dimension_numbers = #tpu.dot_dimension_numbers<[1], [0], [0], [1], [0, 0, 1, 1], [], []>} : vector<18x256xf32>, vector<256x128xf32>, vector<18x128xf32> -> vector<18x128xf32>
    %79 = arith.addf %74, %78 : vector<18x128xf32>
    %80 = vector.extract_strided_slice %70 {offsets = [2, 0], sizes = [18, 256], strides = [1, 1]} : vector<20x256xf32> to vector<18x256xf32>
    %c2_62 = arith.constant 2 : index
    %c0_63 = arith.constant 0 : index
    %c0_64 = arith.constant 0 : index
    %81 = vector.load %arg16[%c2_62, %c0_63, %c0_64] : memref<3x256x128xf32, #tpu.memory_space<vmem>>, vector<1x256x128xf32>
    %82 = vector.shape_cast %81 : vector<1x256x128xf32> to vector<256x128xf32>
    %cst_65 = arith.constant dense<0.000000e+00> : vector<18x128xf32>
    %83 = tpu.matmul %80, %82, %cst_65 {dimension_numbers = #tpu.dot_dimension_numbers<[1], [0], [0], [1], [0, 0, 1, 1], [], []>} : vector<18x256xf32>, vector<256x128xf32>, vector<18x128xf32> -> vector<18x128xf32>
    %84 = arith.addf %79, %83 : vector<18x128xf32>
    %c0_66 = arith.constant 0 : index
    %c0_67 = arith.constant 0 : index
    %85 = vector.load %arg17[%c0_66, %c0_67] : memref<1x128xf32, #tpu.memory_space<vmem>>, vector<1x128xf32>
    %86 = vector.broadcast %85 : vector<1x128xf32> to vector<18x128xf32>
    %87 = arith.addf %84, %86 : vector<18x128xf32>
    %cst_68 = arith.constant 0.000000e+00 : f32
    %88 = vector.broadcast %cst_68 : f32 to vector<18x128xf32>
    %89 = arith.maximumf %87, %88 : vector<18x128xf32>
    %c0_69 = arith.constant 0 : index
    %c0_70 = arith.constant 0 : index
    %90 = vector.load %arg18[%c0_69, %c0_70] : memref<1x128xf32, #tpu.memory_space<vmem>>, vector<1x128xf32>
    %91 = vector.broadcast %90 : vector<1x128xf32> to vector<18x128xf32>
    %92 = arith.mulf %89, %91 : vector<18x128xf32>
    %c0_71 = arith.constant 0 : index
    %c0_72 = arith.constant 0 : index
    %93 = vector.load %arg19[%c0_71, %c0_72] : memref<1x128xf32, #tpu.memory_space<vmem>>, vector<1x128xf32>
    %94 = vector.broadcast %93 : vector<1x128xf32> to vector<18x128xf32>
    %95 = arith.addf %92, %94 : vector<18x128xf32>
    %96 = vector.extract_strided_slice %95 {offsets = [0, 0], sizes = [17, 128], strides = [1, 1]} : vector<18x128xf32> to vector<17x128xf32>
    %97 = vector.extract_strided_slice %95 {offsets = [1, 0], sizes = [17, 128], strides = [1, 1]} : vector<18x128xf32> to vector<17x128xf32>
    %98 = arith.maximumf %96, %97 : vector<17x128xf32>
    %c0_73 = arith.constant 0 : index
    %c0_74 = arith.constant 0 : index
    %99 = vector.load %arg20[%c0_73, %c0_74] : memref<128x64xf32, #tpu.memory_space<vmem>>, vector<128x64xf32>
    %cst_75 = arith.constant dense<0.000000e+00> : vector<17x64xf32>
    %100 = tpu.matmul %98, %99, %cst_75 {dimension_numbers = #tpu.dot_dimension_numbers<[1], [0], [0], [1], [0, 0, 1, 1], [], []>} : vector<17x128xf32>, vector<128x64xf32>, vector<17x64xf32> -> vector<17x64xf32>
    %c0_76 = arith.constant 0 : index
    %c0_77 = arith.constant 0 : index
    %101 = vector.load %arg21[%c0_76, %c0_77] : memref<128x64xf32, #tpu.memory_space<vmem>>, vector<128x64xf32>
    %cst_78 = arith.constant dense<0.000000e+00> : vector<17x64xf32>
    %102 = tpu.matmul %98, %101, %cst_78 {dimension_numbers = #tpu.dot_dimension_numbers<[1], [0], [0], [1], [0, 0, 1, 1], [], []>} : vector<17x128xf32>, vector<128x64xf32>, vector<17x64xf32> -> vector<17x64xf32>
    %103 = arith.maximumf %100, %102 : vector<17x64xf32>
    %cst_79 = arith.constant 0.000000e+00 : f32
    %104 = vector.broadcast %cst_79 : f32 to vector<2x4xf32>
    %c0_80 = arith.constant 0 : index
    %c0_81 = arith.constant 0 : index
    %c0_82 = arith.constant 0 : index
    %105 = vector.load %arg22[%c0_80, %c0_81, %c0_82] : memref<4x2x17xf32, #tpu.memory_space<vmem>>, vector<1x2x17xf32>
    %106 = vector.shape_cast %105 : vector<1x2x17xf32> to vector<2x17xf32>
    %cst_83 = arith.constant dense<0.000000e+00> : vector<2x64xf32>
    %107 = tpu.matmul %106, %103, %cst_83 {dimension_numbers = #tpu.dot_dimension_numbers<[1], [0], [0], [1], [0, 0, 1, 1], [], []>} : vector<2x17xf32>, vector<17x64xf32>, vector<2x64xf32> -> vector<2x64xf32>
    %c0_84 = arith.constant 0 : index
    %c0_85 = arith.constant 0 : index
    %c0_86 = arith.constant 0 : index
    %108 = vector.load %arg23[%c0_84, %c0_85, %c0_86] : memref<4x64x4xf32, #tpu.memory_space<vmem>>, vector<1x64x4xf32>
    %109 = vector.shape_cast %108 : vector<1x64x4xf32> to vector<64x4xf32>
    %cst_87 = arith.constant dense<0.000000e+00> : vector<2x4xf32>
    %110 = tpu.matmul %107, %109, %cst_87 {dimension_numbers = #tpu.dot_dimension_numbers<[1], [0], [0], [1], [0, 0, 1, 1], [], []>} : vector<2x64xf32>, vector<64x4xf32>, vector<2x4xf32> -> vector<2x4xf32>
    %111 = arith.addf %104, %110 : vector<2x4xf32>
    %c1_88 = arith.constant 1 : index
    %c0_89 = arith.constant 0 : index
    %c0_90 = arith.constant 0 : index
    %112 = vector.load %arg22[%c1_88, %c0_89, %c0_90] : memref<4x2x17xf32, #tpu.memory_space<vmem>>, vector<1x2x17xf32>
    %113 = vector.shape_cast %112 : vector<1x2x17xf32> to vector<2x17xf32>
    %cst_91 = arith.constant dense<0.000000e+00> : vector<2x64xf32>
    %114 = tpu.matmul %113, %103, %cst_91 {dimension_numbers = #tpu.dot_dimension_numbers<[1], [0], [0], [1], [0, 0, 1, 1], [], []>} : vector<2x17xf32>, vector<17x64xf32>, vector<2x64xf32> -> vector<2x64xf32>
    %c1_92 = arith.constant 1 : index
    %c0_93 = arith.constant 0 : index
    %c0_94 = arith.constant 0 : index
    %115 = vector.load %arg23[%c1_92, %c0_93, %c0_94] : memref<4x64x4xf32, #tpu.memory_space<vmem>>, vector<1x64x4xf32>
    %116 = vector.shape_cast %115 : vector<1x64x4xf32> to vector<64x4xf32>
    %cst_95 = arith.constant dense<0.000000e+00> : vector<2x4xf32>
    %117 = tpu.matmul %114, %116, %cst_95 {dimension_numbers = #tpu.dot_dimension_numbers<[1], [0], [0], [1], [0, 0, 1, 1], [], []>} : vector<2x64xf32>, vector<64x4xf32>, vector<2x4xf32> -> vector<2x4xf32>
    %118 = arith.addf %111, %117 : vector<2x4xf32>
    %c2_96 = arith.constant 2 : index
    %c0_97 = arith.constant 0 : index
    %c0_98 = arith.constant 0 : index
    %119 = vector.load %arg22[%c2_96, %c0_97, %c0_98] : memref<4x2x17xf32, #tpu.memory_space<vmem>>, vector<1x2x17xf32>
    %120 = vector.shape_cast %119 : vector<1x2x17xf32> to vector<2x17xf32>
    %cst_99 = arith.constant dense<0.000000e+00> : vector<2x64xf32>
    %121 = tpu.matmul %120, %103, %cst_99 {dimension_numbers = #tpu.dot_dimension_numbers<[1], [0], [0], [1], [0, 0, 1, 1], [], []>} : vector<2x17xf32>, vector<17x64xf32>, vector<2x64xf32> -> vector<2x64xf32>
    %c2_100 = arith.constant 2 : index
    %c0_101 = arith.constant 0 : index
    %c0_102 = arith.constant 0 : index
    %122 = vector.load %arg23[%c2_100, %c0_101, %c0_102] : memref<4x64x4xf32, #tpu.memory_space<vmem>>, vector<1x64x4xf32>
    %123 = vector.shape_cast %122 : vector<1x64x4xf32> to vector<64x4xf32>
    %cst_103 = arith.constant dense<0.000000e+00> : vector<2x4xf32>
    %124 = tpu.matmul %121, %123, %cst_103 {dimension_numbers = #tpu.dot_dimension_numbers<[1], [0], [0], [1], [0, 0, 1, 1], [], []>} : vector<2x64xf32>, vector<64x4xf32>, vector<2x4xf32> -> vector<2x4xf32>
    %125 = arith.addf %118, %124 : vector<2x4xf32>
    %c3 = arith.constant 3 : index
    %c0_104 = arith.constant 0 : index
    %c0_105 = arith.constant 0 : index
    %126 = vector.load %arg22[%c3, %c0_104, %c0_105] : memref<4x2x17xf32, #tpu.memory_space<vmem>>, vector<1x2x17xf32>
    %127 = vector.shape_cast %126 : vector<1x2x17xf32> to vector<2x17xf32>
    %cst_106 = arith.constant dense<0.000000e+00> : vector<2x64xf32>
    %128 = tpu.matmul %127, %103, %cst_106 {dimension_numbers = #tpu.dot_dimension_numbers<[1], [0], [0], [1], [0, 0, 1, 1], [], []>} : vector<2x17xf32>, vector<17x64xf32>, vector<2x64xf32> -> vector<2x64xf32>
    %c3_107 = arith.constant 3 : index
    %c0_108 = arith.constant 0 : index
    %c0_109 = arith.constant 0 : index
    %129 = vector.load %arg23[%c3_107, %c0_108, %c0_109] : memref<4x64x4xf32, #tpu.memory_space<vmem>>, vector<1x64x4xf32>
    %130 = vector.shape_cast %129 : vector<1x64x4xf32> to vector<64x4xf32>
    %cst_110 = arith.constant dense<0.000000e+00> : vector<2x4xf32>
    %131 = tpu.matmul %128, %130, %cst_110 {dimension_numbers = #tpu.dot_dimension_numbers<[1], [0], [0], [1], [0, 0, 1, 1], [], []>} : vector<2x64xf32>, vector<64x4xf32>, vector<2x4xf32> -> vector<2x4xf32>
    %132 = arith.addf %125, %131 : vector<2x4xf32>
    %c0_111 = arith.constant 0 : index
    %c0_112 = arith.constant 0 : index
    %133 = vector.load %arg24[%c0_111, %c0_112] : memref<1x4xf32, #tpu.memory_space<vmem>>, vector<1x4xf32>
    %134 = vector.broadcast %133 : vector<1x4xf32> to vector<2x4xf32>
    %135 = arith.addf %132, %134 : vector<2x4xf32>
    %cst_113 = arith.constant 0.000000e+00 : f32
    %136 = vector.broadcast %cst_113 : f32 to vector<2x4xf32>
    %137 = arith.maximumf %135, %136 : vector<2x4xf32>
    %c0_114 = arith.constant 0 : index
    %c0_115 = arith.constant 0 : index
    %138 = vector.load %arg25[%c0_114, %c0_115] : memref<2x4xf32, #tpu.memory_space<vmem>>, vector<2x4xf32>
    tpu.vector_store %arg25[%c0_114, %c0_115], %137 {strides = array<i32>} : memref<2x4xf32, #tpu.memory_space<vmem>>, vector<2x4xf32>,
    return
  }
  func.func @transform_0(%arg0: i32) -> (i32, i32) {
    %c0_i32 = arith.constant 0 : i32
    %c0_i32_0 = arith.constant 0 : i32
    return %arg0, %c0_i32 : i32, i32
  }
  func.func @transform_1(%arg0: i32) -> (i32, i32, i32) {
    %c0_i32 = arith.constant 0 : i32
    %c0_i32_0 = arith.constant 0 : i32
    %c0_i32_1 = arith.constant 0 : i32
    %c0_i32_2 = arith.constant 0 : i32
    return %c0_i32, %c0_i32_0, %c0_i32_1 : i32, i32, i32
  }
  func.func @transform_2(%arg0: i32) -> (i32, i32) {
    %c0_i32 = arith.constant 0 : i32
    %c0_i32_0 = arith.constant 0 : i32
    %c0_i32_1 = arith.constant 0 : i32
    return %c0_i32, %c0_i32_0 : i32, i32
  }
  func.func @transform_3(%arg0: i32) -> (i32, i32) {
    %c0_i32 = arith.constant 0 : i32
    %c0_i32_0 = arith.constant 0 : i32
    %c0_i32_1 = arith.constant 0 : i32
    return %c0_i32, %c0_i32_0 : i32, i32
  }
  func.func @transform_4(%arg0: i32) -> (i32, i32) {
    %c0_i32 = arith.constant 0 : i32
    %c0_i32_0 = arith.constant 0 : i32
    %c0_i32_1 = arith.constant 0 : i32
    return %c0_i32, %c0_i32_0 : i32, i32
  }
  func.func @transform_5(%arg0: i32) -> (i32, i32) {
    %c0_i32 = arith.constant 0 : i32
    %c0_i32_0 = arith.constant 0 : i32
    %c0_i32_1 = arith.constant 0 : i32
    return %c0_i32, %c0_i32_0 : i32, i32
  }
  func.func @transform_6(%arg0: i32) -> (i32, i32) {
    %c0_i32 = arith.constant 0 : i32
    %c0_i32_0 = arith.constant 0 : i32
    %c0_i32_1 = arith.constant 0 : i32
    return %c0_i32, %c0_i32_0 : i32, i32
  }
  func.func @transform_7(%arg0: i32) -> (i32, i32) {
    %c0_i32 = arith.constant 0 : i32
    %c0_i32_0 = arith.constant 0 : i32
    %c0_i32_1 = arith.constant 0 : i32
    return %c0_i32, %c0_i32_0 : i32, i32
  }
  func.func @transform_8(%arg0: i32) -> (i32, i32, i32) {
    %c0_i32 = arith.constant 0 : i32
    %c0_i32_0 = arith.constant 0 : i32
    %c0_i32_1 = arith.constant 0 : i32
    %c0_i32_2 = arith.constant 0 : i32
    return %c0_i32, %c0_i32_0, %c0_i32_1 : i32, i32, i32
  }
  func.func @transform_9(%arg0: i32) -> (i32, i32) {
    %c0_i32 = arith.constant 0 : i32
    %c0_i32_0 = arith.constant 0 : i32
    %c0_i32_1 = arith.constant 0 : i32
    return %c0_i32, %c0_i32_0 : i32, i32
  }
  func.func @transform_10(%arg0: i32) -> (i32, i32) {
    %c0_i32 = arith.constant 0 : i32
    %c0_i32_0 = arith.constant 0 : i32
    %c0_i32_1 = arith.constant 0 : i32
    return %c0_i32, %c0_i32_0 : i32, i32
  }
  func.func @transform_11(%arg0: i32) -> (i32, i32) {
    %c0_i32 = arith.constant 0 : i32
    %c0_i32_0 = arith.constant 0 : i32
    %c0_i32_1 = arith.constant 0 : i32
    return %c0_i32, %c0_i32_0 : i32, i32
  }
  func.func @transform_12(%arg0: i32) -> (i32, i32) {
    %c0_i32 = arith.constant 0 : i32
    %c0_i32_0 = arith.constant 0 : i32
    %c0_i32_1 = arith.constant 0 : i32
    return %c0_i32, %c0_i32_0 : i32, i32
  }
  func.func @transform_13(%arg0: i32) -> (i32, i32) {
    %c0_i32 = arith.constant 0 : i32
    %c0_i32_0 = arith.constant 0 : i32
    %c0_i32_1 = arith.constant 0 : i32
    return %c0_i32, %c0_i32_0 : i32, i32
  }
  func.func @transform_14(%arg0: i32) -> (i32, i32) {
    %c0_i32 = arith.constant 0 : i32
    %c0_i32_0 = arith.constant 0 : i32
    %c0_i32_1 = arith.constant 0 : i32
    return %c0_i32, %c0_i32_0 : i32, i32
  }
  func.func @transform_15(%arg0: i32) -> (i32, i32, i32) {
    %c0_i32 = arith.constant 0 : i32
    %c0_i32_0 = arith.constant 0 : i32
    %c0_i32_1 = arith.constant 0 : i32
    %c0_i32_2 = arith.constant 0 : i32
    return %c0_i32, %c0_i32_0, %c0_i32_1 : i32, i32, i32
  }
  func.func @transform_16(%arg0: i32) -> (i32, i32) {
    %c0_i32 = arith.constant 0 : i32
    %c0_i32_0 = arith.constant 0 : i32
    %c0_i32_1 = arith.constant 0 : i32
    return %c0_i32, %c0_i32_0 : i32, i32
  }
  func.func @transform_17(%arg0: i32) -> (i32, i32) {
    %c0_i32 = arith.constant 0 : i32
    %c0_i32_0 = arith.constant 0 : i32
    %c0_i32_1 = arith.constant 0 : i32
    return %c0_i32, %c0_i32_0 : i32, i32
  }
  func.func @transform_18(%arg0: i32) -> (i32, i32) {
    %c0_i32 = arith.constant 0 : i32
    %c0_i32_0 = arith.constant 0 : i32
    %c0_i32_1 = arith.constant 0 : i32
    return %c0_i32, %c0_i32_0 : i32, i32
  }
  func.func @transform_19(%arg0: i32) -> (i32, i32) {
    %c0_i32 = arith.constant 0 : i32
    %c0_i32_0 = arith.constant 0 : i32
    %c0_i32_1 = arith.constant 0 : i32
    return %c0_i32, %c0_i32_0 : i32, i32
  }
  func.func @transform_20(%arg0: i32) -> (i32, i32) {
    %c0_i32 = arith.constant 0 : i32
    %c0_i32_0 = arith.constant 0 : i32
    %c0_i32_1 = arith.constant 0 : i32
    return %c0_i32, %c0_i32_0 : i32, i32
  }
  func.func @transform_21(%arg0: i32) -> (i32, i32, i32) {
    %c0_i32 = arith.constant 0 : i32
    %c0_i32_0 = arith.constant 0 : i32
    %c0_i32_1 = arith.constant 0 : i32
    %c0_i32_2 = arith.constant 0 : i32
    return %c0_i32, %c0_i32_0, %c0_i32_1 : i32, i32, i32
  }
  func.func @transform_22(%arg0: i32) -> (i32, i32, i32) {
    %c0_i32 = arith.constant 0 : i32
    %c0_i32_0 = arith.constant 0 : i32
    %c0_i32_1 = arith.constant 0 : i32
    %c0_i32_2 = arith.constant 0 : i32
    return %c0_i32, %c0_i32_0, %c0_i32_1 : i32, i32, i32
  }
  func.func @transform_23(%arg0: i32) -> (i32, i32) {
    %c0_i32 = arith.constant 0 : i32
    %c0_i32_0 = arith.constant 0 : i32
    %c0_i32_1 = arith.constant 0 : i32
    return %c0_i32, %c0_i32_0 : i32, i32
  }
  func.func @transform_24(%arg0: i32) -> (i32, i32) {
    %c0_i32 = arith.constant 0 : i32
    %c0_i32_0 = arith.constant 0 : i32
    return %arg0, %c0_i32 : i32, i32
  }
}

</mosaic_0001>

<bundles_post_ra>
// kernel: tpu_custom_call.1
= control target key start
LH: loop header
LB: loop body
LE: loop exit
PB: predicated region body
PF: predicated region fallthrough
CT: control target
= control target key end

     0   :  { %s11274_s0 = inlined_call_operand.vmem [shape: f32[72,36], index: 0, kind: input, shape index: {}]   ;;  %s11275_s1 = inlined_call_operand.vmem [shape: f32[3,36,272], index: 1, kind: input, shape index: {}]   ;;  %s11276_s2 = inlined_call_operand.vmem [shape: f32[1,272], index: 2, kind: input, shape index: {}]   ;;  %s11277_s3 = inlined_call_operand.vmem [shape: f32[1,272], index: 3, kind: input, shape index: {}]   ;;  %s11278_s4 = inlined_call_operand.vmem [shape: f32[1,272], index: 4, kind: input, shape index: {}]   ;;  %s11279_s5 = inlined_call_operand.vmem [shape: f32[272,136], index: 5, kind: input, shape index: {}]   ;;  %s11280_s6 = inlined_call_operand.vmem [shape: f32[272,136], index: 6, kind: input, shape index: {}]   ;;  %s11281_s7 = inlined_call_operand.vmem [shape: f32[38,69], index: 7, kind: input, shape index: {}]   ;;  %s11282_s8 = inlined_call_operand.vmem [shape: f32[3,136,544], index: 8, kind: input, shape index: {}]   ;;  %s11283_s9 = inlined_call_operand.vmem [shape: f32[1,544], index: 9, kind: input, shape index: {}]   ;;  %s11284_s10 = inlined_call_operand.vmem [shape: f32[1,544], index: 10, kind: input, shape index: {}]   ;;  %s11285_s11 = inlined_call_operand.vmem [shape: f32[1,544], index: 11, kind: input, shape index: {}]   ;;  %s11286_s12 = inlined_call_operand.hbm [shape: f32[544,256], index: 12, kind: input, shape index: {}]   ;;  %s11287_s13 = inlined_call_operand.hbm [shape: f32[544,256], index: 13, kind: input, shape index: {}]   ;;  %s11288_s14 = inlined_call_operand.vmem [shape: f32[20,35], index: 14, kind: input, shape index: {}]   ;;  %s11289_s15 = inlined_call_operand.hbm [shape: f32[3,256,128], index: 15, kind: input, shape index: {}]   ;;  %s11290_s16 = inlined_call_operand.vmem [shape: f32[1,128], index: 16, kind: input, shape index: {}]   ;;  %s11291_s17 = inlined_call_operand.vmem [shape: f32[1,128], index: 17, kind: input, shape index: {}]   ;;  %s11292_s18 = inlined_call_operand.vmem [shape: f32[1,128], index: 18, kind: input, shape index: {}]   ;;  %s11293_s19 = inlined_call_operand.vmem [shape: f32[128,64], index: 19, kind: input, shape index: {}]   ;;  %s11294_s20 = inlined_call_operand.vmem [shape: f32[128,64], index: 20, kind: input, shape index: {}]   ;;  %s11295_s21 = inlined_call_operand.vmem [shape: f32[4,2,17], index: 21, kind: input, shape index: {}]   ;;  %s11296_s22 = inlined_call_operand.vmem [shape: f32[4,64,4], index: 22, kind: input, shape index: {}]   ;;  %s11297_s23 = inlined_call_operand.vmem [shape: f32[1,4], index: 23, kind: input, shape index: {}]   ;;  %s11298_s24 = inlined_call_operand.hbm [shape: f32[2,4], index: 24, kind: output, shape index: {}]  }
   0x1   :  { %11322 = sst [smem:[#allocation28_spill]] %s11274_s0 }
   0x2   :  { %11323 = sst [smem:[#allocation29_spill]] %s11275_s1 }
   0x3   :  { %11324 = sst [smem:[#allocation30_spill]] %s11276_s2 }
   0x4   :  { %11325 = sst [smem:[#allocation31_spill]] %s11277_s3 }
   0x5   :  { %11326 = sst [smem:[#allocation32_spill]] %s11278_s4 }
   0x6   :  { %11327 = sst [smem:[#allocation33_spill]] %s11279_s5 }
   0x7   :  { %11328 = sst [smem:[#allocation34_spill]] %s11280_s6 }
   0x8   :  { %11329 = sst [smem:[#allocation35_spill]] %s11281_s7 }
   0x9   :  { %11330 = sst [smem:[#allocation36_spill]] %s11282_s8 }
   0xa   :  { %29 = vsyncpa [#allocation3], 0 }
   0xb   :  { %30 = vsyncpa [#allocation6], 0 }
   0xc   :  { %31 = vsyncpa [#allocation4], 0  ;;  %s8002_s5 = smov [#allocation5]   ;;  %s8003_s27 = smov [#allocation2]  }
   0xd   :  { %s73_s26 = sshll.u32 %s8002_s5, 4  ;;  %s61_s28 = sshll.u32 %s8003_s27, 4  ;;  %s74_s26 = int_to_ptr.vmem [resolvable:$true] %s73_s26  ;;  %s8138_s28 = int_to_ptr.vmem [resolvable:$true] %s61_s28 }
   0xe   :  { %s7908_s29 = scalar_lea.hbm %s11287_s13, 17408 }
   0xf   :  { %p7909_p0 = scmp.ne.s32.totalorder %s11287_s13, %s7908_s29  ;;  %p7912_p1 = scmp.lt.u32.totalorder %s7908_s29, %s11287_s13 }
  0x11   :  { %p7914_p2 = pnand %p7912_p1, %p7909_p0 }
  0x13   :  { %7917 = shalt.err (!%p7914_p2)
}
  0x14   :  { %s7918_s25 = scalar_lea.vmem %s74_s26, 17408  ;;  %p7923_p4 = scmp.lt.s32.totalorder %s74_s26, %s74_s26 }
  0x15   :  { %p7919_p3 = scmp.ne.s32.totalorder %s74_s26, %s7918_s25  ;;  %p7924_p5 = scmp.lt.s32.totalorder %s7918_s25, %s7918_s25 }
  0x17   :  { %p7925_p6 = por %p7924_p5, %p7923_p4 }
  0x19   :  { %p7926_p7 = pnand %p7925_p6, %p7919_p3 }
  0x1b   :  { %7929 = shalt.err (!%p7926_p7)
}
  0x1c   :  { %s8004_s8 = smov 256   ;;  %s8005_s4 = smov 16  }
  0x1d   :  { %79 = dma.hbm_to_vmem [thread:$0]  %s11287_s13, 17408, %s74_s26, [#allocation6], %s8004_s8, %s8004_s8, %s8005_s4  }
  0x1e   :  { %s7930_s2 = scalar_lea.hbm %s11286_s12, 17408 }
  0x1f   :  { %p7931_p8 = scmp.ne.s32.totalorder %s11286_s12, %s7930_s2  ;;  %p7934_p9 = scmp.lt.u32.totalorder %s7930_s2, %s11286_s12 }
  0x21   :  { %p7936_p10 = pnand %p7934_p9, %p7931_p8 }
  0x23   :  { %7939 = shalt.err (!%p7936_p10)
}
  0x24   :  { %s7940_s3 = scalar_lea.vmem %s8138_s28, 17408  ;;  %p7945_p12 = scmp.lt.s32.totalorder %s8138_s28, %s8138_s28 }
  0x25   :  { %p7941_p11 = scmp.ne.s32.totalorder %s8138_s28, %s7940_s3  ;;  %p7946_p13 = scmp.lt.s32.totalorder %s7940_s3, %s7940_s3 }
  0x27   :  { %p7947_p0 = por %p7946_p13, %p7945_p12 }
  0x29   :  { %p7948_p1 = pnand %p7947_p0, %p7941_p11 }
  0x2b   :  { %7951 = shalt.err (!%p7948_p1)
}
  0x2c   :  { %67 = dma.hbm_to_vmem [thread:$0]  %s11286_s12, 17408, %s8138_s28, [#allocation3], %s8004_s8, %s8004_s8, %s8005_s4  }
  0x2d   :  { %s8006_s25 = smov [#allocation7]   ;;  %s7952_s6 = scalar_lea.hbm %s11289_s15, 12288 }
  0x2e   :  { %s87_s1 = sshll.u32 %s8006_s25, 4  ;;  %p7953_p2 = scmp.ne.s32.totalorder %s11289_s15, %s7952_s6  ;;  %s88_s1 = int_to_ptr.vmem [resolvable:$true] %s87_s1 }
  0x2f   :  { %p7956_p3 = scmp.lt.u32.totalorder %s7952_s6, %s11289_s15 }
  0x31   :  { %p7958_p4 = pnand %p7956_p3, %p7953_p2 }
  0x33   :  { %7961 = shalt.err (!%p7958_p4)
}
  0x34   :  { %s7962_s30 = scalar_lea.vmem %s88_s1, 12288  ;;  %p7967_p6 = scmp.lt.s32.totalorder %s88_s1, %s88_s1 }
  0x35   :  { %p7963_p5 = scmp.ne.s32.totalorder %s88_s1, %s7962_s30  ;;  %p7968_p7 = scmp.lt.s32.totalorder %s7962_s30, %s7962_s30 }
  0x37   :  { %p7969_p8 = por %p7968_p7, %p7967_p6 }
  0x39   :  { %p7970_p9 = pnand %p7969_p8, %p7963_p5 }
  0x3b   :  { %7973 = shalt.err (!%p7970_p9)
}
  0x3c   :  { %s8007_s12 = smov 128   ;;  %s8008_s28 = smov 8  }
  0x3d   :  { %93 = dma.hbm_to_vmem [thread:$0]  %s11289_s15, 12288, %s88_s1, [#allocation6], %s8007_s12, %s8007_s12, %s8008_s28  }
  0x3e   :  { %7996 = dma.done.wait [#allocation3], 17408  }
  0x3f   :  { %7997 = vsyncadd [#allocation3], 4294949888 }
  0x40   :  { %7998 = dma.done.wait [#allocation6], 29696  }
  0x41   :  { %7999 = vsyncadd [#allocation6], 4294937600  ;;  %v11305_v0 = vmov 0.0|0.0   ;;  %vm8010_vm0 = vmmov 0   ;;  %v11307_v1 = vmov 0.0   ;;  %s11331_s26 = sld [smem:[#allocation29_spill]] }
  0x42   :  { %6811 = vmatprep.subr.bf16.mxu1 %v11305_v0  ;;  %6508 = vmatprep.mubr.msk.f32.mxu1 %vm8010_vm0, %v11307_v1  ;;  %s11332_s29 = sld [smem:[#allocation28_spill]]  ;;  %vm205_vm1 = vcmask 1043456   ;;  %vm716_vm2 = vcmask 1045504   ;;  %vm168_vm3 = vcmask 1046528   ;;  %vm186_vm4 = vcmask 293888   ;;  %s11333_s7 = sld [smem:[#allocation33_spill]] }
  0x43   :  { %279 = vmatprep.mubr.f32.mxu0 %v11307_v1  ;;  %s11334_s4 = sld [smem:[#allocation34_spill]]  ;;  %s11335_s15 = sld [smem:[#allocation30_spill]]  ;;  %vm1376_vm5 = vcmask 130048   ;;  %vm1987_vm6 = vcmask 1044480   ;;  %vm1971_vm7 = vcmask 564224   ;;  %vm2293_vm8 = vcmask 64512  }
  0x44   :  { %s11336_s27 = sld [smem:[#allocation31_spill]]  ;;  %s11338_s25 = sld [smem:[#allocation36_spill]]  ;;  %vm3735_vm9 = vcmask 261120   ;;  %vm4480_vm10 = vcmask 1042432   ;;  %vm4470_vm11 = vcmask 285696   ;;  %vm5196_vm12 = vcmask 1040384  }
  0x45   :  { %s11339_s3 = sld [smem:[#allocation35_spill]]  ;;  %vm5192_vm13 = vcmask 138240   ;;  %vm5362_vm14 = vcmask 523264   ;;  %vm5834_vm15 = vcmask 25600  }
  0x47   :  { %v5853_v2 = vld [vmem:[%s11331_s26 + $0x80] sm:$0xff]  ;;  %v5856_v3 = vld [vmem:[%s11331_s26 + $0x98] sm:$0xff]  ;;  %v5854_v4 = vld [vmem:[%s11331_s26 + $0x88] sm:$0xff] }
  0x48   :  { %v6803_v5 = vpack.c.bf16 %v5856_v3, %v5853_v2  ;;  %v5857_v6 = vld [vmem:[%s11331_s26 + $0xa0] sm:$0xff]  ;;  %v5852_v7 = vld [vmem:[%s11331_s26 + $0x78] sm:$0xff]  ;;  %v5855_v8 = vld [vmem:[%s11331_s26 + $0x90] sm:$0xff] }
  0x49   :  { %v6812_v9 = vpack.c.bf16 %v5857_v6, %v5854_v4  ;;  %v6805_v10 = vpack.c.bf16 %v5855_v8, %v5852_v7  ;;  %v5859_v11 = vld [vmem:[%s11331_s26 + $0xb0] sm:$0xff]  ;;  %v5862_v12 = vld [vmem:[%s11331_s26 + $0xc8] sm:$0xff]  ;;  %v5860_v13 = vld [vmem:[%s11331_s26 + $0xb8] sm:$0xff] }
  0x4a   :  { %6804 = vmatprep.subr.bf16.mxu0 %v6803_v5  ;;  %v6807_v14 = vpack.c.bf16 %v5862_v12, %v5859_v11  ;;  %v5863_v15 = vld [vmem:[%s11331_s26 + $0xd0] sm:$0xff]  ;;  %v5858_v16 = vld [vmem:[%s11331_s26 + $0xa8] sm:$0xff]  ;;  %v5861_v17 = vld [vmem:[%s11331_s26 + $0xc0] sm:$0xff] }
  0x4b   :  { %6813 = vmatpush3.bf16.msra.mxu1 %v6812_v9  ;;  %6806 = vmatpush1.bf16.msra.mxu0 %v6805_v10  ;;  %v6815_v18 = vpack.c.bf16 %v5863_v15, %v5860_v13  ;;  %v6809_v19 = vpack.c.bf16 %v5861_v17, %v5858_v16  ;;  %v8225_v20 = vld [vmem:[%s11332_s29] sm:$0xff]  ;;  %v8230_v21 = vld [vmem:[%s11332_s29 + $0x8] sm:$0xff]  ;;  %v8240_v25 = vld [vmem:[%s11332_s29 + $0x10] sm:$0xff] }
  0x4c   :  { %6814 = vmatprep.subr.bf16.mxu1 %v11305_v0  ;;  %6808 = vmatprep.subr.bf16.mxu0 %v6807_v14  ;;  %v5865_v22 = vld [vmem:[%s11331_s26 + $0xe0] sm:$0xf]  ;;  %v169_v23 = vrot.slane %v8225_v20, 1  ;;  %v170_v24 = vrot.slane %v8230_v21, 1  ;;  %v717_v26 = vrot.slane %v8225_v20, 2  ;;  %v718_v27 = vrot.slane %v8230_v21, 2 }
  0x4d   :  { %v5866_v28 = vld [vmem:[%s11331_s26 + $0xe8] sm:$0xf]  ;;  %v132_v30 = vld [vmem:[%s11331_s26 + $0x20] sm:$0xff]  ;;  %v5864_v31 = vld [vmem:[%s11331_s26 + $0xd8] sm:$0xf]  ;;  %v172_v36 = vrot.slane %v8240_v25, 1 }
  0x4e   :  { %v129_v29 = vld [vmem:[%s11331_s26 + $0x8] sm:$0xff]  ;;  %v128_v32 = vld [vmem:[%s11331_s26] sm:$0xff]  ;;  %v131_v33 = vld [vmem:[%s11331_s26 + $0x18] sm:$0xff]  ;;  %v8265_v34 = vsel %vm716_vm2, %v717_v26, %v718_v27  ;;  %v171_v35 = vsel %vm168_vm3, %v169_v23, %v170_v24  ;;  %v720_v40 = vrot.slane %v8240_v25, 2 }
  0x4f   :  { %6816 = vmatpush3.bf16.msra.mxu1 %v6815_v18  ;;  %6810 = vmatpush1.bf16.msra.mxu0 %v6809_v19  ;;  %v8272_v37 = vld [vmem:[%s11332_s29 + $0x18] sm:$0xff]  ;;  %v130_v38 = vld [vmem:[%s11331_s26 + $0x10] sm:$0xff]  ;;  %v133_v39 = vld [vmem:[%s11331_s26 + $0x28] sm:$0xff]  ;;  %v6817_v41 = vpack.c.bf16 %v132_v30, %v129_v29  ;;  %v6819_v45 = vpack.c.bf16 %v131_v33, %v128_v32  ;;  %v173_v56 = vsel %vm168_vm3, %v170_v24, %v172_v36 }
  0x50   :  { %6506 = vmatprep.subr.mxu1 %v11307_v1  ;;  %5867 = vmatprep.subr.msk.mxu0 %vm205_vm1, %v5865_v22  ;;  %v8284_v42 = vld [vmem:[%s11332_s29 + $0x20] sm:$0xff]  ;;  %v8289_v43 = vld [vmem:[%s11332_s29 + $0x28] sm:$0xff]  ;;  %v135_v44 = vld [vmem:[%s11331_s26 + $0x38] sm:$0xff]  ;;  %v6826_v49 = vpack.c.bf16 %v133_v39, %v130_v38  ;;  %v8306_v50 = vsel %vm716_vm2, %v718_v27, %v720_v40  ;;  %v722_v54 = vrot.slane %v8272_v37, 2  ;;  %v174_v57 = vrot.slane %v8272_v37, 1 }
  0x51   :  { %v138_v46 = vld [vmem:[%s11331_s26 + $0x50] sm:$0xff]  ;;  %v137_v48 = vld [vmem:[%s11331_s26 + $0x48] sm:$0xff]  ;;  %v136_v52 = vld [vmem:[%s11331_s26 + $0x40] sm:$0xff]  ;;  %v724_v55 = vrot.slane %v8284_v42, 2  ;;  %v726_v58 = vrot.slane %v8289_v43, 2  ;;  %v176_v6 = vrot.slane %v8284_v42, 1 }
  0x52   :  { %v134_v47 = vld [vmem:[%s11331_s26 + $0x30] sm:$0xff]  ;;  %v139_v53 = vld [vmem:[%s11331_s26 + $0x58] sm:$0xff]  ;;  %v6821_v60 = vpack.c.bf16 %v138_v46, %v135_v44  ;;  %v8332_v62 = vsel %vm716_vm2, %v720_v40, %v722_v54  ;;  %v175_v5 = vsel %vm168_vm3, %v172_v36, %v174_v57  ;;  %v141_v7 = vld [vmem:[%s11331_s26 + $0x68] sm:$0xf]  ;;  %v178_v13 = vrot.slane %v8289_v43, 1 }
  0x53   :  { %6507 = vmatpush3.msk.msra.mxu1 %vm205_vm1, %v5866_v28  ;;  %5868 = vmatpush1.msk.msra.mxu0 %vm205_vm1, %v5864_v31  ;;  %v8313_v51 = vld [vmem:[%s11332_s29 + $0x30] sm:$0xff]  ;;  %v6823_v61 = vpack.c.bf16 %v137_v48, %v134_v47  ;;  %v6829_v63 = vpack.c.bf16 %v139_v53, %v136_v52  ;;  %v8335_v2 = vsel %vm716_vm2, %v722_v54, %v724_v55  ;;  %v5910_v8 = vld [vmem:[%s11331_s26 + $0xf8] sm:$0xff]  ;;  %v140_v10 = vld [vmem:[%s11331_s26 + $0x60] sm:$0xf] }
  0x54   :  { %6509 = vmatmul.mubr.msk.f32.vlgmr.msra.gmra.mrb[0].mxu1 %vm186_vm4, %v171_v35  ;;  %5869 = vmatmul.mubr.msk.f32.vlgmr.msra.gmra.mrb[0].mxu0 %vm186_vm4, %v171_v35  ;;  %v728_v59 = vrot.slane %v8313_v51, 2  ;;  %v8338_v3 = vsel %vm716_vm2, %v724_v55, %v726_v58  ;;  %v5913_v9 = vld [vmem:[%s11331_s26 + $0x110] sm:$0xff]  ;;  %v177_v12 = vsel %vm168_vm3, %v174_v57, %v176_v6  ;;  %v179_v15 = vsel %vm168_vm3, %v176_v6, %v178_v13  ;;  %v8389_v17 = vld [vmem:[%s11332_s29 + $0x38] sm:$0xff]  ;;  %v8402_v22 = vld [vmem:[%s11332_s29 + $0x40] sm:$0xff] }
  0x55   :  { %6511 = vmatprep.mubr.msk.f32.mxu1 %vm8010_vm0, %v11307_v1  ;;  %285 = vmatprep.mubr.f32.mxu0 %v11307_v1  ;;  %v142_v11 = vld [vmem:[%s11331_s26 + $0x70] sm:$0xf]  ;;  %v6831_v14 = vpack.c.bf16 %v5913_v9, %v5910_v8  ;;  %v180_v16 = vrot.slane %v8313_v51, 1  ;;  %v182_v19 = vrot.slane %v8389_v17, 1  ;;  %v184_v24 = vrot.slane %v8402_v22, 1  ;;  %v5912_v28 = vld [vmem:[%s11331_s26 + $0x108] sm:$0xff] }
  0x56   :  { %6818 = vmatprep.subr.bf16.mxu0 %v6817_v41  ;;  %6825 = vmatprep.subr.bf16.mxu1 %v11305_v0  ;;  %v8345_v4 = vsel %vm716_vm2, %v726_v58, %v728_v59  ;;  %v5909_v27 = vld [vmem:[%s11331_s26 + $0xf0] sm:$0xff]  ;;  %v5911_v29 = vld [vmem:[%s11331_s26 + $0x100] sm:$0xff]  ;;  %v5914_v30 = vld [vmem:[%s11331_s26 + $0x118] sm:$0xff] }
  0x57   :  { %6820 = vmatpush1.bf16.msra.mxu0 %v6819_v45  ;;  %6827 = vmatpush3.bf16.msra.mxu1 %v6826_v49  ;;  %v181_v18 = vsel %vm168_vm3, %v178_v13, %v180_v16  ;;  %v183_v23 = vsel %vm168_vm3, %v180_v16, %v182_v19  ;;  %v185_v26 = vsel %vm168_vm3, %v182_v19, %v184_v24  ;;  %v5916_v31 = vld [vmem:[%s11331_s26 + $0x128] sm:$0xff]  ;;  %v5919_v32 = vld [vmem:[%s11331_s26 + $0x140] sm:$0xff]  ;;  %v5918_v39 = vld [vmem:[%s11331_s26 + $0x138] sm:$0xff] }
  0x58   :  { %6512 = vmatmul.mubr.msk.f32.gmra.mrb[2].mxu1 %vm186_vm4, %v173_v56  ;;  %5870 = vmatmul.mubr.msk.f32.gmra.mrb[2].mxu0 %vm186_vm4, %v173_v56  ;;  %v6833_v33 = vpack.c.bf16 %v5912_v28, %v5909_v27  ;;  %v5915_v35 = vld [vmem:[%s11331_s26 + $0x120] sm:$0xff]  ;;  %v6840_v36 = vpack.c.bf16 %v5914_v30, %v5911_v29  ;;  %v6835_v38 = vpack.c.bf16 %v5919_v32, %v5916_v31  ;;  %v5917_v40 = vld [vmem:[%s11331_s26 + $0x130] sm:$0xff]  ;;  %v5920_v41 = vld [vmem:[%s11331_s26 + $0x148] sm:$0xff] }
  0x59   :  { %6514 = vmatprep.mubr.msk.f32.mxu1 %vm8010_vm0, %v11307_v1  ;;  %291 = vmatprep.mubr.f32.mxu0 %v11307_v1  ;;  %v6837_v44 = vpack.c.bf16 %v5918_v39, %v5915_v35  ;;  %v6843_v45 = vpack.c.bf16 %v5920_v41, %v5917_v40  ;;  %v5921_v46 = vld [vmem:[%s11331_s26 + $0x150] sm:$0xf]  ;;  %v1311_v47 = vld [vmem:[%s11333_s7 + $0x18] sm:$0xff]  ;;  %v1643_v48 = vld [vmem:[%s11334_s4 + $0x8] sm:$0xff] }
  0x5a   :  { %6822 = vmatprep.subr.bf16.mxu0 %v6821_v60  ;;  %6828 = vmatprep.subr.bf16.mxu1 %v11305_v0  ;;  %v1310_v52 = vld [vmem:[%s11333_s7 + $0x10] sm:$0xff]  ;;  %v1642_v55 = vld [vmem:[%s11334_s4] sm:$0xff]  ;;  %v1313_v58 = vld [vmem:[%s11333_s7 + $0x28] sm:$0xff] }
  0x5b   :  { %6824 = vmatpush1.bf16.msra.mxu0 %v6823_v61  ;;  %6830 = vmatpush3.bf16.msra.mxu1 %v6829_v63  ;;  %v1644_v56 = vld [vmem:[%s11334_s4 + $0x10] sm:$0xff]  ;;  %v1647_v60 = vld [vmem:[%s11334_s4 + $0x28] sm:$0xff]  ;;  %v1312_v63 = vld [vmem:[%s11333_s7 + $0x20] sm:$0xff] }
  0x5c   :  { %6515 = vmatmul.mubr.msk.f32.gmra.mrb[4].mxu1 %vm186_vm4, %v175_v5  ;;  %5871 = vmatmul.mubr.msk.f32.gmra.mrb[4].mxu0 %vm186_vm4, %v175_v5  ;;  %v6915_v57 = vpack.c.bf16 %v1644_v56, %v1642_v55  ;;  %v1646_v5 = vld [vmem:[%s11334_s4 + $0x20] sm:$0xff]  ;;  %v1648_v6 = vld [vmem:[%s11334_s4 + $0x30] sm:$0xff]  ;;  %v1317_v8 = vld [vmem:[%s11333_s7 + $0x48] sm:$0xff] }
  0x5d   :  { %6517 = vmatprep.mubr.msk.f32.mxu1 %vm8010_vm0, %v11307_v1  ;;  %297 = vmatprep.mubr.f32.mxu0 %v11307_v1  ;;  %v1319_v9 = vld [vmem:[%s11333_s7 + $0x58] sm:$0xff]  ;;  %v1316_v13 = vld [vmem:[%s11333_s7 + $0x40] sm:$0xff]  ;;  %v1322_v29 = vld [vmem:[%s11333_s7 + $0x70] sm:$0xff] }
  0x5e   :  { %5888 = vmatprep.subr.msk.mxu0 %vm205_vm1, %v141_v7  ;;  %6543 = vmatprep.subr.mxu1 %v11307_v1  ;;  %v6919_v7 = vpack.c.bf16 %v1648_v6, %v1646_v5  ;;  %v1657_v27 = vld [vmem:[%s11334_s4 + $0x78] sm:$0xff]  ;;  %v1320_v28 = vld [vmem:[%s11333_s7 + $0x60] sm:$0xff]  ;;  %v1659_v39 = vld [vmem:[%s11334_s4 + $0x88] sm:$0xff] }
  0x5f   :  { %5889 = vmatpush1.msk.msra.mxu0 %vm205_vm1, %v140_v10  ;;  %6544 = vmatpush3.msk.msra.mxu1 %vm205_vm1, %v142_v11  ;;  %v1651_v10 = vld [vmem:[%s11334_s4 + $0x48] sm:$0xff]  ;;  %v6853_v11 = vpack.c.bf16 %v1319_v9, %v1317_v8  ;;  %v6859_v31 = vpack.c.bf16 %v1322_v29, %v1320_v28  ;;  %v1654_v32 = vld [vmem:[%s11334_s4 + $0x60] sm:$0xff]  ;;  %v1661_v41 = vld [vmem:[%s11334_s4 + $0x98] sm:$0xff] }
  0x60   :  { %6518 = vmatmul.mubr.msk.f32.gmra.mrb[6].mxu1 %vm186_vm4, %v177_v12  ;;  %5872 = vmatmul.mubr.msk.f32.gmra.mrb[6].mxu0 %vm186_vm4, %v177_v12  ;;  %v1653_v12 = vld [vmem:[%s11334_s4 + $0x58] sm:$0xff]  ;;  %v1333_v56 = vld [vmem:[%s11333_s7 + $0xc8] sm:$0xff] }
  0x61   :  { %6520 = vmatprep.mubr.msk.f32.mxu1 %vm8010_vm0, %v11307_v1  ;;  %303 = vmatprep.mubr.f32.mxu0 %v11307_v1  ;;  %v1337_v6 = vld [vmem:[%s11333_s7 + $0xe8] sm:$0xff] }
  0x62   :  { %6832 = vmatprep.subr.bf16.mxu0 %v6831_v14  ;;  %6839 = vmatprep.subr.bf16.mxu1 %v11305_v0  ;;  %v1318_v14 = vld [vmem:[%s11333_s7 + $0x50] sm:$0xff]  ;;  %v1671_v8 = vld [vmem:[%s11334_s4 + $0xe8] sm:$0xff] }
  0x63   :  { %v6855_v16 = vpack.c.bf16 %v1318_v14, %v1316_v13 }
  0x64   :  { %6521 = vmatmul.mubr.msk.f32.gmra.mrb[8].mxu1 %vm186_vm4, %v179_v15  ;;  %5873 = vmatmul.mubr.msk.f32.gmra.mrb[8].mxu0 %vm186_vm4, %v179_v15  ;;  %v6921_v15 = vpack.c.bf16 %v1653_v12, %v1651_v10  ;;  %v1673_v10 = vld [vmem:[%s11334_s4 + $0xf8] sm:$0xff]  ;;  %v1338_v12 = vld [vmem:[%s11333_s7 + $0xf0] sm:$0xff] }
  0x65   :  { %6523 = vmatprep.mubr.msk.f32.mxu1 %vm8010_vm0, %v11307_v1  ;;  %309 = vmatprep.mubr.f32.mxu0 %v11307_v1  ;;  %v6941_v13 = vpack.c.bf16 %v1673_v10, %v1671_v8  ;;  %v1693_v8 = vld [vmem:[%s11334_s4 + $0x198] sm:$0xff] }
  0x68   :  { %6524 = vmatmul.mubr.msk.f32.gmra.mrb[10].mxu1 %vm186_vm4, %v181_v18  ;;  %5874 = vmatmul.mubr.msk.f32.gmra.mrb[10].mxu0 %vm186_vm4, %v181_v18  ;;  %v1652_v18 = vld [vmem:[%s11334_s4 + $0x50] sm:$0xff] }
  0x69   :  { %6526 = vmatprep.mubr.msk.f32.mxu1 %vm8010_vm0, %v11307_v1  ;;  %315 = vmatprep.mubr.f32.mxu0 %v11307_v1 }
  0x6c   :  { %6527 = vmatmul.mubr.msk.f32.gmra.mrb[12].mxu1 %vm186_vm4, %v183_v23  ;;  %5875 = vmatmul.mubr.msk.f32.gmra.mrb[12].mxu0 %vm186_vm4, %v183_v23  ;;  %v1323_v23 = vld [vmem:[%s11333_s7 + $0x78] sm:$0xff] }
  0x6d   :  { %6529 = vmatprep.mubr.msk.f32.mxu1 %vm8010_vm0, %v11307_v1  ;;  %321 = vmatprep.mubr.f32.mxu0 %v11307_v1 }
  0x70   :  { %6530 = vmatmul.mubr.msk.f32.gmra.mrb[14].mxu1 %vm186_vm4, %v185_v26  ;;  %5876 = vmatmul.mubr.msk.f32.gmra.mrb[14].mxu0 %vm186_vm4, %v185_v26 }
  0x71   :  { %6532 = vmatprep.mubr.msk.f32.mxu1 %vm8010_vm0, %v11307_v1  ;;  %327 = vmatprep.mubr.f32.mxu0 %v11307_v1 }
  0x74   :  { %6533 = vmatmul.mubr.msk.f32.gmra.mrb[16].mxu1 %vm186_vm4, %v184_v24  ;;  %5877 = vmatmul.mubr.msk.f32.gmra.mrb[16].mxu0 %vm186_vm4, %v184_v24  ;;  %v1655_v24 = vld [vmem:[%s11334_s4 + $0x68] sm:$0xff] }
  0x75   :  { %6545 = vmatprep.mubr.msk.f32.mxu1 %vm8010_vm0, %v11307_v1  ;;  %535 = vmatprep.mubr.f32.mxu0 %v11307_v1  ;;  %v6925_v30 = vpack.c.bf16 %v1657_v27, %v1655_v24  ;;  %v1677_v24 = vld [vmem:[%s11334_s4 + $0x118] sm:$0xff]  ;;  %v1342_v27 = vld [vmem:[%s11333_s7 + $0x110] sm:$0xff] }
  0x78   :  { %6546 = vmatmul.mubr.msk.f32.vlgmr.msra.gmra.mrb[18].mxu1 %vm186_vm4, %v8225_v20  ;;  %5890 = vmatmul.mubr.msk.f32.vlgmr.msra.gmra.mrb[0].mxu0 %vm186_vm4, %v8225_v20  ;;  %v5922_v20 = vld [vmem:[%s11331_s26 + $0x158] sm:$0xf] }
  0x79   :  { %6548 = vmatprep.mubr.msk.f32.mxu1 %vm8010_vm0, %v11307_v1  ;;  %541 = vmatprep.mubr.f32.mxu0 %v11307_v1 }
  0x7a   :  { %6834 = vmatpush1.bf16.msra.mxu0 %v6833_v33  ;;  %6841 = vmatpush3.bf16.msra.mxu1 %v6840_v36  ;;  %v1656_v33 = vld [vmem:[%s11334_s4 + $0x70] sm:$0xff]  ;;  %v1325_v36 = vld [vmem:[%s11333_s7 + $0x88] sm:$0xff] }
  0x7b   :  { %6836 = vmatprep.subr.bf16.mxu0 %v6835_v38  ;;  %6842 = vmatprep.subr.bf16.mxu1 %v11305_v0  ;;  %v6927_v35 = vpack.c.bf16 %v1656_v33, %v1654_v32  ;;  %v1327_v38 = vld [vmem:[%s11333_s7 + $0x98] sm:$0xff]  ;;  %v1345_v33 = vld [vmem:[%s11333_s7 + $0x128] sm:$0xff] }
  0x7c   :  { %6549 = vmatmul.mubr.msk.f32.gmra.mrb[20].mxu1 %vm186_vm4, %v8230_v21  ;;  %5891 = vmatmul.mubr.msk.f32.gmra.mrb[2].mxu0 %vm186_vm4, %v8230_v21  ;;  %v5923_v21 = vld [vmem:[%s11331_s26 + $0x160] sm:$0xf]  ;;  %v6861_v40 = vpack.c.bf16 %v1327_v38, %v1325_v36  ;;  %v1679_v36 = vld [vmem:[%s11334_s4 + $0x128] sm:$0xff]  ;;  %s11337_s26 = sld [smem:[#allocation32_spill]] }
  0x7d   :  { %6551 = vmatprep.mubr.msk.f32.mxu1 %vm8010_vm0, %v11307_v1  ;;  %547 = vmatprep.mubr.f32.mxu0 %v11307_v1 }
  0x7e   :  { %6838 = vmatpush1.bf16.msra.mxu0 %v6837_v44  ;;  %6844 = vmatpush3.bf16.msra.mxu1 %v6843_v45  ;;  %v1324_v44 = vld [vmem:[%s11333_s7 + $0x80] sm:$0xff]  ;;  %v1326_v45 = vld [vmem:[%s11333_s7 + $0x90] sm:$0xff] }
  0x7f   :  { %5924 = vmatprep.subr.msk.mxu0 %vm205_vm1, %v5922_v20  ;;  %6580 = vmatprep.subr.mxu1 %v11307_v1  ;;  %v6929_v20 = vpack.c.bf16 %v1661_v41, %v1659_v39  ;;  %v1681_v39 = vld [vmem:[%s11334_s4 + $0x138] sm:$0xff]  ;;  %v1346_v41 = vld [vmem:[%s11333_s7 + $0x130] sm:$0xff] }
  0x80   :  { %6552 = vmatmul.mubr.msk.f32.gmra.mrb[22].mxu1 %vm186_vm4, %v8240_v25  ;;  %5892 = vmatmul.mubr.msk.f32.gmra.mrb[4].mxu0 %vm186_vm4, %v8240_v25  ;;  %v730_v25 = vrot.slane %v8389_v17, 2 }
  0x81   :  { %6554 = vmatprep.mubr.msk.f32.mxu1 %vm8010_vm0, %v11307_v1  ;;  %553 = vmatprep.mubr.f32.mxu0 %v11307_v1 }
  0x82   :  { %5925 = vmatpush1.msk.msra.mxu0 %vm205_vm1, %v5921_v46  ;;  %6581 = vmatpush3.msk.msra.mxu1 %vm205_vm1, %v5923_v21  ;;  %v6863_v46 = vpack.c.bf16 %v1326_v45, %v1324_v44  ;;  %v1658_v21 = vld [vmem:[%s11334_s4 + $0x80] sm:$0xff]  ;;  %v6949_v44 = vpack.c.bf16 %v1681_v39, %v1679_v36  ;;  %v1701_v36 = vld [vmem:[%s11334_s4 + $0x1d8] sm:$0xff] }
  0x83   :  { %v1364_v39 = vld [vmem:[%s11333_s7 + $0x1c0] sm:$0xff] }
  0x84   :  { %6555 = vmatmul.mubr.msk.f32.gmra.mrb[24].mxu1 %vm186_vm4, %v8272_v37  ;;  %5893 = vmatmul.mubr.msk.f32.gmra.mrb[6].mxu0 %vm186_vm4, %v8272_v37  ;;  %v732_v37 = vrot.slane %v8402_v22, 2 }
  0x85   :  { %6557 = vmatprep.mubr.msk.f32.mxu1 %vm8010_vm0, %v11307_v1  ;;  %559 = vmatprep.mubr.f32.mxu0 %v11307_v1 }
  0x88   :  { %6558 = vmatmul.mubr.msk.f32.gmra.mrb[26].mxu1 %vm186_vm4, %v8284_v42  ;;  %5894 = vmatmul.mubr.msk.f32.gmra.mrb[8].mxu0 %vm186_vm4, %v8284_v42  ;;  %v733_v42 = vsel %vm716_vm2, %v730_v25, %v732_v37 }
  0x89   :  { %6560 = vmatprep.mubr.msk.f32.mxu1 %vm8010_vm0, %v11307_v1  ;;  %565 = vmatprep.mubr.f32.mxu0 %v11307_v1 }
  0x8c   :  { %6561 = vmatmul.mubr.msk.f32.gmra.mrb[28].mxu1 %vm186_vm4, %v8289_v43  ;;  %5895 = vmatmul.mubr.msk.f32.gmra.mrb[10].mxu0 %vm186_vm4, %v8289_v43  ;;  %v1309_v43 = vld [vmem:[%s11333_s7 + $0x8] sm:$0xff] }
  0x8d   :  { %6563 = vmatprep.mubr.msk.f32.mxu1 %vm8010_vm0, %v11307_v1  ;;  %571 = vmatprep.mubr.f32.mxu0 %v11307_v1  ;;  %v6845_v49 = vpack.c.bf16 %v1311_v47, %v1309_v43  ;;  %v1663_v43 = vld [vmem:[%s11334_s4 + $0xa8] sm:$0xff] }
  0x8f   :  { %6846 = vmatprep.subr.bf16.mxu0 %v6845_v49  ;;  %v1328_v49 = vld [vmem:[%s11333_s7 + $0xa0] sm:$0xff] }
  0x90   :  { %6564 = vmatmul.mubr.msk.f32.gmra.mrb[30].mxu1 %vm186_vm4, %v8313_v51  ;;  %5896 = vmatmul.mubr.msk.f32.gmra.mrb[12].mxu0 %vm186_vm4, %v8313_v51  ;;  %v1308_v51 = vld [vmem:[%s11333_s7] sm:$0xff] }
  0x91   :  { %6566 = vmatprep.mubr.msk.f32.mxu1 %vm8010_vm0, %v11307_v1  ;;  %577 = vmatprep.mubr.f32.mxu0 %v11307_v1  ;;  %v6847_v54 = vpack.c.bf16 %v1310_v52, %v1308_v51 }
  0x94   :  { %6567 = vmatmul.mubr.msk.f32.gmra.mrb[32].mxu1 %vm186_vm4, %v8389_v17  ;;  %5897 = vmatmul.mubr.msk.f32.gmra.mrb[14].mxu0 %vm186_vm4, %v8389_v17  ;;  %v1650_v17 = vld [vmem:[%s11334_s4 + $0x40] sm:$0xff] }
  0x95   :  { %6569 = vmatprep.mubr.msk.f32.mxu1 %vm8010_vm0, %v11307_v1  ;;  %583 = vmatprep.mubr.f32.mxu0 %v11307_v1  ;;  %v6923_v19 = vpack.c.bf16 %v1652_v18, %v1650_v17  ;;  %v1341_v18 = vld [vmem:[%s11333_s7 + $0x108] sm:$0xff] }
  0x98   :  { %6570 = vmatmul.mubr.msk.f32.gmra.mrb[34].mxu1 %vm186_vm4, %v8402_v22  ;;  %5898 = vmatmul.mubr.msk.f32.gmra.mrb[16].mxu0 %vm186_vm4, %v8402_v22  ;;  %v1321_v22 = vld [vmem:[%s11333_s7 + $0x68] sm:$0xff] }
  0x99   :  { %6582 = vmatprep.mubr.msk.f32.mxu1 %vm8010_vm0, %v11307_v1  ;;  %825 = vmatprep.mubr.f32.mxu0 %v11307_v1  ;;  %v6857_v26 = vpack.c.bf16 %v1323_v23, %v1321_v22  ;;  %v1675_v22 = vld [vmem:[%s11334_s4 + $0x108] sm:$0xff] }
  0x9a   :  { %v6945_v28 = vpack.c.bf16 %v1677_v24, %v1675_v22  ;;  %v1697_v22 = vld [vmem:[%s11334_s4 + $0x1b8] sm:$0xff]  ;;  %v1362_v24 = vld [vmem:[%s11333_s7 + $0x1b0] sm:$0xff] }
  0x9c   :  { %6583 = vmatmul.mubr.msk.f32.vlgmr.msra.gmra.mrb[36].mxu1 %vm186_vm4, %v8265_v34  ;;  %5926 = vmatmul.mubr.msk.f32.vlgmr.msra.gmra.mrb[0].mxu0 %vm186_vm4, %v8265_v34  ;;  %v731_v34 = vsel %vm716_vm2, %v728_v59, %v730_v25  ;;  %v1315_v59 = vld [vmem:[%s11333_s7 + $0x38] sm:$0xff]  ;;  %v1660_v25 = vld [vmem:[%s11334_s4 + $0x90] sm:$0xff] }
  0x9d   :  { %6585 = vmatprep.mubr.msk.f32.mxu1 %vm8010_vm0, %v11307_v1  ;;  %831 = vmatprep.mubr.f32.mxu0 %v11307_v1  ;;  %v6849_v61 = vpack.c.bf16 %v1315_v59, %v1313_v58  ;;  %v1667_v58 = vld [vmem:[%s11334_s4 + $0xc8] sm:$0xff] }
  0x9e   :  { %6848 = vmatpush1.bf16.msra.mxu0 %v6847_v54  ;;  %v1664_v54 = vld [vmem:[%s11334_s4 + $0xb0] sm:$0xff] }
  0x9f   :  { %6850 = vmatprep.subr.bf16.mxu0 %v6849_v61  ;;  %v1332_v61 = vld [vmem:[%s11333_s7 + $0xc0] sm:$0xff] }
  0xa0   :  { %6586 = vmatmul.mubr.msk.f32.gmra.mrb[38].mxu1 %vm186_vm4, %v8306_v50  ;;  %5927 = vmatmul.mubr.msk.f32.gmra.mrb[2].mxu0 %vm186_vm4, %v8306_v50  ;;  %v1645_v50 = vld [vmem:[%s11334_s4 + $0x18] sm:$0xff] }
  0xa1   :  { %6588 = vmatprep.mubr.msk.f32.mxu1 %vm8010_vm0, %v11307_v1  ;;  %837 = vmatprep.mubr.f32.mxu0 %v11307_v1  ;;  %v6913_v53 = vpack.c.bf16 %v1645_v50, %v1643_v48  ;;  %v1665_v48 = vld [vmem:[%s11334_s4 + $0xb8] sm:$0xff]  ;;  %v1330_v50 = vld [vmem:[%s11333_s7 + $0xb0] sm:$0xff] }
  0xa2   :  { %v6933_v51 = vpack.c.bf16 %v1665_v48, %v1663_v43  ;;  %v6867_v52 = vpack.c.bf16 %v1330_v50, %v1328_v49  ;;  %v1685_v43 = vld [vmem:[%s11334_s4 + $0x158] sm:$0xff]  ;;  %v1350_v48 = vld [vmem:[%s11333_s7 + $0x150] sm:$0xff] }
  0xa3   :  { %6914 = vmatprep.subr.bf16.mxu1 %v6913_v53  ;;  %v1662_v53 = vld [vmem:[%s11334_s4 + $0xa0] sm:$0xff] }
  0xa4   :  { %6589 = vmatmul.mubr.msk.f32.gmra.mrb[40].mxu1 %vm186_vm4, %v8332_v62  ;;  %5928 = vmatmul.mubr.msk.f32.gmra.mrb[4].mxu0 %vm186_vm4, %v8332_v62  ;;  %v1649_v62 = vld [vmem:[%s11334_s4 + $0x38] sm:$0xff]  ;;  %v6935_v55 = vpack.c.bf16 %v1664_v54, %v1662_v53  ;;  %v1353_v54 = vld [vmem:[%s11333_s7 + $0x168] sm:$0xff] }
  0xa5   :  { %6591 = vmatprep.mubr.msk.f32.mxu1 %vm8010_vm0, %v11307_v1  ;;  %843 = vmatprep.mubr.f32.mxu0 %v11307_v1 }
  0xa6   :  { %6916 = vmatpush1.bf16.msra.mxu1 %v6915_v57  ;;  %v1335_v57 = vld [vmem:[%s11333_s7 + $0xd8] sm:$0xff] }
  0xa7   :  { %v6869_v59 = vpack.c.bf16 %v1335_v57, %v1333_v56  ;;  %v1687_v56 = vld [vmem:[%s11334_s4 + $0x168] sm:$0xff] }
  0xa8   :  { %6592 = vmatmul.mubr.msk.f32.gmra.mrb[42].mxu1 %vm186_vm4, %v8335_v2  ;;  %5929 = vmatmul.mubr.msk.f32.gmra.mrb[6].mxu0 %vm186_vm4, %v8335_v2  ;;  %v1314_v2 = vld [vmem:[%s11333_s7 + $0x30] sm:$0xff] }
  0xa9   :  { %6594 = vmatprep.mubr.msk.f32.mxu1 %vm8010_vm0, %v11307_v1  ;;  %849 = vmatprep.mubr.f32.mxu0 %v11307_v1 }
  0xac   :  { %6595 = vmatmul.mubr.msk.f32.gmra.mrb[44].mxu1 %vm186_vm4, %v8338_v3  ;;  %5930 = vmatmul.mubr.msk.f32.gmra.mrb[8].mxu0 %vm186_vm4, %v8338_v3  ;;  %v6917_v3 = vpack.c.bf16 %v1649_v62, %v1647_v60  ;;  %v1669_v60 = vld [vmem:[%s11334_s4 + $0xd8] sm:$0xff]  ;;  %v1334_v62 = vld [vmem:[%s11333_s7 + $0xd0] sm:$0xff] }
  0xad   :  { %6597 = vmatprep.mubr.msk.f32.mxu1 %vm8010_vm0, %v11307_v1  ;;  %855 = vmatprep.mubr.f32.mxu0 %v11307_v1 }
  0xae   :  { %6918 = vmatprep.subr.bf16.mxu1 %v6917_v3  ;;  %v1666_v3 = vld [vmem:[%s11334_s4 + $0xc0] sm:$0xff] }
  0xaf   :  { %6920 = vmatpush1.bf16.msra.mxu1 %v6919_v7  ;;  %v1339_v7 = vld [vmem:[%s11333_s7 + $0xf8] sm:$0xff] }
  0xb0   :  { %6598 = vmatmul.mubr.msk.f32.gmra.mrb[46].mxu1 %vm186_vm4, %v8345_v4  ;;  %5931 = vmatmul.mubr.msk.f32.gmra.mrb[10].mxu0 %vm186_vm4, %v8345_v4  ;;  %v6851_v4 = vpack.c.bf16 %v1314_v2, %v1312_v63  ;;  %v6937_v63 = vpack.c.bf16 %v1669_v60, %v1667_v58  ;;  %v6871_v2 = vpack.c.bf16 %v1334_v62, %v1332_v61  ;;  %v1689_v58 = vld [vmem:[%s11334_s4 + $0x178] sm:$0xff]  ;;  %v1354_v61 = vld [vmem:[%s11333_s7 + $0x170] sm:$0xff]  ;;  %v1686_v62 = vld [vmem:[%s11334_s4 + $0x160] sm:$0xff] }
  0xb1   :  { %6600 = vmatprep.mubr.msk.f32.mxu1 %vm8010_vm0, %v11307_v1  ;;  %861 = vmatprep.mubr.f32.mxu0 %v11307_v1  ;;  %v6873_v9 = vpack.c.bf16 %v1339_v7, %v1337_v6  ;;  %v6957_v60 = vpack.c.bf16 %v1689_v58, %v1687_v56  ;;  %v1691_v6 = vld [vmem:[%s11334_s4 + $0x188] sm:$0xff]  ;;  %v1709_v56 = vld [vmem:[%s11334_s4 + $0x218] sm:$0xff] }
  0xb2   :  { %6852 = vmatpush1.bf16.msra.mxu0 %v6851_v4  ;;  %6922 = vmatprep.subr.bf16.mxu1 %v6921_v15  ;;  %v1668_v4 = vld [vmem:[%s11334_s4 + $0xd0] sm:$0xff]  ;;  %v1670_v15 = vld [vmem:[%s11334_s4 + $0xe0] sm:$0xff]  ;;  %v6961_v10 = vpack.c.bf16 %v1693_v8, %v1691_v6 }
  0xb3   :  { %6854 = vmatprep.subr.bf16.mxu0 %v6853_v11  ;;  %6924 = vmatpush1.bf16.msra.mxu1 %v6923_v19  ;;  %v6939_v5 = vpack.c.bf16 %v1668_v4, %v1666_v3  ;;  %v1336_v11 = vld [vmem:[%s11333_s7 + $0xe0] sm:$0xff]  ;;  %v1343_v19 = vld [vmem:[%s11333_s7 + $0x118] sm:$0xff]  ;;  %v1357_v4 = vld [vmem:[%s11333_s7 + $0x188] sm:$0xff] }
  0xb4   :  { %6601 = vmatmul.mubr.msk.f32.gmra.mrb[48].mxu1 %vm186_vm4, %v731_v34  ;;  %5932 = vmatmul.mubr.msk.f32.gmra.mrb[12].mxu0 %vm186_vm4, %v731_v34  ;;  %v6931_v34 = vpack.c.bf16 %v1660_v25, %v1658_v21  ;;  %v6875_v14 = vpack.c.bf16 %v1338_v12, %v1336_v11  ;;  %v6877_v23 = vpack.c.bf16 %v1343_v19, %v1341_v18  ;;  %v1349_v25 = vld [vmem:[%s11333_s7 + $0x148] sm:$0xff]  ;;  %v1358_v11 = vld [vmem:[%s11333_s7 + $0x190] sm:$0xff]  ;;  %v1690_v12 = vld [vmem:[%s11334_s4 + $0x180] sm:$0xff] }
  0xb5   :  { %6603 = vmatprep.mubr.msk.f32.mxu1 %vm8010_vm0, %v11307_v1  ;;  %867 = vmatprep.mubr.f32.mxu0 %v11307_v1  ;;  %v1695_v18 = vld [vmem:[%s11334_s4 + $0x1a8] sm:$0xff] }
  0xb6   :  { %6856 = vmatpush1.bf16.msra.mxu0 %v6855_v16  ;;  %6926 = vmatprep.subr.bf16.mxu1 %v6925_v30  ;;  %v1672_v16 = vld [vmem:[%s11334_s4 + $0xf0] sm:$0xff]  ;;  %v1674_v30 = vld [vmem:[%s11334_s4 + $0x100] sm:$0xff] }
  0xb7   :  { %6858 = vmatprep.subr.bf16.mxu0 %v6857_v26  ;;  %6928 = vmatpush1.bf16.msra.mxu1 %v6927_v35  ;;  %v6943_v17 = vpack.c.bf16 %v1672_v16, %v1670_v15  ;;  %v1340_v26 = vld [vmem:[%s11333_s7 + $0x100] sm:$0xff]  ;;  %v1347_v35 = vld [vmem:[%s11333_s7 + $0x138] sm:$0xff]  ;;  %v1361_v16 = vld [vmem:[%s11333_s7 + $0x1a8] sm:$0xff] }
  0xb8   :  { %6604 = vmatmul.mubr.msk.f32.gmra.mrb[50].mxu1 %vm186_vm4, %v733_v42  ;;  %5933 = vmatmul.mubr.msk.f32.gmra.mrb[14].mxu0 %vm186_vm4, %v733_v42  ;;  %v1331_v42 = vld [vmem:[%s11333_s7 + $0xb8] sm:$0xff]  ;;  %v6879_v29 = vpack.c.bf16 %v1342_v27, %v1340_v26  ;;  %v6881_v38 = vpack.c.bf16 %v1347_v35, %v1345_v33  ;;  %v6965_v26 = vpack.c.bf16 %v1697_v22, %v1695_v18  ;;  %v1699_v33 = vld [vmem:[%s11334_s4 + $0x1c8] sm:$0xff] }
  0xb9   :  { %6606 = vmatprep.mubr.msk.f32.mxu1 %vm8010_vm0, %v11307_v1  ;;  %873 = vmatprep.mubr.f32.mxu0 %v11307_v1 }
  0xba   :  { %6860 = vmatpush1.bf16.msra.mxu0 %v6859_v31  ;;  %6930 = vmatprep.subr.bf16.mxu1 %v6929_v20  ;;  %v1676_v31 = vld [vmem:[%s11334_s4 + $0x110] sm:$0xff]  ;;  %v1678_v20 = vld [vmem:[%s11334_s4 + $0x120] sm:$0xff] }
  0xbb   :  { %6862 = vmatprep.subr.bf16.mxu0 %v6861_v40  ;;  %6932 = vmatpush1.bf16.msra.mxu1 %v6931_v34  ;;  %v6947_v32 = vpack.c.bf16 %v1676_v31, %v1674_v30  ;;  %v1344_v40 = vld [vmem:[%s11333_s7 + $0x120] sm:$0xff]  ;;  %v1351_v34 = vld [vmem:[%s11333_s7 + $0x158] sm:$0xff]  ;;  %v1365_v31 = vld [vmem:[%s11333_s7 + $0x1c8] sm:$0xff] }
  0xbc   :  { %6607 = vmatmul.mubr.msk.f32.gmra.mrb[52].mxu1 %vm186_vm4, %v732_v37  ;;  %5934 = vmatmul.mubr.msk.f32.gmra.mrb[16].mxu0 %vm186_vm4, %v732_v37  ;;  %v1329_v37 = vld [vmem:[%s11333_s7 + $0xa8] sm:$0xff]  ;;  %v6883_v45 = vpack.c.bf16 %v1346_v41, %v1344_v40  ;;  %v1366_v40 = vld [vmem:[%s11333_s7 + $0x1d0] sm:$0xff]  ;;  %v1698_v41 = vld [vmem:[%s11334_s4 + $0x1c0] sm:$0xff] }
  0xbd   :  { %v6865_v47 = vpack.c.bf16 %v1331_v42, %v1329_v37  ;;  %6934 = vmatprep.subr.bf16.mxu1 %v6933_v51  ;;  %v1683_v37 = vld [vmem:[%s11334_s4 + $0x148] sm:$0xff]  ;;  %v6885_v42 = vpack.c.bf16 %v1351_v34, %v1349_v25  ;;  %v1682_v51 = vld [vmem:[%s11334_s4 + $0x140] sm:$0xff] }
  0xbe   :  { %6864 = vmatpush1.bf16.msra.mxu0 %v6863_v46  ;;  %v1680_v46 = vld [vmem:[%s11334_s4 + $0x130] sm:$0xff]  ;;  %v6953_v49 = vpack.c.bf16 %v1685_v43, %v1683_v37  ;;  %v1703_v25 = vld [vmem:[%s11334_s4 + $0x1e8] sm:$0xff]  ;;  %v1705_v37 = vld [vmem:[%s11334_s4 + $0x1f8] sm:$0xff] }
  0xbf   :  { %6866 = vmatprep.subr.bf16.mxu0 %v6865_v47  ;;  %6936 = vmatpush1.bf16.msra.mxu1 %v6935_v55  ;;  %v6951_v21 = vpack.c.bf16 %v1680_v46, %v1678_v20  ;;  %v1348_v47 = vld [vmem:[%s11333_s7 + $0x140] sm:$0xff]  ;;  %v1355_v55 = vld [vmem:[%s11333_s7 + $0x178] sm:$0xff]  ;;  %v1369_v46 = vld [vmem:[%s11333_s7 + $0x1e8] sm:$0xff] }
  0xc0   :  { %6938 = vmatprep.subr.bf16.mxu1 %v6937_v63  ;;  %v6887_v50 = vpack.c.bf16 %v1350_v48, %v1348_v47  ;;  %v6889_v57 = vpack.c.bf16 %v1355_v55, %v1353_v54  ;;  %v1688_v63 = vld [vmem:[%s11334_s4 + $0x170] sm:$0xff]  ;;  %v6973_v47 = vpack.c.bf16 %v1705_v37, %v1703_v25  ;;  %v1707_v54 = vld [vmem:[%s11334_s4 + $0x208] sm:$0xff] }
  0xc1   :  { %v6959_v3 = vpack.c.bf16 %v1688_v63, %v1686_v62  ;;  %v1370_v43 = vld [vmem:[%s11333_s7 + $0x1f0] sm:$0xff] }
  0xc2   :  { %6868 = vmatpush1.bf16.msra.mxu0 %v6867_v52  ;;  %v1684_v52 = vld [vmem:[%s11334_s4 + $0x150] sm:$0xff] }
  0xc3   :  { %6870 = vmatprep.subr.bf16.mxu0 %v6869_v59  ;;  %6940 = vmatpush1.bf16.msra.mxu1 %v6939_v5  ;;  %v6955_v53 = vpack.c.bf16 %v1684_v52, %v1682_v51  ;;  %v1352_v59 = vld [vmem:[%s11333_s7 + $0x160] sm:$0xff]  ;;  %v1359_v5 = vld [vmem:[%s11333_s7 + $0x198] sm:$0xff]  ;;  %v1373_v52 = vld [vmem:[%s11333_s7 + $0x208] sm:$0xff] }
  0xc4   :  { %6942 = vmatprep.subr.bf16.mxu1 %v6941_v13  ;;  %v6893_v7 = vpack.c.bf16 %v1359_v5, %v1357_v4  ;;  %v1692_v13 = vld [vmem:[%s11334_s4 + $0x190] sm:$0xff] }
  0xc5   :  { %v6963_v15 = vpack.c.bf16 %v1692_v13, %v1690_v12 }
  0xc6   :  { %6872 = vmatpush1.bf16.msra.mxu0 %v6871_v2  ;;  %v6891_v2 = vpack.c.bf16 %v1354_v61, %v1352_v59 }
  0xc7   :  { %6874 = vmatprep.subr.bf16.mxu0 %v6873_v9  ;;  %6944 = vmatpush1.bf16.msra.mxu1 %v6943_v17  ;;  %v1356_v9 = vld [vmem:[%s11333_s7 + $0x180] sm:$0xff]  ;;  %v1363_v17 = vld [vmem:[%s11333_s7 + $0x1b8] sm:$0xff] }
  0xc8   :  { %6946 = vmatprep.subr.bf16.mxu1 %v6945_v28  ;;  %v6897_v19 = vpack.c.bf16 %v1363_v17, %v1361_v16  ;;  %v1694_v28 = vld [vmem:[%s11334_s4 + $0x1a0] sm:$0xff] }
  0xca   :  { %6876 = vmatpush1.bf16.msra.mxu0 %v6875_v14  ;;  %v6895_v14 = vpack.c.bf16 %v1358_v11, %v1356_v9 }
  0xcb   :  { %6878 = vmatprep.subr.bf16.mxu0 %v6877_v23  ;;  %6948 = vmatpush1.bf16.msra.mxu1 %v6947_v32  ;;  %v1360_v23 = vld [vmem:[%s11333_s7 + $0x1a0] sm:$0xff]  ;;  %v1367_v32 = vld [vmem:[%s11333_s7 + $0x1d8] sm:$0xff] }
  0xcc   :  { %6950 = vmatprep.subr.bf16.mxu1 %v6949_v44  ;;  %v6899_v27 = vpack.c.bf16 %v1362_v24, %v1360_v23  ;;  %v6901_v35 = vpack.c.bf16 %v1367_v32, %v1365_v31  ;;  %v6903_v44 = vpack.c.bf16 %v1366_v40, %v1364_v39 }
  0xce   :  { %6880 = vmatpush1.bf16.msra.mxu0 %v6879_v29  ;;  %v1696_v29 = vld [vmem:[%s11334_s4 + $0x1b0] sm:$0xff] }
  0xcf   :  { %6882 = vmatprep.subr.bf16.mxu0 %v6881_v38  ;;  %6952 = vmatpush1.bf16.msra.mxu1 %v6951_v21  ;;  %v6967_v30 = vpack.c.bf16 %v1696_v29, %v1694_v28  ;;  %v6969_v38 = vpack.c.bf16 %v1701_v36, %v1699_v33  ;;  %v1371_v21 = vld [vmem:[%s11333_s7 + $0x1f8] sm:$0xff]  ;;  %v1019_v36 = vlaneseq }
  0xd0   :  { %6954 = vmatprep.subr.bf16.mxu1 %v6953_v49  ;;  %v6905_v34 = vpack.c.bf16 %v1371_v21, %v1369_v46  ;;  %v1702_v49 = vld [vmem:[%s11334_s4 + $0x1e0] sm:$0xff] }
  0xd1   :  { %v1017_v21 = vld [vmem:[%s11335_s15] sm:$0x7] }
  0xd2   :  { %6884 = vmatpush1.bf16.msra.mxu0 %v6883_v45  ;;  %v1700_v45 = vld [vmem:[%s11334_s4 + $0x1d0] sm:$0xff] }
  0xd3   :  { %6886 = vmatprep.subr.bf16.mxu0 %v6885_v42  ;;  %6956 = vmatpush1.bf16.msra.mxu1 %v6955_v53  ;;  %v6971_v20 = vpack.c.bf16 %v1700_v45, %v1698_v41  ;;  %v1368_v42 = vld [vmem:[%s11333_s7 + $0x1e0] sm:$0xff]  ;;  %v1375_v53 = vld [vmem:[%s11333_s7 + $0x218] sm:$0xff]  ;;  %v9000_v41 = vshrl.u32 %v1019_v36, 7 }
  0xd4   :  { %6958 = vmatprep.subr.bf16.mxu1 %v6957_v60  ;;  %v6907_v48 = vpack.c.bf16 %v1370_v43, %v1368_v42  ;;  %v6909_v55 = vpack.c.bf16 %v1375_v53, %v1373_v52 }
  0xd5   :  { %v9005_v46 = vsub.s32 0, %v9000_v41  ;;  %v9011_v25 = vsub.s32 1, %v9000_v41 }
  0xd6   :  { %6888 = vmatpush1.bf16.msra.mxu0 %v6887_v50  ;;  %v1704_v50 = vld [vmem:[%s11334_s4 + $0x1f0] sm:$0xff] }
  0xd7   :  { %6890 = vmatprep.subr.bf16.mxu0 %v6889_v57  ;;  %6960 = vmatpush1.bf16.msra.mxu1 %v6959_v3  ;;  %v6975_v51 = vpack.c.bf16 %v1704_v50, %v1702_v49  ;;  %v6977_v57 = vpack.c.bf16 %v1709_v56, %v1707_v54  ;;  %v9025_v49 = vrot.slane %v1017_v21, %v9011_v25  ;;  %v1132_v54 = vld [vmem:[%s11337_s26] sm:$0x7] }
  0xd8   :  { %6962 = vmatprep.subr.bf16.mxu1 %v6961_v10 }
  0xda   :  { %6892 = vmatpush1.bf16.msra.mxu0 %v6891_v2 }
  0xdb   :  { %6894 = vmatprep.subr.bf16.mxu0 %v6893_v7  ;;  %6964 = vmatpush1.bf16.msra.mxu1 %v6963_v15 }
  0xdc   :  { %6966 = vmatprep.subr.bf16.mxu1 %v6965_v26 }
  0xde   :  { %6896 = vmatpush1.bf16.msra.mxu0 %v6895_v14 }
  0xdf   :  { %6898 = vmatprep.subr.bf16.mxu0 %v6897_v19  ;;  %6968 = vmatpush1.bf16.msra.mxu1 %v6967_v30 }
  0xe0   :  { %6970 = vmatprep.subr.bf16.mxu1 %v6969_v38 }
  0xe2   :  { %6900 = vmatpush1.bf16.msra.mxu0 %v6899_v27 }
  0xe3   :  { %6902 = vmatprep.subr.bf16.mxu0 %v6901_v35  ;;  %6972 = vmatpush1.bf16.msra.mxu1 %v6971_v20 }
  0xe4   :  { %6974 = vmatprep.subr.bf16.mxu1 %v6973_v47  ;;  %v9019_v47 = vrot.slane %v1017_v21, %v9005_v46 }
  0xe6   :  { %6904 = vmatpush1.bf16.msra.mxu0 %v6903_v44 }
  0xe7   :  { %6906 = vmatprep.subr.bf16.mxu0 %v6905_v34  ;;  %6976 = vmatpush1.bf16.msra.mxu1 %v6975_v51  ;;  %v9014_v34 = vsub.s32 2, %v9000_v41 }
  0xe8   :  { %6978 = vmatprep.subr.bf16.mxu1 %v6977_v57 }
  0xe9   :  { %v9028_v50 = vrot.slane %v1017_v21, %v9014_v34 }
  0xea   :  { %6908 = vmatpush1.bf16.msra.mxu0 %v6907_v48  ;;  %v1088_v48 = vld [vmem:[%s11336_s27] sm:$0x7] }
  0xeb   :  { %6910 = vmatprep.subr.bf16.mxu0 %v6909_v55  ;;  %v9035_v56 = vrot.slane %v1088_v48, %v9005_v46 }
 0x127   :  { %v400_v58 = vpop.f32.mrb[0].mxu1 }
 0x128   :  { %v6510_v59 = vpop.f32.mrb[1].mxu1 }
 0x12b   :  { %v405_v60 = vpop.f32.mrb[2].mxu1 }
 0x12c   :  { %v6513_v61 = vpop.f32.mrb[3].mxu1 }
 0x12d   :  { %v9040_v61 = vrot.slane %v1088_v48, %v9014_v34 }
 0x12f   :  { %v410_v62 = vpop.f32.mrb[4].mxu1 }
 0x130   :  { %v6516_v63 = vpop.f32.mrb[5].mxu1 }
 0x131   :  { %v9043_v63 = vrot.slane %v1088_v48, %v9011_v25 }
 0x133   :  { %v415_v2 = vpop.f32.mrb[6].mxu1 }
 0x134   :  { %v6519_v3 = vpop.f32.mrb[7].mxu1 }
 0x135   :  { %v9049_v3 = vrot.slane %v1132_v54, %v9005_v46 }
 0x137   :  { %v420_v4 = vpop.f32.mrb[8].mxu1 }
 0x138   :  { %v6522_v5 = vpop.f32.mrb[9].mxu1 }
 0x13b   :  { %v425_v6 = vpop.f32.mrb[10].mxu1 }
 0x13c   :  { %v6525_v7 = vpop.f32.mrb[11].mxu1 }
 0x13f   :  { %v430_v8 = vpop.f32.mrb[12].mxu1 }
 0x140   :  { %v6528_v9 = vpop.f32.mrb[13].mxu1 }
 0x143   :  { %v435_v10 = vpop.f32.mrb[14].mxu1 }
 0x144   :  { %v6531_v11 = vpop.f32.mrb[15].mxu1 }
 0x147   :  { %v440_v12 = vpop.f32.mrb[16].mxu1 }
 0x148   :  { %v6534_v13 = vpop.f32.mrb[17].mxu1 }
 0x149   :  { %v9054_v13 = vrot.slane %v1132_v54, %v9011_v25 }
 0x14b   :  { %v656_v14 = vpop.f32.mrb[18].mxu1 }
 0x14c   :  { %v657_v15 = vadd.f32 %v656_v14, %v400_v58  ;;  %v6547_v16 = vpop.f32.mrb[19].mxu1 }
 0x14f   :  { %v661_v17 = vpop.f32.mrb[20].mxu1 }
 0x150   :  { %v662_v18 = vadd.f32 %v661_v17, %v405_v60  ;;  %v6550_v19 = vpop.f32.mrb[21].mxu1 }
 0x153   :  { %v666_v22 = vpop.f32.mrb[22].mxu1 }
 0x154   :  { %v8990_v23 = vadd.f32 %v666_v22, %v410_v62  ;;  %v6553_v24 = vpop.f32.mrb[23].mxu1  ;;  %v9068_v22 = vld [vmem:[%s11333_s7 + $0x210] sm:$0xff] }
 0x157   :  { %v671_v26 = vpop.f32.mrb[24].mxu1 }
 0x158   :  { %v8992_v27 = vadd.f32 %v671_v26, %v415_v2  ;;  %v6556_v28 = vpop.f32.mrb[25].mxu1  ;;  %v9046_v2 = vrot.slane %v1132_v54, %v9014_v34 }
 0x15b   :  { %v676_v29 = vpop.f32.mrb[26].mxu1 }
 0x15c   :  { %v8994_v30 = vadd.f32 %v676_v29, %v420_v4  ;;  %v6559_v31 = vpop.f32.mrb[27].mxu1 }
 0x15f   :  { %v681_v32 = vpop.f32.mrb[28].mxu1 }
 0x160   :  { %v8996_v33 = vadd.f32 %v681_v32, %v425_v6  ;;  %v6562_v35 = vpop.f32.mrb[29].mxu1 }
 0x163   :  { %v686_v38 = vpop.f32.mrb[30].mxu1 }
 0x164   :  { %v8998_v39 = vadd.f32 %v686_v38, %v430_v8  ;;  %v6565_v40 = vpop.f32.mrb[31].mxu1 }
 0x167   :  { %v691_v44 = vpop.f32.mrb[32].mxu1 }
 0x168   :  { %v9002_v45 = vadd.f32 %v691_v44, %v435_v10  ;;  %v6568_v20 = vpop.f32.mrb[33].mxu1 }
 0x16b   :  { %v696_v37 = vpop.f32.mrb[34].mxu1 }
 0x16c   :  { %v9016_v42 = vadd.f32 %v696_v37, %v440_v12  ;;  %v6571_v43 = vpop.f32.mrb[35].mxu1 }
 0x16f   :  { %v946_v51 = vpop.f32.mrb[36].mxu1  ;;  %v827_v52 = vpop.f32.mrb[0].mxu0 }
 0x170   :  { %v992_v53 = vadd.f32 %v946_v51, %v657_v15  ;;  %v1034_v55 = vadd.f32 %v9019_v47, %v827_v52  ;;  %v829_v57 = vpop.f32.mrb[1].mxu0  ;;  %v6584_v58 = vpop.f32.mrb[37].mxu1 }
 0x171   :  { %v1035_v59 = vadd.f32 %v9025_v49, %v829_v57 }
 0x172   :  { %v1036_v60 = vadd.f32 %v9028_v50, %v992_v53  ;;  %v1061_v62 = vmax.f32 %v1034_v55, 0.0 }
 0x173   :  { %v1062_v4 = vmax.f32 %v1035_v59, 0.0  ;;  %v951_v5 = vpop.f32.mrb[38].mxu1  ;;  %v833_v6 = vpop.f32.mrb[2].mxu0 }
 0x174   :  { %v1063_v7 = vmax.f32 %v1036_v60, 0.0  ;;  %v1105_v8 = vmul.f32 %v9035_v56, %v1061_v62  ;;  %v995_v9 = vadd.f32 %v951_v5, %v662_v18  ;;  %v1037_v10 = vadd.f32 %v9019_v47, %v833_v6  ;;  %v835_v11 = vpop.f32.mrb[3].mxu0  ;;  %v6587_v12 = vpop.f32.mrb[39].mxu1  ;;  %v9063_v18 = vld [vmem:[%s11333_s7 + $0x200] sm:$0xff] }
 0x175   :  { %v1038_v14 = vadd.f32 %v9025_v49, %v835_v11  ;;  %v1106_v16 = vmul.f32 %v9043_v63, %v1062_v4  ;;  %v6911_v21 = vpack.c.bf16 %v9068_v22, %v9063_v18  ;;  %v9108_v11 = vld [vmem:[%s11334_s4 + $0x210] sm:$0xff] }
 0x176   :  { %v1107_v15 = vmul.f32 %v9040_v61, %v1063_v7  ;;  %v1039_v17 = vadd.f32 %v9028_v50, %v995_v9  ;;  %v1064_v19 = vmax.f32 %v1037_v10, 0.0  ;;  %v9071_v24 = vadd.f32 %v9049_v3, %v1105_v8  ;;  %v9103_v10 = vld [vmem:[%s11334_s4 + $0x200] sm:$0xff] }
 0x177   :  { %v1065_v26 = vmax.f32 %v1038_v14, 0.0  ;;  %v956_v28 = vpop.f32.mrb[40].mxu1  ;;  %v839_v29 = vpop.f32.mrb[4].mxu0  ;;  %v9081_v37 = vadd.f32 %v9054_v13, %v1106_v16 }
 0x178   :  { %v1151_v31 = vadd.f32 %v9046_v2, %v1107_v15  ;;  %v1066_v32 = vmax.f32 %v1039_v17, 0.0  ;;  %v1108_v35 = vmul.f32 %v9035_v56, %v1064_v19  ;;  %v841_v36 = vpop.f32.mrb[5].mxu0  ;;  %v6590_v38 = vpop.f32.mrb[41].mxu1  ;;  %v998_v44 = vadd.f32 %v956_v28, %v8990_v23 }
 0x179   :  { %v1109_v40 = vmul.f32 %v9043_v63, %v1065_v26  ;;  %v1040_v20 = vadd.f32 %v9019_v47, %v839_v29  ;;  %v1041_v51 = vadd.f32 %v9025_v49, %v841_v36  ;;  %v1203_v53 = vrot.slane %v9071_v24, 1 }
 0x17a   :  { %v1110_v43 = vmul.f32 %v9040_v61, %v1066_v32  ;;  %v9085_v48 = vadd.f32 %v9049_v3, %v1108_v35  ;;  %v1209_v52 = vrot.slane %v1151_v31, 1  ;;  %v1042_v23 = vadd.f32 %v9028_v50, %v998_v44 }
 0x17b   :  { %v1067_v54 = vmax.f32 %v1040_v20, 0.0  ;;  %v961_v55 = vpop.f32.mrb[42].mxu1  ;;  %v845_v57 = vpop.f32.mrb[6].mxu0  ;;  %v1068_v60 = vmax.f32 %v1041_v51, 0.0  ;;  %v9096_v6 = vadd.f32 %v9054_v13, %v1109_v40  ;;  %v6979_v44 = vpack.c.bf16 %v9108_v11, %v9103_v10 }
 0x17c   :  { %v9091_v58 = vadd.f32 %v9046_v2, %v1110_v43  ;;  %v1204_v59 = vrot.slane %v9085_v48, 1  ;;  %v1001_v62 = vadd.f32 %v961_v55, %v8992_v27  ;;  %v847_v4 = vpop.f32.mrb[7].mxu0  ;;  %v6593_v5 = vpop.f32.mrb[43].mxu1  ;;  %v1069_v7 = vmax.f32 %v1042_v23, 0.0 }
 0x17d   :  { %v1111_v8 = vmul.f32 %v9035_v56, %v1067_v54  ;;  %v1043_v9 = vadd.f32 %v9019_v47, %v845_v57  ;;  %v1112_v14 = vmul.f32 %v9043_v63, %v1068_v60  ;;  %v1044_v26 = vadd.f32 %v9025_v49, %v847_v4 }
 0x17e   :  { %v1210_v27 = vrot.slane %v9091_v58, 1  ;;  %v1205_v12 = vsel %vm168_vm3, %v1203_v53, %v1204_v59  ;;  %v1045_v15 = vadd.f32 %v9028_v50, %v1001_v62  ;;  %v1113_v16 = vmul.f32 %v9040_v61, %v1069_v7 }
 0x17f   :  { %v9118_v17 = vadd.f32 %v9049_v3, %v1111_v8  ;;  %v1070_v19 = vmax.f32 %v1043_v9, 0.0  ;;  %v966_v28 = vpop.f32.mrb[44].mxu1  ;;  %v851_v29 = vpop.f32.mrb[8].mxu0  ;;  %v1206_v20 = vrot.slane %v9081_v37, 1  ;;  %v1207_v51 = vrot.slane %v9096_v6, 1 }
 0x180   :  { %v1211_v32 = vsel %vm168_vm3, %v1209_v52, %v1210_v27  ;;  %v1072_v35 = vmax.f32 %v1045_v15, 0.0  ;;  %v1004_v36 = vadd.f32 %v966_v28, %v8994_v30  ;;  %v853_v38 = vpop.f32.mrb[9].mxu0  ;;  %v6596_v40 = vpop.f32.mrb[45].mxu1  ;;  %v9133_v23 = vadd.f32 %v9054_v13, %v1112_v14 }
 0x181   :  { %v9128_v43 = vmax.f32 %v1151_v31, %v1211_v32  ;;  %v1114_v53 = vmul.f32 %v9035_v56, %v1070_v19  ;;  %v1071_v54 = vmax.f32 %v1044_v26, 0.0  ;;  %v9138_v55 = vadd.f32 %v9046_v2, %v1113_v16 }
 0x182   :  { %v1116_v52 = vmul.f32 %v9040_v61, %v1072_v35  ;;  %v1048_v30 = vadd.f32 %v9028_v50, %v1004_v36  ;;  %v1212_v57 = vrot.slane %v9118_v17, 1  ;;  %v1046_v31 = vadd.f32 %v9019_v47, %v851_v29 }
 0x183   :  { %v1047_v60 = vadd.f32 %v9025_v49, %v853_v38  ;;  %v971_v62 = vpop.f32.mrb[46].mxu1  ;;  %v857_v4 = vpop.f32.mrb[10].mxu0  ;;  %v9144_v5 = vadd.f32 %v9049_v3, %v1114_v53  ;;  %v1115_v7 = vmul.f32 %v9043_v63, %v1071_v54  ;;  %v1208_v19 = vsel %vm168_vm3, %v1206_v20, %v1207_v51 }
 0x184   :  { %v1075_v8 = vmax.f32 %v1048_v30, 0.0  ;;  %v1007_v9 = vadd.f32 %v971_v62, %v8996_v33  ;;  %v859_v10 = vpop.f32.mrb[11].mxu0  ;;  %v6599_v11 = vpop.f32.mrb[47].mxu1  ;;  %v9149_v14 = vadd.f32 %v9046_v2, %v1116_v52  ;;  %v1073_v15 = vmax.f32 %v1046_v31, 0.0 }
 0x185   :  { %v1074_v16 = vmax.f32 %v1047_v60, 0.0  ;;  %v1214_v26 = vrot.slane %v9133_v23, 1  ;;  %v9154_v28 = vadd.f32 %v9054_v13, %v1115_v7  ;;  %v1282_v36 = vmax.f32 %v9081_v37, %v1208_v19 }
 0x186   :  { %v1119_v29 = vmul.f32 %v9040_v61, %v1075_v8  ;;  %v1051_v32 = vadd.f32 %v9028_v50, %v1007_v9  ;;  %v1117_v33 = vmul.f32 %v9035_v56, %v1073_v15  ;;  %v1049_v38 = vadd.f32 %v9019_v47, %v857_v4 }
 0x187   :  { %v1118_v35 = vmul.f32 %v9043_v63, %v1074_v16  ;;  %v976_v40 = vpop.f32.mrb[48].mxu1  ;;  %v863_v53 = vpop.f32.mrb[12].mxu0  ;;  %v1216_v20 = vrot.slane %v9138_v55, 1  ;;  %v1281_v30 = vmax.f32 %v9071_v24, %v1205_v12  ;;  %v1222_v62 = vrot.slane %v9149_v14, 1  ;;  %1468 = vmatprep.mubr.f32.mxu0 %v1282_v36  ;;  %1774 = vmatprep.mubr.f32.mxu1 %v1282_v36 }
 0x188   :  { %v9164_v52 = vadd.f32 %v9046_v2, %v1119_v29  ;;  %v1078_v54 = vmax.f32 %v1051_v32, 0.0  ;;  %v865_v31 = vpop.f32.mrb[13].mxu0  ;;  %v6602_v60 = vpop.f32.mrb[49].mxu1  ;;  %v1218_v7 = vrot.slane %v9144_v5, 1  ;;  %v1076_v37 = vmax.f32 %v1049_v38, 0.0 }
 0x189   :  { %v1050_v4 = vadd.f32 %v9025_v49, %v859_v10  ;;  %v1220_v8 = vrot.slane %v9154_v28, 1  ;;  %1469 = vmatmul.mubr.f32.vlgmr.msra.gmra.mrb[18].mxu0 %v1281_v30  ;;  %1775 = vmatmul.mubr.f32.vlgmr.msra.gmra.mrb[54].mxu1 %v1281_v30  ;;  %v1010_v11 = vadd.f32 %v976_v40, %v8998_v39  ;;  %v1215_v24 = vsel %vm168_vm3, %v1207_v51, %v1214_v26 }
 0x18a   :  { %v1122_v9 = vmul.f32 %v9040_v61, %v1078_v54  ;;  %v9177_v12 = vadd.f32 %v9049_v3, %v1117_v33  ;;  %v9180_v15 = vadd.f32 %v9054_v13, %v1118_v35  ;;  %v1120_v10 = vmul.f32 %v9035_v56, %v1076_v37  ;;  %6912 = vmatpush1.bf16.msra.mxu0 %v6911_v21 }
 0x18b   :  { %v1077_v16 = vmax.f32 %v1050_v4, 0.0  ;;  %v981_v19 = vpop.f32.mrb[50].mxu1  ;;  %v869_v29 = vpop.f32.mrb[14].mxu0  ;;  %6980 = vmatpush1.bf16.msra.mxu1 %v6979_v44  ;;  %v1228_v39 = vrot.slane %v9164_v52, 1  ;;  %v1054_v51 = vadd.f32 %v9028_v50, %v1010_v11  ;;  %v1285_v32 = vmax.f32 %v9096_v6, %v1215_v24 }
 0x18c   :  { %v1052_v33 = vadd.f32 %v9019_v47, %v863_v53  ;;  %v871_v35 = vpop.f32.mrb[15].mxu0  ;;  %v6605_v36 = vpop.f32.mrb[51].mxu1  ;;  %v9191_v38 = vadd.f32 %v9046_v2, %v1122_v9  ;;  %v1213_v18 = vsel %vm168_vm3, %v1204_v59, %v1212_v57  ;;  %v1053_v22 = vadd.f32 %v9025_v49, %v865_v31 }
 0x18d   :  { %v1121_v40 = vmul.f32 %v9043_v63, %v1077_v16  ;;  %v9201_v21 = vadd.f32 %v9049_v3, %v1120_v10  ;;  %v1081_v6 = vmax.f32 %v1054_v51, 0.0  ;;  %1474 = vmatprep.mubr.f32.mxu0 %v1285_v32  ;;  %1780 = vmatprep.mubr.f32.mxu1 %v1285_v32  ;;  %v1284_v53 = vmax.f32 %v9085_v48, %v1213_v18 }
 0x18e   :  { %v1079_v44 = vmax.f32 %v1052_v33, 0.0  ;;  %v1224_v54 = vrot.slane %v9177_v12, 1  ;;  %v1080_v60 = vmax.f32 %v1053_v22, 0.0  ;;  %v1013_v37 = vadd.f32 %v981_v19, %v9002_v45 }
 0x18f   :  { %v9206_v30 = vadd.f32 %v9054_v13, %v1121_v40  ;;  %v986_v59 = vpop.f32.mrb[52].mxu1  ;;  %v875_v4 = vpop.f32.mrb[16].mxu0  ;;  %v1226_v31 = vrot.slane %v9180_v15, 1  ;;  %v1125_v9 = vmul.f32 %v9040_v61, %v1081_v6  ;;  %1475 = vmatmul.mubr.f32.gmra.mrb[20].mxu0 %v1284_v53  ;;  %1781 = vmatmul.mubr.f32.gmra.mrb[56].mxu1 %v1284_v53  ;;  %v1221_v48 = vsel %vm168_vm3, %v1214_v26, %v1220_v8 }
 0x190   :  { %v1123_v11 = vmul.f32 %v9035_v56, %v1079_v44  ;;  %v877_v24 = vpop.f32.mrb[17].mxu0  ;;  %v6608_v10 = vpop.f32.mrb[53].mxu1  ;;  %v1234_v45 = vrot.slane %v9191_v38, 1  ;;  %v1124_v16 = vmul.f32 %v9043_v63, %v1080_v60  ;;  %v1057_v19 = vadd.f32 %v9028_v50, %v1013_v37 }
 0x191   :  { %v1288_v51 = vmax.f32 %v9133_v23, %v1221_v48  ;;  %v1230_v32 = vrot.slane %v9201_v21, 1  ;;  %v1055_v36 = vadd.f32 %v9019_v47, %v869_v29  ;;  %v1219_v26 = vsel %vm168_vm3, %v1212_v57, %v1218_v7 }
 0x192   :  { %v9223_v33 = vadd.f32 %v9049_v3, %v1123_v11  ;;  %v1168_v40 = vadd.f32 %v9054_v13, %v1124_v16  ;;  %v1084_v18 = vmax.f32 %v1057_v19, 0.0  ;;  %v1287_v23 = vmax.f32 %v9118_v17, %v1219_v26 }
 0x193   :  { %1480 = vmatprep.mubr.f32.mxu0 %v1288_v51  ;;  %1786 = vmatprep.mubr.f32.mxu1 %v1288_v51  ;;  %v1056_v22 = vadd.f32 %v9025_v49, %v871_v35  ;;  %v1232_v6 = vrot.slane %v9206_v30, 1  ;;  %v9236_v44 = vadd.f32 %v9046_v2, %v1125_v9  ;;  %v1082_v29 = vmax.f32 %v1055_v36, 0.0 }
 0x194   :  { %v1016_v53 = vadd.f32 %v986_v59, %v9016_v42  ;;  %v1236_v60 = vrot.slane %v9223_v33, 1  ;;  %v1128_v57 = vmul.f32 %v9040_v61, %v1084_v18  ;;  %1481 = vmatmul.mubr.f32.gmra.mrb[22].mxu0 %v1287_v23  ;;  %1787 = vmatmul.mubr.f32.gmra.mrb[58].mxu1 %v1287_v23  ;;  %v1227_v17 = vsel %vm168_vm3, %v1220_v8, %v1226_v31 }
 0x195   :  { %v1083_v37 = vmax.f32 %v1056_v22, 0.0  ;;  %v1126_v35 = vmul.f32 %v9035_v56, %v1082_v29  ;;  %v1291_v9 = vmax.f32 %v9154_v28, %v1227_v17  ;;  %v1058_v48 = vadd.f32 %v9019_v47, %v875_v4 }
 0x196   :  { %v1060_v11 = vadd.f32 %v9028_v50, %v1016_v53  ;;  %v1238_v42 = vrot.slane %v1168_v40, 1  ;;  %v1225_v10 = vsel %vm168_vm3, %v1218_v7, %v1224_v54  ;;  %v1059_v16 = vadd.f32 %v9025_v49, %v877_v24 }
 0x197   :  { %v1127_v59 = vmul.f32 %v9043_v63, %v1083_v37  ;;  %v1170_v8 = vadd.f32 %v9049_v3, %v1126_v35  ;;  %1486 = vmatprep.mubr.f32.mxu0 %v1291_v9  ;;  %1792 = vmatprep.mubr.f32.mxu1 %v1291_v9  ;;  %v1085_v50 = vmax.f32 %v1058_v48, 0.0  ;;  %v1290_v28 = vmax.f32 %v9144_v5, %v1225_v10  ;;  %v5970_v10 = vld [vmem:[%s11338_s25 + $0x2a8] sm:$0xff] }
 0x198   :  { %v1087_v19 = vmax.f32 %v1060_v11, 0.0  ;;  %v1172_v47 = vadd.f32 %v9046_v2, %v1128_v57  ;;  %v1086_v51 = vmax.f32 %v1059_v16, 0.0  ;;  %v1233_v36 = vsel %vm168_vm3, %v1226_v31, %v1232_v6  ;;  %v5975_v16 = vld [vmem:[%s11338_s25 + $0x2d0] sm:$0xff] }
 0x199   :  { %v1171_v4 = vadd.f32 %v9054_v13, %v1127_v59  ;;  %v1242_v26 = vrot.slane %v1170_v8, 1  ;;  %v1129_v49 = vmul.f32 %v9035_v56, %v1085_v50  ;;  %1487 = vmatmul.mubr.f32.gmra.mrb[24].mxu0 %v1290_v28  ;;  %1793 = vmatmul.mubr.f32.gmra.mrb[60].mxu1 %v1290_v28  ;;  %v1294_v24 = vmax.f32 %v9180_v15, %v1233_v36  ;;  %v5986_v50 = vld [vmem:[%s11338_s25 + $0x328] sm:$0xff]  ;;  %v5991_v36 = vld [vmem:[%s11338_s25 + $0x350] sm:$0xff] }
 0x19a   :  { %v1131_v7 = vmul.f32 %v9040_v61, %v1087_v19  ;;  %v1130_v23 = vmul.f32 %v9043_v63, %v1086_v51  ;;  %v1231_v5 = vsel %vm168_vm3, %v1224_v54, %v1230_v32  ;;  %v1239_v22 = vsel %vm168_vm3, %v1232_v6, %v1238_v42  ;;  %v5981_v19 = vld [vmem:[%s11338_s25 + $0x300] sm:$0xff] }
 0x19b   :  { %v1244_v18 = vrot.slane %v1171_v4, 1  ;;  %v1240_v31 = vrot.slane %v9236_v44, 1  ;;  %v1173_v56 = vadd.f32 %v9049_v3, %v1129_v49  ;;  %1492 = vmatprep.mubr.f32.mxu0 %v1294_v24  ;;  %1798 = vmatprep.mubr.f32.mxu1 %v1294_v24  ;;  %v1293_v61 = vmax.f32 %v9177_v12, %v1231_v5  ;;  %v5990_v49 = vld [vmem:[%s11338_s25 + $0x348] sm:$0xff]  ;;  %v5995_v24 = vld [vmem:[%s11338_s25 + $0x370] sm:$0xff] }
 0x19c   :  { %v9270_v29 = vadd.f32 %v9046_v2, %v1131_v7  ;;  %v1174_v15 = vadd.f32 %v9054_v13, %v1130_v23  ;;  %v1297_v63 = vmax.f32 %v9206_v30, %v1239_v22  ;;  %v1237_v53 = vsel %vm168_vm3, %v1230_v32, %v1236_v60  ;;  %v6001_v23 = vld [vmem:[%s11338_s25 + $0x3a0] sm:$0xff]  ;;  %v6006_v5 = vld [vmem:[%s11338_s25 + $0x3c8] sm:$0xff] }
 0x19d   :  { %v1245_v54 = vsel %vm168_vm3, %v1238_v42, %v1244_v18  ;;  %v1246_v6 = vrot.slane %v1172_v47, 1  ;;  %v1248_v57 = vrot.slane %v1173_v56, 1  ;;  %1493 = vmatmul.mubr.f32.gmra.mrb[26].mxu0 %v1293_v61  ;;  %1799 = vmatmul.mubr.f32.gmra.mrb[62].mxu1 %v1293_v61  ;;  %v1296_v2 = vmax.f32 %v9201_v21, %v1237_v53  ;;  %v6016_v61 = vld [vmem:[%s11338_s25 + $0x418] sm:$0xff]  ;;  %v6010_v53 = vld [vmem:[%s11338_s25 + $0x3e8] sm:$0xff] }
 0x19e   :  { %v1300_v37 = vmax.f32 %v1168_v40, %v1245_v54  ;;  %v1250_v3 = vrot.slane %v1174_v15, 1  ;;  %1498 = vmatprep.mubr.f32.mxu0 %v1297_v63  ;;  %1804 = vmatprep.mubr.f32.mxu1 %v1297_v63  ;;  %v1243_v12 = vsel %vm168_vm3, %v1236_v60, %v1242_v26  ;;  %v1217_v13 = vsel %vm168_vm3, %v1210_v27, %v1216_v20  ;;  %v6015_v54 = vld [vmem:[%s11338_s25 + $0x410] sm:$0xff] }
 0x19f   :  { %v1223_v30 = vsel %vm168_vm3, %v1216_v20, %v1222_v62  ;;  %v1252_v21 = vrot.slane %v9270_v29, 1  ;;  %v1299_v32 = vmax.f32 %v9223_v33, %v1243_v12  ;;  %v1249_v40 = vsel %vm168_vm3, %v1242_v26, %v1248_v57  ;;  %v5996_v26 = vld [vmem:[%s11338_s25 + $0x378] sm:$0xff]  ;;  %v6025_v12 = vld [vmem:[%s11338_s25 + $0x460] sm:$0xff] }
 0x1a0   :  { %v1286_v60 = vmax.f32 %v9091_v58, %v1217_v13  ;;  %v1251_v17 = vsel %vm168_vm3, %v1244_v18, %v1250_v3  ;;  %v1302_v35 = vmax.f32 %v1170_v8, %v1249_v40  ;;  %v1289_v11 = vmax.f32 %v9138_v55, %v1223_v30  ;;  %v6031_v13 = vld [vmem:[%s11338_s25 + $0x490] sm:$0xff]  ;;  %v6036_v30 = vld [vmem:[%s11338_s25 + $0x4b8] sm:$0xff] }
 0x1a1   :  { %1499 = vmatmul.mubr.f32.gmra.mrb[28].mxu0 %v1296_v2  ;;  %1805 = vmatmul.mubr.f32.gmra.mrb[64].mxu1 %v1296_v2  ;;  %v1303_v27 = vmax.f32 %v1171_v4, %v1251_v17  ;;  %v1229_v20 = vsel %vm168_vm3, %v1222_v62, %v1228_v39  ;;  %v1235_v58 = vsel %vm168_vm3, %v1228_v39, %v1234_v45  ;;  %v5985_v4 = vld [vmem:[%s11338_s25 + $0x320] sm:$0xff] }
 0x1a2   :  { %1504 = vmatprep.mubr.f32.mxu0 %v1300_v37  ;;  %1810 = vmatprep.mubr.f32.mxu1 %v1300_v37  ;;  %v1292_v33 = vmax.f32 %v9149_v14, %v1229_v20  ;;  %v1295_v55 = vmax.f32 %v9164_v52, %v1235_v58  ;;  %v1241_v9 = vsel %vm168_vm3, %v1234_v45, %v1240_v31  ;;  %v5976_v45 = vld [vmem:[%s11338_s25 + $0x2d8] sm:$0xff] }
 0x1a3   :  { %v1298_v48 = vmax.f32 %v9191_v38, %v1241_v9  ;;  %v1247_v62 = vsel %vm168_vm3, %v1240_v31, %v1246_v6  ;;  %v1253_v42 = vsel %vm168_vm3, %v1246_v6, %v1252_v21  ;;  %v1306_v14 = vmax.f32 %v1174_v15, %v1250_v3  ;;  %v5971_v38 = vld [vmem:[%s11338_s25 + $0x2b0] sm:$0xff]  ;;  %v6000_v31 = vld [vmem:[%s11338_s25 + $0x398] sm:$0xff]  ;;  %v6021_v6 = vld [vmem:[%s11338_s25 + $0x440] sm:$0xff] }
 0x1a4   :  { %v1301_v39 = vmax.f32 %v9236_v44, %v1247_v62  ;;  %v1304_v59 = vmax.f32 %v1172_v47, %v1253_v42  ;;  %v1305_v52 = vmax.f32 %v1173_v56, %v1248_v57  ;;  %v6997_v44 = vpack.c.bf16 %v5976_v45, %v5971_v38  ;;  %v5980_v47 = vld [vmem:[%s11338_s25 + $0x2f8] sm:$0xff]  ;;  %v6011_v56 = vld [vmem:[%s11338_s25 + $0x3f0] sm:$0xff]  ;;  %v6026_v57 = vld [vmem:[%s11338_s25 + $0x468] sm:$0xff] }
 0x1a5   :  { %1505 = vmatmul.mubr.f32.gmra.mrb[30].mxu0 %v1299_v32  ;;  %1811 = vmatmul.mubr.f32.gmra.mrb[66].mxu1 %v1299_v32  ;;  %v6999_v8 = vpack.c.bf16 %v5975_v16, %v5970_v10  ;;  %v7001_v28 = vpack.c.bf16 %v5986_v50, %v5981_v19  ;;  %v7003_v51 = vpack.c.bf16 %v5985_v4, %v5980_v47  ;;  %v6020_v3 = vld [vmem:[%s11338_s25 + $0x438] sm:$0xff] }
 0x1a6   :  { %1510 = vmatprep.mubr.f32.mxu0 %v1303_v27  ;;  %1816 = vmatprep.mubr.f32.mxu1 %v1303_v27  ;;  %v7005_v7 = vpack.c.bf16 %v5996_v26, %v5991_v36  ;;  %v7007_v18 = vpack.c.bf16 %v5995_v24, %v5990_v49  ;;  %v7009_v22 = vpack.c.bf16 %v6006_v5, %v6001_v23 }
 0x1a7   :  { %6998 = vmatprep.subr.bf16.mxu1 %v6997_v44  ;;  %v7013_v63 = vpack.c.bf16 %v6016_v61, %v6011_v56  ;;  %v7015_v2 = vpack.c.bf16 %v6015_v54, %v6010_v53  ;;  %v7017_v37 = vpack.c.bf16 %v6026_v57, %v6021_v6  ;;  %v7021_v32 = vpack.c.bf16 %v6036_v30, %v6031_v13 }
 0x1a9   :  { %1511 = vmatmul.mubr.f32.gmra.mrb[32].mxu0 %v1302_v35  ;;  %1817 = vmatmul.mubr.f32.gmra.mrb[68].mxu1 %v1302_v35 }
 0x1aa   :  { %1516 = vmatprep.mubr.f32.mxu0 %v1306_v14  ;;  %1822 = vmatprep.mubr.f32.mxu1 %v1306_v14 }
 0x1ad   :  { %1517 = vmatmul.mubr.f32.gmra.mrb[34].mxu0 %v1305_v52  ;;  %1823 = vmatmul.mubr.f32.gmra.mrb[70].mxu1 %v1305_v52 }
 0x1ae   :  { %1587 = vmatprep.mubr.f32.mxu0 %v11307_v1  ;;  %1893 = vmatprep.mubr.f32.mxu1 %v11307_v1 }
 0x1b1   :  { %5945 = vmatmul.mubr.msk.f32.vlgmr.msra.gmra.mrb[18].mxu0 %vm1376_vm5, %v9128_v43  ;;  %5954 = vmatmul.mubr.msk.f32.vlgmr.msra.gmra.mrb[54].mxu1 %vm1376_vm5, %v9128_v43  ;;  %v1307_v43 = vmax.f32 %v9270_v29, %v1252_v21  ;;  %v6005_v29 = vld [vmem:[%s11338_s25 + $0x3c0] sm:$0xff]  ;;  %v7019_v21 = vpack.c.bf16 %v6025_v12, %v6020_v3 }
 0x1b2   :  { %1593 = vmatprep.mubr.f32.mxu0 %v11307_v1  ;;  %1899 = vmatprep.mubr.f32.mxu1 %v11307_v1  ;;  %v7011_v15 = vpack.c.bf16 %v6005_v29, %v6000_v31 }
 0x1b3   :  { %7000 = vmatpush1.bf16.msra.mxu1 %v6999_v8 }
 0x1b4   :  { %7002 = vmatprep.subr.bf16.mxu1 %v7001_v28 }
 0x1b5   :  { %5946 = vmatmul.mubr.msk.f32.gmra.mrb[20].mxu0 %vm1376_vm5, %v1286_v60  ;;  %5955 = vmatmul.mubr.msk.f32.gmra.mrb[56].mxu1 %vm1376_vm5, %v1286_v60 }
 0x1b6   :  { %1599 = vmatprep.mubr.f32.mxu0 %v11307_v1  ;;  %1905 = vmatprep.mubr.f32.mxu1 %v11307_v1 }
 0x1b7   :  { %7004 = vmatpush1.bf16.msra.mxu1 %v7003_v51 }
 0x1b8   :  { %7006 = vmatprep.subr.bf16.mxu1 %v7005_v7 }
 0x1b9   :  { %5947 = vmatmul.mubr.msk.f32.gmra.mrb[22].mxu0 %vm1376_vm5, %v1289_v11  ;;  %5956 = vmatmul.mubr.msk.f32.gmra.mrb[58].mxu1 %vm1376_vm5, %v1289_v11 }
 0x1ba   :  { %1605 = vmatprep.mubr.f32.mxu0 %v11307_v1  ;;  %1911 = vmatprep.mubr.f32.mxu1 %v11307_v1 }
 0x1bb   :  { %7008 = vmatpush1.bf16.msra.mxu1 %v7007_v18 }
 0x1bc   :  { %7010 = vmatprep.subr.bf16.mxu1 %v7009_v22 }
 0x1bd   :  { %5948 = vmatmul.mubr.msk.f32.gmra.mrb[24].mxu0 %vm1376_vm5, %v1292_v33  ;;  %5957 = vmatmul.mubr.msk.f32.gmra.mrb[60].mxu1 %vm1376_vm5, %v1292_v33 }
 0x1be   :  { %1611 = vmatprep.mubr.f32.mxu0 %v11307_v1  ;;  %1917 = vmatprep.mubr.f32.mxu1 %v11307_v1 }
 0x1bf   :  { %7012 = vmatpush1.bf16.msra.mxu1 %v7011_v15 }
 0x1c0   :  { %7014 = vmatprep.subr.bf16.mxu1 %v7013_v63 }
 0x1c1   :  { %5949 = vmatmul.mubr.msk.f32.gmra.mrb[26].mxu0 %vm1376_vm5, %v1295_v55  ;;  %5958 = vmatmul.mubr.msk.f32.gmra.mrb[62].mxu1 %vm1376_vm5, %v1295_v55 }
 0x1c2   :  { %1617 = vmatprep.mubr.f32.mxu0 %v11307_v1  ;;  %1923 = vmatprep.mubr.f32.mxu1 %v11307_v1 }
 0x1c3   :  { %7016 = vmatpush1.bf16.msra.mxu1 %v7015_v2 }
 0x1c4   :  { %7018 = vmatprep.subr.bf16.mxu1 %v7017_v37 }
 0x1c5   :  { %5950 = vmatmul.mubr.msk.f32.gmra.mrb[28].mxu0 %vm1376_vm5, %v1298_v48  ;;  %5959 = vmatmul.mubr.msk.f32.gmra.mrb[64].mxu1 %vm1376_vm5, %v1298_v48 }
 0x1c6   :  { %1623 = vmatprep.mubr.f32.mxu0 %v11307_v1  ;;  %1929 = vmatprep.mubr.f32.mxu1 %v11307_v1 }
 0x1c7   :  { %7020 = vmatpush1.bf16.msra.mxu1 %v7019_v21 }
 0x1c8   :  { %7022 = vmatprep.subr.bf16.mxu1 %v7021_v32 }
 0x1c9   :  { %5951 = vmatmul.mubr.msk.f32.gmra.mrb[30].mxu0 %vm1376_vm5, %v1301_v39  ;;  %5960 = vmatmul.mubr.msk.f32.gmra.mrb[66].mxu1 %vm1376_vm5, %v1301_v39 }
 0x1ca   :  { %1629 = vmatprep.mubr.f32.mxu0 %v11307_v1  ;;  %1935 = vmatprep.mubr.f32.mxu1 %v11307_v1 }
 0x1cd   :  { %5952 = vmatmul.mubr.msk.f32.gmra.mrb[32].mxu0 %vm1376_vm5, %v1304_v59  ;;  %5961 = vmatmul.mubr.msk.f32.gmra.mrb[68].mxu1 %vm1376_vm5, %v1304_v59 }
 0x1ce   :  { %1635 = vmatprep.mubr.f32.mxu0 %v11307_v1  ;;  %1941 = vmatprep.mubr.f32.mxu1 %v11307_v1 }
 0x1d1   :  { %5953 = vmatmul.mubr.msk.f32.gmra.mrb[34].mxu0 %vm1376_vm5, %v1307_v43  ;;  %5962 = vmatmul.mubr.msk.f32.gmra.mrb[70].mxu1 %vm1376_vm5, %v1307_v43 }
 0x1d2   :  { %2058 = vmatprep.mubr.f32.mxu0 %v11307_v1 }
 0x284   :  { %v1589_v40 = vpop.f32.mrb[18].mxu0  ;;  %v1895_v60 = vpop.f32.mrb[54].mxu1 }
 0x285   :  { %v1948_v17 = vmax.f32 %v1589_v40, %v1895_v60  ;;  %v1591_v35 = vpop.f32.mrb[19].mxu0  ;;  %v1897_v11 = vpop.f32.mrb[55].mxu1 }
 0x286   :  { %v1949_v27 = vmax.f32 %v1591_v35, %v1897_v11  ;;  %v5973_v35 = vld [vmem:[%s11338_s25 + $0x2c0] sm:$0xff]  ;;  %v5978_v11 = vld [vmem:[%s11338_s25 + $0x2e8] sm:$0xff] }
 0x288   :  { %v1595_v20 = vpop.f32.mrb[20].mxu0  ;;  %v1901_v58 = vpop.f32.mrb[56].mxu1 }
 0x289   :  { %v1950_v33 = vmax.f32 %v1595_v20, %v1901_v58  ;;  %v1597_v55 = vpop.f32.mrb[21].mxu0  ;;  %v1903_v9 = vpop.f32.mrb[57].mxu1  ;;  %v5972_v20 = vld [vmem:[%s11338_s25 + $0x2b8] sm:$0xff]  ;;  %v5977_v58 = vld [vmem:[%s11338_s25 + $0x2e0] sm:$0xff] }
 0x28a   :  { %v1951_v48 = vmax.f32 %v1597_v55, %v1903_v9  ;;  %v5988_v55 = vld [vmem:[%s11338_s25 + $0x338] sm:$0xff]  ;;  %v7029_v9 = vpack.c.bf16 %v5978_v11, %v5973_v35  ;;  %v6045_v35 = vld [vmem:[%s11338_s25 + $0x500] sm:$0xff]  ;;  %v6042_v11 = vld [vmem:[%s11338_s25 + $0x4e8] sm:$0xff] }
 0x28b   :  { %v6983_v62 = vpack.c.bf16 %v1950_v33, %v1948_v17  ;;  %v5983_v33 = vld [vmem:[%s11338_s25 + $0x310] sm:$0xff] }
 0x28c   :  { %v6981_v42 = vpack.c.bf16 %v1951_v48, %v1949_v27  ;;  %v1601_v39 = vpop.f32.mrb[22].mxu0  ;;  %v1907_v59 = vpop.f32.mrb[58].mxu1  ;;  %v1966_v48 = vld [vmem:[%s11339_s3] sm:$0xff] }
 0x28d   :  { %v1952_v14 = vmax.f32 %v1601_v39, %v1907_v59  ;;  %v1603_v52 = vpop.f32.mrb[23].mxu0  ;;  %v1909_v43 = vpop.f32.mrb[59].mxu1  ;;  %v5982_v39 = vld [vmem:[%s11338_s25 + $0x308] sm:$0xff]  ;;  %v5987_v59 = vld [vmem:[%s11338_s25 + $0x330] sm:$0xff] }
 0x28e   :  { %v1953_v38 = vmax.f32 %v1603_v52, %v1909_v43  ;;  %6982 = vmatprep.subr.bf16.mxu0 %v6981_v42  ;;  %v7033_v42 = vpack.c.bf16 %v5988_v55, %v5983_v33  ;;  %v5998_v52 = vld [vmem:[%s11338_s25 + $0x388] sm:$0xff]  ;;  %v6053_v55 = vld [vmem:[%s11338_s25 + $0x540] sm:$0xff] }
 0x28f   :  { %6984 = vmatpush1.bf16.msra.mxu0 %v6983_v62  ;;  %v7031_v62 = vpack.c.bf16 %v5977_v58, %v5972_v20  ;;  %v1967_v43 = vld [vmem:[%s11339_s3 + $0x8] sm:$0xff]  ;;  %v6047_v20 = vld [vmem:[%s11338_s25 + $0x510] sm:$0xff] }
 0x290   :  { %v1607_v45 = vpop.f32.mrb[24].mxu0  ;;  %v1913_v44 = vpop.f32.mrb[60].mxu1  ;;  %v6051_v58 = vld [vmem:[%s11338_s25 + $0x530] sm:$0xff]  ;;  %v7059_v33 = vpack.c.bf16 %v6047_v20, %v6042_v11  ;;  %v2116_v11 = vld [vmem:[%s11338_s25 + $0xd8] sm:$0xff] }
 0x291   :  { %v1954_v10 = vmax.f32 %v1607_v45, %v1913_v44  ;;  %v1609_v16 = vpop.f32.mrb[25].mxu0  ;;  %v1915_v8 = vpop.f32.mrb[61].mxu1  ;;  %v5992_v44 = vld [vmem:[%s11338_s25 + $0x358] sm:$0xff] }
 0x292   :  { %v1955_v19 = vmax.f32 %v1609_v16, %v1915_v8  ;;  %v6003_v16 = vld [vmem:[%s11338_s25 + $0x3b0] sm:$0xff]  ;;  %v6008_v8 = vld [vmem:[%s11338_s25 + $0x3d8] sm:$0xff] }
 0x293   :  { %v6987_v50 = vpack.c.bf16 %v1954_v10, %v1952_v14  ;;  %v5993_v14 = vld [vmem:[%s11338_s25 + $0x360] sm:$0xff] }
 0x294   :  { %v6985_v28 = vpack.c.bf16 %v1955_v19, %v1953_v38  ;;  %v1613_v47 = vpop.f32.mrb[26].mxu0  ;;  %v1919_v4 = vpop.f32.mrb[62].mxu1  ;;  %v7035_v38 = vpack.c.bf16 %v5987_v59, %v5982_v39  ;;  %v7037_v45 = vpack.c.bf16 %v5998_v52, %v5993_v14  ;;  %v5997_v10 = vld [vmem:[%s11338_s25 + $0x380] sm:$0xff]  ;;  %v1968_v19 = vld [vmem:[%s11339_s3 + $0x10] sm:$0xff]  ;;  %v5974_v52 = vld [vmem:[%s11338_s25 + $0x2c8] sm:$0xff] }
 0x295   :  { %v1956_v51 = vmax.f32 %v1613_v47, %v1919_v4  ;;  %v1615_v36 = vpop.f32.mrb[27].mxu0  ;;  %v1921_v26 = vpop.f32.mrb[63].mxu1  ;;  %v6002_v47 = vld [vmem:[%s11338_s25 + $0x3a8] sm:$0xff]  ;;  %v6007_v4 = vld [vmem:[%s11338_s25 + $0x3d0] sm:$0xff] }
 0x296   :  { %v1957_v7 = vmax.f32 %v1615_v36, %v1921_v26  ;;  %6986 = vmatprep.subr.bf16.mxu0 %v6985_v28  ;;  %v7041_v28 = vpack.c.bf16 %v6008_v8, %v6003_v16  ;;  %v6018_v36 = vld [vmem:[%s11338_s25 + $0x428] sm:$0xff]  ;;  %v1969_v26 = vld [vmem:[%s11339_s3 + $0x18] sm:$0xff] }
 0x297   :  { %6988 = vmatpush1.bf16.msra.mxu0 %v6987_v50  ;;  %v7039_v50 = vpack.c.bf16 %v5997_v10, %v5992_v44  ;;  %v2096_v44 = vld [vmem:[%s11338_s25 + $0x38] sm:$0xff]  ;;  %v2102_v10 = vld [vmem:[%s11338_s25 + $0x68] sm:$0xff] }
 0x298   :  { %v1619_v49 = vpop.f32.mrb[28].mxu0  ;;  %v1925_v24 = vpop.f32.mrb[64].mxu1 }
 0x299   :  { %v1958_v18 = vmax.f32 %v1619_v49, %v1925_v24  ;;  %v1621_v23 = vpop.f32.mrb[29].mxu0  ;;  %v1927_v5 = vpop.f32.mrb[65].mxu1  ;;  %v6012_v24 = vld [vmem:[%s11338_s25 + $0x3f8] sm:$0xff] }
 0x29a   :  { %v1959_v22 = vmax.f32 %v1621_v23, %v1927_v5  ;;  %v6023_v23 = vld [vmem:[%s11338_s25 + $0x450] sm:$0xff]  ;;  %v6028_v5 = vld [vmem:[%s11338_s25 + $0x478] sm:$0xff] }
 0x29b   :  { %v6991_v31 = vpack.c.bf16 %v1958_v18, %v1956_v51  ;;  %v6013_v51 = vld [vmem:[%s11338_s25 + $0x400] sm:$0xff] }
 0x29c   :  { %v6989_v29 = vpack.c.bf16 %v1959_v22, %v1957_v7  ;;  %v1625_v56 = vpop.f32.mrb[30].mxu0  ;;  %v1931_v61 = vpop.f32.mrb[66].mxu1  ;;  %v7043_v7 = vpack.c.bf16 %v6007_v4, %v6002_v47  ;;  %v7045_v49 = vpack.c.bf16 %v6018_v36, %v6013_v51  ;;  %v6017_v18 = vld [vmem:[%s11338_s25 + $0x420] sm:$0xff]  ;;  %v2107_v47 = vld [vmem:[%s11338_s25 + $0x90] sm:$0xff] }
 0x29d   :  { %v1960_v15 = vmax.f32 %v1625_v56, %v1931_v61  ;;  %v1627_v63 = vpop.f32.mrb[31].mxu0  ;;  %v1933_v53 = vpop.f32.mrb[67].mxu1  ;;  %v1970_v22 = vld [vmem:[%s11339_s3 + $0x20] sm:$0x3f]  ;;  %v6022_v56 = vld [vmem:[%s11338_s25 + $0x448] sm:$0xff]  ;;  %v6027_v61 = vld [vmem:[%s11338_s25 + $0x470] sm:$0xff] }
 0x29e   :  { %v1961_v54 = vmax.f32 %v1627_v63, %v1933_v53  ;;  %6990 = vmatprep.subr.bf16.mxu0 %v6989_v29  ;;  %v7049_v29 = vpack.c.bf16 %v6028_v5, %v6023_v23  ;;  %v6038_v63 = vld [vmem:[%s11338_s25 + $0x4c8] sm:$0xff]  ;;  %v7051_v53 = vpack.c.bf16 %v6027_v61, %v6022_v56  ;;  %v5989_v23 = vld [vmem:[%s11338_s25 + $0x340] sm:$0xff] }
 0x29f   :  { %6992 = vmatpush1.bf16.msra.mxu0 %v6991_v31  ;;  %v7047_v31 = vpack.c.bf16 %v6017_v18, %v6012_v24  ;;  %v5984_v18 = vld [vmem:[%s11338_s25 + $0x318] sm:$0xff]  ;;  %v2101_v56 = vld [vmem:[%s11338_s25 + $0x60] sm:$0xff]  ;;  %v2106_v61 = vld [vmem:[%s11338_s25 + $0x88] sm:$0xff] }
 0x2a0   :  { %v1631_v6 = vpop.f32.mrb[32].mxu0  ;;  %v1937_v57 = vpop.f32.mrb[68].mxu1 }
 0x2a1   :  { %v1962_v2 = vmax.f32 %v1631_v6, %v1937_v57  ;;  %v1633_v37 = vpop.f32.mrb[33].mxu0  ;;  %v1939_v3 = vpop.f32.mrb[69].mxu1  ;;  %v6030_v6 = vld [vmem:[%s11338_s25 + $0x488] sm:$0xff]  ;;  %v6035_v57 = vld [vmem:[%s11338_s25 + $0x4b0] sm:$0xff] }
 0x2a2   :  { %v1963_v12 = vmax.f32 %v1633_v37, %v1939_v3  ;;  %v7023_v37 = vpack.c.bf16 %v6035_v57, %v6030_v6  ;;  %v6037_v3 = vld [vmem:[%s11338_s25 + $0x4c0] sm:$0xff] }
 0x2a3   :  { %v6995_v13 = vpack.c.bf16 %v1962_v2, %v1960_v15  ;;  %v6033_v15 = vld [vmem:[%s11338_s25 + $0x4a0] sm:$0xff]  ;;  %v6032_v2 = vld [vmem:[%s11338_s25 + $0x498] sm:$0xff] }
 0x2a4   :  { %v6993_v30 = vpack.c.bf16 %v1963_v12, %v1961_v54  ;;  %v1637_v21 = vpop.f32.mrb[34].mxu0  ;;  %v1943_v32 = vpop.f32.mrb[70].mxu1  ;;  %v7053_v54 = vpack.c.bf16 %v6038_v63, %v6033_v15  ;;  %v6041_v12 = vld [vmem:[%s11338_s25 + $0x4e0] sm:$0xff]  ;;  %7024 = vmatpush1.bf16.msra.mxu1 %v7023_v37  ;;  %v7065_v37 = vpack.c.bf16 %v5989_v23, %v5984_v18  ;;  %v2132_v18 = vld [vmem:[%s11338_s25 + $0x158] sm:$0xff] }
 0x2a5   :  { %v1964_v40 = vmax.f32 %v1637_v21, %v1943_v32  ;;  %v1639_v60 = vpop.f32.mrb[35].mxu0  ;;  %v1945_v17 = vpop.f32.mrb[71].mxu1  ;;  %v6043_v32 = vld [vmem:[%s11338_s25 + $0x4f0] sm:$0xff]  ;;  %v2117_v6 = vld [vmem:[%s11338_s25 + $0xe0] sm:$0xff] }
 0x2a6   :  { %v1965_v27 = vmax.f32 %v1639_v60, %v1945_v17  ;;  %6994 = vmatprep.subr.bf16.mxu0 %v6993_v30  ;;  %v7055_v30 = vpack.c.bf16 %v6037_v3, %v6032_v2  ;;  %v6040_v17 = vld [vmem:[%s11338_s25 + $0x4d8] sm:$0xff]  ;;  %v2137_v23 = vld [vmem:[%s11338_s25 + $0x180] sm:$0xff] }
 0x2a7   :  { %6996 = vmatpush1.bf16.msra.mxu0 %v6995_v13  ;;  %v6046_v13 = vld [vmem:[%s11338_s25 + $0x508] sm:$0xff] }
 0x2a8   :  { %5963 = vmatprep.subr.msk.mxu0 %vm1987_vm6, %v1965_v27  ;;  %v7025_v21 = vpack.c.bf16 %v6046_v13, %v6041_v12  ;;  %v7027_v27 = vpack.c.bf16 %v6045_v35, %v6040_v17  ;;  %v7123_v13 = vpack.c.bf16 %v2106_v61, %v2101_v56  ;;  %v2111_v35 = vld [vmem:[%s11338_s25 + $0xb0] sm:$0xff]  ;;  %v6014_v61 = vld [vmem:[%s11338_s25 + $0x408] sm:$0xff] }
 0x2aa   :  { %7026 = vmatprep.subr.bf16.mxu1 %v7025_v21  ;;  %v5999_v21 = vld [vmem:[%s11338_s25 + $0x390] sm:$0xff] }
 0x2ab   :  { %5964 = vmatpush1.msk.msra.mxu0 %vm1987_vm6, %v1964_v40  ;;  %v6048_v40 = vld [vmem:[%s11338_s25 + $0x518] sm:$0xff]  ;;  %7028 = vmatpush1.bf16.msra.mxu1 %v7027_v27 }
 0x2ac   :  { %5965 = vmatmul.mubr.msk.f32.vlgmr.msra.gmra.mrb[36].mxu0 %vm1971_vm7, %v1966_v48  ;;  %7030 = vmatprep.subr.bf16.mxu0 %v7029_v9  ;;  %v7057_v60 = vpack.c.bf16 %v6048_v40, %v6043_v32  ;;  %v6050_v9 = vld [vmem:[%s11338_s25 + $0x528] sm:$0xff]  ;;  %v2092_v48 = vld [vmem:[%s11338_s25 + $0x18] sm:$0xff] }
 0x2ad   :  { %2064 = vmatprep.mubr.f32.mxu0 %v11307_v1  ;;  %7032 = vmatpush1.bf16.msra.mxu0 %v7031_v62  ;;  %v2097_v62 = vld [vmem:[%s11338_s25 + $0x40] sm:$0xff] }
 0x2ae   :  { %7034 = vmatprep.subr.bf16.mxu0 %v7033_v42  ;;  %2336 = vmatprep.subr.mxu1 %v6051_v58  ;;  %v6052_v42 = vld [vmem:[%s11338_s25 + $0x538] sm:$0xff]  ;;  %v7117_v39 = vpack.c.bf16 %v2097_v62, %v2092_v48 }
 0x2af   :  { %2337 = vmatpush1.msra.mxu1 %v6050_v9 }
 0x2b0   :  { %5966 = vmatmul.mubr.msk.f32.gmra.mrb[38].mxu0 %vm1971_vm7, %v1967_v43  ;;  %7061 = vmatprep.subr.bf16.mxu1 %v11305_v0  ;;  %v5979_v43 = vld [vmem:[%s11338_s25 + $0x2f0] sm:$0xff] }
 0x2b1   :  { %2070 = vmatprep.mubr.f32.mxu0 %v11307_v1  ;;  %7036 = vmatpush1.bf16.msra.mxu0 %v7035_v38 }
 0x2b2   :  { %7038 = vmatprep.subr.bf16.mxu0 %v7037_v45  ;;  %v2091_v45 = vld [vmem:[%s11338_s25 + $0x10] sm:$0xff] }
 0x2b3   :  { %v7119_v24 = vpack.c.bf16 %v2096_v44, %v2091_v45  ;;  %v6009_v45 = vld [vmem:[%s11338_s25 + $0x3e0] sm:$0xff] }
 0x2b4   :  { %5967 = vmatmul.mubr.msk.f32.gmra.mrb[40].mxu0 %vm1971_vm7, %v1968_v19 }
 0x2b5   :  { %2076 = vmatprep.mubr.f32.mxu0 %v11307_v1  ;;  %7040 = vmatpush1.bf16.msra.mxu0 %v7039_v50 }
 0x2b6   :  { %7042 = vmatprep.subr.bf16.mxu0 %v7041_v28 }
 0x2b8   :  { %5968 = vmatmul.mubr.msk.f32.gmra.mrb[42].mxu0 %vm1971_vm7, %v1969_v26 }
 0x2b9   :  { %2082 = vmatprep.mubr.f32.mxu0 %v11307_v1  ;;  %7044 = vmatpush1.bf16.msra.mxu0 %v7043_v7 }
 0x2ba   :  { %7046 = vmatprep.subr.bf16.mxu0 %v7045_v49  ;;  %v7062_v49 = vpack.c.bf16 %v5979_v43, %v5974_v52  ;;  %v7127_v52 = vpack.c.bf16 %v2116_v11, %v2111_v35  ;;  %v6004_v43 = vld [vmem:[%s11338_s25 + $0x3b8] sm:$0xff]  ;;  %v6029_v11 = vld [vmem:[%s11338_s25 + $0x480] sm:$0xff] }
 0x2bb   :  { %v6024_v35 = vld [vmem:[%s11338_s25 + $0x458] sm:$0xff] }
 0x2bc   :  { %5969 = vmatmul.mubr.msk.f32.gmra.mrb[44].mxu0 %vm1971_vm7, %v1970_v22 }
 0x2bd   :  { %7048 = vmatpush1.bf16.msra.mxu0 %v7047_v31 }
 0x2be   :  { %7050 = vmatprep.subr.bf16.mxu0 %v7049_v29  ;;  %v7121_v29 = vpack.c.bf16 %v2107_v47, %v2102_v10 }
 0x2c1   :  { %7052 = vmatpush1.bf16.msra.mxu0 %v7051_v53 }
 0x2c2   :  { %7054 = vmatprep.subr.bf16.mxu0 %v7053_v54  ;;  %v2112_v54 = vld [vmem:[%s11338_s25 + $0xb8] sm:$0xff] }
 0x2c3   :  { %v7125_v17 = vpack.c.bf16 %v2117_v6, %v2112_v54  ;;  %v6019_v6 = vld [vmem:[%s11338_s25 + $0x430] sm:$0xff] }
 0x2c5   :  { %7056 = vmatpush1.bf16.msra.mxu0 %v7055_v30  ;;  %v5994_v30 = vld [vmem:[%s11338_s25 + $0x368] sm:$0xff] }
 0x2c6   :  { %7058 = vmatprep.subr.bf16.mxu0 %v7057_v60  ;;  %v7068_v62 = vpack.c.bf16 %v5999_v21, %v5994_v30  ;;  %v2147_v30 = vld [vmem:[%s11338_s25 + $0x1d0] sm:$0xff]  ;;  %v7074_v21 = vpack.c.bf16 %v6019_v6, %v6014_v61  ;;  %v6049_v61 = vld [vmem:[%s11338_s25 + $0x520] sm:$0xff] }
 0x2c7   :  { %v2161_v6 = vld [vmem:[%s11338_s25 + $0x240] sm:$0xff] }
 0x2c9   :  { %7060 = vmatpush1.bf16.msra.mxu0 %v7059_v33  ;;  %v2122_v33 = vld [vmem:[%s11338_s25 + $0x108] sm:$0xff] }
 0x2ca   :  { %2431 = vmatprep.subr.mxu0 %v6053_v55  ;;  %v2127_v55 = vld [vmem:[%s11338_s25 + $0x130] sm:$0xff] }
 0x2cd   :  { %2432 = vmatpush1.msra.mxu0 %v6052_v42 }
 0x2ce   :  { %7118 = vmatprep.subr.bf16.mxu0 %v7117_v39 }
 0x37f   :  { %v9596_v59 = vpop.f32.mrb[36].mxu0 }
 0x380   :  { %v9598_v14 = vpop.f32.mrb[37].mxu0  ;;  %v2270_v16 = vrot.slane %v9596_v59, 1  ;;  %v2960_v8 = vrot.slane %v9596_v59, 2 }
 0x381   :  { %v2273_v4 = vrot.slane %v9598_v14, 1  ;;  %v2963_v36 = vrot.slane %v9598_v14, 2 }
 0x383   :  { %v9606_v38 = vpop.f32.mrb[38].mxu0 }
 0x384   :  { %v2271_v19 = vrot.slane %v9606_v38, 1  ;;  %v2961_v50 = vrot.slane %v9606_v38, 2  ;;  %v9621_v28 = vpop.f32.mrb[39].mxu0 }
 0x385   :  { %v2274_v51 = vrot.slane %v9621_v28, 1  ;;  %v2964_v26 = vrot.slane %v9621_v28, 2 }
 0x386   :  { %v9631_v7 = vsel %vm168_vm3, %v2270_v16, %v2271_v19  ;;  %v9640_v5 = vsel %vm716_vm2, %v2960_v8, %v2961_v50  ;;  %v7129_v8 = vpack.c.bf16 %v2127_v55, %v2122_v33  ;;  %v2146_v33 = vld [vmem:[%s11338_s25 + $0x1c8] sm:$0xff] }
 0x387   :  { %v9642_v22 = vpop.f32.mrb[40].mxu0  ;;  %v9645_v31 = vsel %vm168_vm3, %v2273_v4, %v2274_v51  ;;  %v9654_v15 = vsel %vm716_vm2, %v2963_v36, %v2964_v26 }
 0x388   :  { %v9656_v63 = vpop.f32.mrb[41].mxu0  ;;  %6055 = vmatprep.mubr.msk.f32.mxu1 %vm2293_vm8, %v9645_v31  ;;  %6060 = vmatprep.mubr.msk.f32.mxu0 %vm2293_vm8, %v9645_v31  ;;  %v2276_v53 = vrot.slane %v9642_v22, 1  ;;  %v2966_v57 = vrot.slane %v9642_v22, 2 }
 0x389   :  { %2369 = vmatmul.mubr.f32.vlgmr.msra.gmra.mrb[72].mxu1 %v9631_v7  ;;  %2464 = vmatmul.mubr.f32.vlgmr.msra.gmra.mrb[46].mxu0 %v9631_v7  ;;  %v2278_v2 = vrot.slane %v9656_v63, 1  ;;  %v2968_v3 = vrot.slane %v9656_v63, 2 }
 0x38a   :  { %7063 = vmatpush1.bf16.msra.mxu1 %v7062_v49  ;;  %7120 = vmatpush1.bf16.msra.mxu0 %v7119_v24  ;;  %v9675_v12 = vsel %vm168_vm3, %v2271_v19, %v2276_v53  ;;  %v9684_v32 = vsel %vm716_vm2, %v2961_v50, %v2966_v57  ;;  %v2121_v19 = vld [vmem:[%s11338_s25 + $0x100] sm:$0xff]  ;;  %v2126_v50 = vld [vmem:[%s11338_s25 + $0x128] sm:$0xff]  ;;  %v7071_v24 = vpack.c.bf16 %v6009_v45, %v6004_v43  ;;  %v6039_v45 = vld [vmem:[%s11338_s25 + $0x4d0] sm:$0xff] }
 0x38b   :  { %v9686_v40 = vpop.f32.mrb[42].mxu0  ;;  %v9689_v60 = vsel %vm168_vm3, %v2274_v51, %v2278_v2  ;;  %7064 = vmatprep.subr.bf16.mxu1 %v11305_v0  ;;  %7122 = vmatprep.subr.bf16.mxu0 %v7121_v29  ;;  %v9699_v27 = vsel %vm716_vm2, %v2964_v26, %v2968_v3  ;;  %v7131_v56 = vpack.c.bf16 %v2126_v50, %v2121_v19  ;;  %v2156_v19 = vld [vmem:[%s11338_s25 + $0x218] sm:$0xff]  ;;  %v2167_v50 = vld [vmem:[%s11338_s25 + $0x270] sm:$0xff] }
 0x38c   :  { %v9701_v20 = vpop.f32.mrb[43].mxu0  ;;  %6056 = vmatprep.mubr.msk.f32.mxu1 %vm2293_vm8, %v9689_v60  ;;  %6061 = vmatprep.mubr.msk.f32.mxu0 %vm2293_vm8, %v9689_v60  ;;  %v2280_v58 = vrot.slane %v9686_v40, 1  ;;  %v2970_v9 = vrot.slane %v9686_v40, 2 }
 0x38d   :  { %2375 = vmatmul.mubr.f32.gmra.mrb[74].mxu1 %v9675_v12  ;;  %2470 = vmatmul.mubr.f32.gmra.mrb[48].mxu0 %v9675_v12  ;;  %v2282_v48 = vrot.slane %v9701_v20, 1  ;;  %v2972_v42 = vrot.slane %v9701_v20, 2 }
 0x38e   :  { %7066 = vmatpush1.bf16.msra.mxu1 %v7065_v37  ;;  %7124 = vmatpush1.bf16.msra.mxu0 %v7123_v13  ;;  %v9720_v39 = vsel %vm168_vm3, %v2276_v53, %v2280_v58  ;;  %v9729_v44 = vsel %vm716_vm2, %v2966_v57, %v2970_v9  ;;  %v2131_v57 = vld [vmem:[%s11338_s25 + $0x150] sm:$0xff]  ;;  %v2142_v13 = vld [vmem:[%s11338_s25 + $0x1a8] sm:$0xff] }
 0x38f   :  { %v9731_v10 = vpop.f32.mrb[44].mxu0  ;;  %v9734_v16 = vsel %vm168_vm3, %v2278_v2, %v2282_v48  ;;  %7067 = vmatprep.subr.bf16.mxu1 %v11305_v0  ;;  %7126 = vmatprep.subr.bf16.mxu0 %v7125_v17  ;;  %v9744_v47 = vsel %vm716_vm2, %v2968_v3, %v2972_v42  ;;  %v2136_v2 = vld [vmem:[%s11338_s25 + $0x178] sm:$0xff]  ;;  %v7133_v3 = vpack.c.bf16 %v2137_v23, %v2132_v18 }
 0x390   :  { %v9747_v4 = vrot.slane %v9731_v10, 1  ;;  %v9750_v51 = vrot.slane %v9731_v10, 2  ;;  %v9752_v36 = vpop.f32.mrb[45].mxu0  ;;  %6057 = vmatprep.mubr.msk.f32.mxu1 %vm2293_vm8, %v9734_v16  ;;  %6062 = vmatprep.mubr.msk.f32.mxu0 %vm2293_vm8, %v9734_v16  ;;  %v7135_v17 = vpack.c.bf16 %v2136_v2, %v2131_v57  ;;  %v7137_v55 = vpack.c.bf16 %v2147_v30, %v2142_v13  ;;  %v6044_v23 = vld [vmem:[%s11338_s25 + $0x4f8] sm:$0xff]  ;;  %v2166_v57 = vld [vmem:[%s11338_s25 + $0x268] sm:$0xff] }
 0x391   :  { %v9759_v26 = vrot.slane %v9752_v36, 1  ;;  %v9762_v49 = vrot.slane %v9752_v36, 2  ;;  %2381 = vmatmul.mubr.f32.gmra.mrb[76].mxu1 %v9720_v39  ;;  %2476 = vmatmul.mubr.f32.gmra.mrb[50].mxu0 %v9720_v39  ;;  %v7083_v2 = vpack.c.bf16 %v6049_v61, %v6044_v23  ;;  %v2172_v13 = vld [vmem:[%s11338_s25 + $0x298] sm:$0xff]  ;;  %v2090_v30 = vld [vmem:[%s11338_s25 + $0x8] sm:$0xff]  ;;  %v2109_v23 = vld [vmem:[%s11338_s25 + $0xa0] sm:$0xff] }
 0x392   :  { %7069 = vmatpush1.bf16.msra.mxu1 %v7068_v62  ;;  %7128 = vmatpush1.bf16.msra.mxu0 %v7127_v52  ;;  %v9774_v29 = vsel %vm168_vm3, %v2280_v58, %v9747_v4  ;;  %v9781_v53 = vsel %vm716_vm2, %v2970_v9, %v9750_v51  ;;  %v2141_v58 = vld [vmem:[%s11338_s25 + $0x1a0] sm:$0xff]  ;;  %v2152_v9 = vld [vmem:[%s11338_s25 + $0x1f8] sm:$0xff]  ;;  %v7077_v62 = vpack.c.bf16 %v6029_v11, %v6024_v35  ;;  %v6034_v52 = vld [vmem:[%s11338_s25 + $0x4a8] sm:$0xff] }
 0x393   :  { %v9785_v54 = vsel %vm168_vm3, %v2282_v48, %v9759_v26  ;;  %7070 = vmatprep.subr.bf16.mxu1 %v11305_v0  ;;  %7130 = vmatprep.subr.bf16.mxu0 %v7129_v8  ;;  %v9799_v37 = vsel %vm716_vm2, %v2972_v42, %v9762_v49  ;;  %v2157_v48 = vld [vmem:[%s11338_s25 + $0x220] sm:$0xff]  ;;  %v7139_v42 = vpack.c.bf16 %v2146_v33, %v2141_v58  ;;  %v2151_v8 = vld [vmem:[%s11338_s25 + $0x1f0] sm:$0xff]  ;;  %v2094_v11 = vld [vmem:[%s11338_s25 + $0x28] sm:$0xff] }
 0x394   :  { %6058 = vmatprep.mubr.msk.f32.mxu1 %vm2293_vm8, %v9785_v54  ;;  %6063 = vmatprep.mubr.msk.f32.mxu0 %vm2293_vm8, %v9785_v54  ;;  %v7141_v43 = vpack.c.bf16 %v2157_v48, %v2152_v9  ;;  %v7143_v18 = vpack.c.bf16 %v2156_v19, %v2151_v8  ;;  %v2089_v35 = vld [vmem:[%s11338_s25] sm:$0xff]  ;;  %v2171_v58 = vld [vmem:[%s11338_s25 + $0x290] sm:$0xff]  ;;  %v2098_v9 = vld [vmem:[%s11338_s25 + $0x48] sm:$0xff] }
 0x395   :  { %2387 = vmatmul.mubr.f32.gmra.mrb[78].mxu1 %v9774_v29  ;;  %2482 = vmatmul.mubr.f32.gmra.mrb[52].mxu0 %v9774_v29  ;;  %v2100_v48 = vld [vmem:[%s11338_s25 + $0x58] sm:$0xff]  ;;  %v2103_v19 = vld [vmem:[%s11338_s25 + $0x70] sm:$0xff] }
 0x396   :  { %7072 = vmatpush1.bf16.msra.mxu1 %v7071_v24  ;;  %7132 = vmatpush1.bf16.msra.mxu0 %v7131_v56  ;;  %v7080_v24 = vpack.c.bf16 %v6039_v45, %v6034_v52  ;;  %v2104_v45 = vld [vmem:[%s11338_s25 + $0x78] sm:$0xff] }
 0x397   :  { %6059 = vmatprep.mubr.msk.f32.mxu1 %vm2293_vm8, %v9759_v26  ;;  %6064 = vmatprep.mubr.msk.f32.mxu0 %vm2293_vm8, %v9759_v26 }
 0x398   :  { %7073 = vmatprep.subr.bf16.mxu1 %v11305_v0  ;;  %7134 = vmatprep.subr.bf16.mxu0 %v7133_v3  ;;  %v7147_v3 = vpack.c.bf16 %v2166_v57, %v2161_v6  ;;  %v2118_v6 = vld [vmem:[%s11338_s25 + $0xe8] sm:$0xff]  ;;  %v2120_v57 = vld [vmem:[%s11338_s25 + $0xf8] sm:$0xff] }
 0x399   :  { %2393 = vmatmul.mubr.f32.gmra.mrb[80].mxu1 %v9747_v4  ;;  %2488 = vmatmul.mubr.f32.gmra.mrb[54].mxu0 %v9747_v4 }
 0x39a   :  { %7075 = vmatpush1.bf16.msra.mxu1 %v7074_v21  ;;  %7136 = vmatpush1.bf16.msra.mxu0 %v7135_v17  ;;  %v2095_v21 = vld [vmem:[%s11338_s25 + $0x30] sm:$0xff]  ;;  %v6054_v17 = vld [vmem:[%s11338_s25 + $0x548] sm:$0xff] }
 0x39b   :  { %6065 = vmatprep.mubr.msk.f32.mxu1 %vm2293_vm8, %v9645_v31  ;;  %6075 = vmatprep.mubr.msk.f32.mxu0 %vm2293_vm8, %v9598_v14  ;;  %v2162_v31 = vld [vmem:[%s11338_s25 + $0x248] sm:$0xff]  ;;  %v7085_v33 = vpack.c.bf16 %v2095_v21, %v2090_v30  ;;  %v2124_v30 = vld [vmem:[%s11338_s25 + $0x118] sm:$0xff] }
 0x39c   :  { %7076 = vmatprep.subr.bf16.mxu1 %v11305_v0  ;;  %7138 = vmatprep.subr.bf16.mxu0 %v7137_v55  ;;  %v7145_v56 = vpack.c.bf16 %v2167_v50, %v2162_v31  ;;  %v2093_v55 = vld [vmem:[%s11338_s25 + $0x20] sm:$0xff]  ;;  %v2108_v31 = vld [vmem:[%s11338_s25 + $0x98] sm:$0xff]  ;;  %v2110_v50 = vld [vmem:[%s11338_s25 + $0xa8] sm:$0xff] }
 0x39d   :  { %v7150_v52 = vpack.c.bf16 %v2098_v9, %v2093_v55  ;;  %v2134_v55 = vld [vmem:[%s11338_s25 + $0x168] sm:$0xff] }
 0x39e   :  { %7078 = vmatpush1.bf16.msra.mxu1 %v7077_v62  ;;  %7140 = vmatpush1.bf16.msra.mxu0 %v7139_v42  ;;  %v2105_v62 = vld [vmem:[%s11338_s25 + $0x80] sm:$0xff]  ;;  %v7087_v42 = vpack.c.bf16 %v2094_v11, %v2089_v35  ;;  %v2130_v35 = vld [vmem:[%s11338_s25 + $0x148] sm:$0xff] }
 0x39f   :  { %7079 = vmatprep.subr.bf16.mxu1 %v11305_v0  ;;  %7142 = vmatprep.subr.bf16.mxu0 %v7141_v43  ;;  %v2099_v43 = vld [vmem:[%s11338_s25 + $0x50] sm:$0xff]  ;;  %v7089_v8 = vpack.c.bf16 %v2105_v62, %v2100_v48  ;;  %v2138_v48 = vld [vmem:[%s11338_s25 + $0x188] sm:$0xff]  ;;  %v2140_v62 = vld [vmem:[%s11338_s25 + $0x198] sm:$0xff] }
 0x3a2   :  { %7081 = vmatpush1.bf16.msra.mxu1 %v7080_v24  ;;  %7144 = vmatpush1.bf16.msra.mxu0 %v7143_v18  ;;  %v7091_v24 = vpack.c.bf16 %v2104_v45, %v2099_v43  ;;  %v7153_v18 = vpack.c.bf16 %v2108_v31, %v2103_v19  ;;  %v2139_v43 = vld [vmem:[%s11338_s25 + $0x190] sm:$0xff]  ;;  %v2144_v45 = vld [vmem:[%s11338_s25 + $0x1b8] sm:$0xff]  ;;  %v2150_v31 = vld [vmem:[%s11338_s25 + $0x1e8] sm:$0xff] }
 0x3a3   :  { %7082 = vmatprep.subr.bf16.mxu1 %v11305_v0  ;;  %7146 = vmatprep.subr.bf16.mxu0 %v7145_v56  ;;  %v2114_v56 = vld [vmem:[%s11338_s25 + $0xc8] sm:$0xff]  ;;  %v2148_v19 = vld [vmem:[%s11338_s25 + $0x1d8] sm:$0xff] }
 0x3a6   :  { %7084 = vmatpush1.bf16.msra.mxu1 %v7083_v2  ;;  %7148 = vmatpush1.bf16.msra.mxu0 %v7147_v3  ;;  %v7095_v2 = vpack.c.bf16 %v2114_v56, %v2109_v23  ;;  %v2154_v23 = vld [vmem:[%s11338_s25 + $0x208] sm:$0xff]  ;;  %v2153_v56 = vld [vmem:[%s11338_s25 + $0x200] sm:$0xff] }
 0x3a7   :  { %2526 = vmatprep.subr.mxu1 %v11307_v1  ;;  %2721 = vmatprep.subr.mxu0 %v2172_v13  ;;  %v2119_v13 = vld [vmem:[%s11338_s25 + $0xf0] sm:$0xff] }
 0x3a8   :  { %v7099_v11 = vpack.c.bf16 %v2124_v30, %v2119_v13  ;;  %v2163_v13 = vld [vmem:[%s11338_s25 + $0x250] sm:$0xff]  ;;  %v2168_v30 = vld [vmem:[%s11338_s25 + $0x278] sm:$0xff] }
 0x3aa   :  { %2527 = vmatpush1.msra.mxu1 %v6054_v17  ;;  %2722 = vmatpush1.msra.mxu0 %v2171_v58  ;;  %v2128_v17 = vld [vmem:[%s11338_s25 + $0x138] sm:$0xff] }
 0x3ab   :  { %2559 = vmatmul.mubr.f32.vlgmr.msra.gmra.mrb[82].mxu1 %v9631_v7  ;;  %7086 = vmatprep.subr.bf16.mxu1 %v7085_v33  ;;  %v2115_v7 = vld [vmem:[%s11338_s25 + $0xd0] sm:$0xff]  ;;  %v2129_v33 = vld [vmem:[%s11338_s25 + $0x140] sm:$0xff] }
 0x3ac   :  { %2754 = vmatmul.mubr.f32.vlgmr.msra.gmra.mrb[46].mxu0 %v9596_v59  ;;  %7149 = vmatprep.subr.bf16.mxu0 %v11305_v0  ;;  %v7093_v61 = vpack.c.bf16 %v2115_v7, %v2110_v50  ;;  %v2155_v50 = vld [vmem:[%s11338_s25 + $0x210] sm:$0xff] }
 0x3ad   :  { %6066 = vmatprep.mubr.msk.f32.mxu1 %vm2293_vm8, %v9689_v60  ;;  %7088 = vmatpush1.bf16.msra.mxu1 %v7087_v42  ;;  %v2113_v60 = vld [vmem:[%s11338_s25 + $0xc0] sm:$0xff]  ;;  %v7103_v42 = vpack.c.bf16 %v2134_v55, %v2129_v33  ;;  %v6085_v55 = vld [vmem:[%s11338_s25 + $0x550] sm:$0xff] }
 0x3ae   :  { %6076 = vmatprep.mubr.msk.f32.mxu0 %vm2293_vm8, %v9621_v28  ;;  %7151 = vmatpush1.bf16.msra.mxu0 %v7150_v52  ;;  %v7156_v3 = vpack.c.bf16 %v2118_v6, %v2113_v60  ;;  %v2165_v60 = vld [vmem:[%s11338_s25 + $0x260] sm:$0xff] }
 0x3af   :  { %2564 = vmatmul.mubr.f32.gmra.mrb[84].mxu1 %v9675_v12  ;;  %7090 = vmatprep.subr.bf16.mxu1 %v7089_v8  ;;  %v2125_v12 = vld [vmem:[%s11338_s25 + $0x120] sm:$0xff]  ;;  %v2143_v8 = vld [vmem:[%s11338_s25 + $0x1b0] sm:$0xff] }
 0x3b0   :  { %2760 = vmatmul.mubr.f32.gmra.mrb[48].mxu0 %v9606_v38  ;;  %7152 = vmatprep.subr.bf16.mxu0 %v11305_v0  ;;  %v7097_v21 = vpack.c.bf16 %v2125_v12, %v2120_v57  ;;  %v7165_v7 = vpack.c.bf16 %v2148_v19, %v2143_v8  ;;  %v2169_v33 = vld [vmem:[%s11338_s25 + $0x280] sm:$0xff]  ;;  %v6098_v8 = vld [vmem:[%s11338_s25 + $0x5b8] sm:$0xff] }
 0x3b1   :  { %6067 = vmatprep.mubr.msk.f32.mxu1 %vm2293_vm8, %v9734_v16  ;;  %7092 = vmatpush1.bf16.msra.mxu1 %v7091_v24  ;;  %v2123_v16 = vld [vmem:[%s11338_s25 + $0x110] sm:$0xff]  ;;  %v7109_v24 = vpack.c.bf16 %v2155_v50, %v2150_v31  ;;  %v6095_v31 = vld [vmem:[%s11338_s25 + $0x5a0] sm:$0xff]  ;;  %v6100_v50 = vld [vmem:[%s11338_s25 + $0x5c8] sm:$0xff] }
 0x3b2   :  { %6077 = vmatprep.mubr.msk.f32.mxu0 %vm2293_vm8, %v9656_v63  ;;  %7154 = vmatpush1.bf16.msra.mxu0 %v7153_v18  ;;  %v7159_v58 = vpack.c.bf16 %v2128_v17, %v2123_v16  ;;  %v2149_v18 = vld [vmem:[%s11338_s25 + $0x1e0] sm:$0xff]  ;;  %v7171_v16 = vpack.c.bf16 %v2168_v30, %v2163_v13  ;;  %v2170_v17 = vld [vmem:[%s11338_s25 + $0x288] sm:$0xff] }
 0x3b3   :  { %2569 = vmatmul.mubr.f32.gmra.mrb[86].mxu1 %v9720_v39  ;;  %7094 = vmatprep.subr.bf16.mxu1 %v7093_v61  ;;  %v2135_v39 = vld [vmem:[%s11338_s25 + $0x170] sm:$0xff]  ;;  %v2160_v61 = vld [vmem:[%s11338_s25 + $0x238] sm:$0xff]  ;;  %v7111_v6 = vpack.c.bf16 %v2154_v23, %v2149_v18  ;;  %v6116_v13 = vld [vmem:[%s11338_s25 + $0x648] sm:$0xff] }
 0x3b4   :  { %2766 = vmatmul.mubr.f32.gmra.mrb[50].mxu0 %v9642_v22  ;;  %7155 = vmatprep.subr.bf16.mxu0 %v11305_v0  ;;  %v7101_v9 = vpack.c.bf16 %v2135_v39, %v2130_v35  ;;  %v7113_v12 = vpack.c.bf16 %v2165_v60, %v2160_v61  ;;  %v6086_v35 = vld [vmem:[%s11338_s25 + $0x558] sm:$0xff]  ;;  %v6091_v39 = vld [vmem:[%s11338_s25 + $0x580] sm:$0xff]  ;;  %v6113_v61 = vld [vmem:[%s11338_s25 + $0x630] sm:$0xff] }
 0x3b5   :  { %6068 = vmatprep.mubr.msk.f32.mxu1 %vm2293_vm8, %v9785_v54  ;;  %7096 = vmatpush1.bf16.msra.mxu1 %v7095_v2  ;;  %v2133_v54 = vld [vmem:[%s11338_s25 + $0x160] sm:$0xff]  ;;  %v2159_v2 = vld [vmem:[%s11338_s25 + $0x230] sm:$0xff]  ;;  %v6106_v23 = vld [vmem:[%s11338_s25 + $0x5f8] sm:$0xff] }
 0x3b6   :  { %6078 = vmatprep.mubr.msk.f32.mxu0 %vm2293_vm8, %v9701_v20  ;;  %7157 = vmatpush1.bf16.msra.mxu0 %v7156_v3  ;;  %v7162_v52 = vpack.c.bf16 %v2138_v48, %v2133_v54  ;;  %v2164_v3 = vld [vmem:[%s11338_s25 + $0x258] sm:$0xff]  ;;  %v2173_v54 = vld [vmem:[%s11338_s25 + $0x2a0] sm:$0xff]  ;;  %v7173_v48 = vpack.c.bf16 %v6091_v39, %v6086_v35 }
 0x3b7   :  { %2574 = vmatmul.mubr.f32.gmra.mrb[88].mxu1 %v9774_v29  ;;  %7098 = vmatprep.subr.bf16.mxu1 %v7097_v21  ;;  %v2145_v29 = vld [vmem:[%s11338_s25 + $0x1c0] sm:$0xff]  ;;  %v7115_v21 = vpack.c.bf16 %v2164_v3, %v2159_v2  ;;  %v6112_v2 = vld [vmem:[%s11338_s25 + $0x628] sm:$0xff] }
 0x3b8   :  { %2772 = vmatmul.mubr.f32.gmra.mrb[52].mxu0 %v9686_v40  ;;  %7158 = vmatprep.subr.bf16.mxu0 %v11305_v0  ;;  %v6115_v35 = vld [vmem:[%s11338_s25 + $0x640] sm:$0xff] }
 0x3b9   :  { %6069 = vmatprep.mubr.msk.f32.mxu1 %vm2293_vm8, %v9759_v26  ;;  %7100 = vmatpush1.bf16.msra.mxu1 %v7099_v11  ;;  %v7105_v26 = vpack.c.bf16 %v2145_v29, %v2140_v62  ;;  %v6088_v11 = vld [vmem:[%s11338_s25 + $0x568] sm:$0xff]  ;;  %v6087_v62 = vld [vmem:[%s11338_s25 + $0x560] sm:$0xff] }
 0x3ba   :  { %6079 = vmatprep.mubr.msk.f32.mxu0 %vm2293_vm8, %v9752_v36  ;;  %7160 = vmatpush1.bf16.msra.mxu0 %v7159_v58  ;;  %v6093_v58 = vld [vmem:[%s11338_s25 + $0x590] sm:$0xff]  ;;  %v6092_v29 = vld [vmem:[%s11338_s25 + $0x588] sm:$0xff] }
 0x3bb   :  { %2579 = vmatmul.mubr.f32.gmra.mrb[90].mxu1 %v9747_v4  ;;  %7102 = vmatprep.subr.bf16.mxu1 %v7101_v9  ;;  %v7107_v4 = vpack.c.bf16 %v2144_v45, %v2139_v43  ;;  %v6090_v9 = vld [vmem:[%s11338_s25 + $0x578] sm:$0xff]  ;;  %v6101_v43 = vld [vmem:[%s11338_s25 + $0x5d0] sm:$0xff]  ;;  %v7207_v19 = vpack.c.bf16 %v6092_v29, %v6087_v62 }
 0x3bc   :  { %2778 = vmatmul.mubr.f32.gmra.mrb[54].mxu0 %v9731_v10  ;;  %7161 = vmatprep.subr.bf16.mxu0 %v11305_v0  ;;  %v7175_v45 = vpack.c.bf16 %v6090_v9, %v6085_v55  ;;  %v6126_v55 = vld [vmem:[%s11338_s25 + $0x698] sm:$0xff]  ;;  %v6125_v29 = vld [vmem:[%s11338_s25 + $0x690] sm:$0xff] }
 0x3bd   :  { %7104 = vmatpush1.bf16.msra.mxu1 %v7103_v42  ;;  %6070 = vmatprep.mubr.msk.f32.mxu1 %vm2293_vm8, %v9598_v14  ;;  %v7205_v42 = vpack.c.bf16 %v6093_v58, %v6088_v11  ;;  %v6117_v11 = vld [vmem:[%s11338_s25 + $0x650] sm:$0xff]  ;;  %v6122_v58 = vld [vmem:[%s11338_s25 + $0x678] sm:$0xff] }
 0x3be   :  { %7163 = vmatpush1.bf16.msra.mxu0 %v7162_v52  ;;  %6080 = vmatprep.mubr.msk.f32.mxu0 %vm2293_vm8, %v9598_v14  ;;  %v2158_v14 = vld [vmem:[%s11338_s25 + $0x228] sm:$0xff]  ;;  %v7219_v62 = vpack.c.bf16 %v6122_v58, %v6117_v11  ;;  %v6157_v58 = vld [vmem:[%s11338_s25 + $0x790] sm:$0xff] }
 0x3bf   :  { %7106 = vmatprep.subr.bf16.mxu1 %v7105_v26  ;;  %7164 = vmatprep.subr.bf16.mxu0 %v11305_v0  ;;  %v7168_v57 = vpack.c.bf16 %v2158_v14, %v2153_v56  ;;  %v6096_v52 = vld [vmem:[%s11338_s25 + $0x5a8] sm:$0xff]  ;;  %v6103_v26 = vld [vmem:[%s11338_s25 + $0x5e0] sm:$0xff]  ;;  %v7179_v56 = vpack.c.bf16 %v6100_v50, %v6095_v31 }
 0x3c0   :  { %v7209_v18 = vpack.c.bf16 %v6103_v26, %v6098_v8  ;;  %v6108_v14 = vld [vmem:[%s11338_s25 + $0x608] sm:$0xff]  ;;  %v6141_v8 = vld [vmem:[%s11338_s25 + $0x710] sm:$0xff] }
 0x3c1   :  { %7108 = vmatpush1.bf16.msra.mxu1 %v7107_v4  ;;  %v7177_v4 = vpack.c.bf16 %v6101_v43, %v6096_v52  ;;  %v7213_v3 = vpack.c.bf16 %v6113_v61, %v6108_v14  ;;  %v6132_v43 = vld [vmem:[%s11338_s25 + $0x6c8] sm:$0xff]  ;;  %v6153_v14 = vld [vmem:[%s11338_s25 + $0x770] sm:$0xff] }
 0x3c2   :  { %7166 = vmatpush1.bf16.msra.mxu0 %v7165_v7  ;;  %7110 = vmatprep.subr.bf16.mxu1 %v7109_v24  ;;  %v6097_v7 = vld [vmem:[%s11338_s25 + $0x5b0] sm:$0xff]  ;;  %v6102_v24 = vld [vmem:[%s11338_s25 + $0x5d8] sm:$0xff] }
 0x3c3   :  { %7167 = vmatprep.subr.bf16.mxu0 %v11305_v0  ;;  %v7211_v60 = vpack.c.bf16 %v6102_v24, %v6097_v7  ;;  %v6135_v7 = vld [vmem:[%s11338_s25 + $0x6e0] sm:$0xff]  ;;  %v6140_v24 = vld [vmem:[%s11338_s25 + $0x708] sm:$0xff] }
 0x3c4   :  { %v7195_v61 = vpack.c.bf16 %v6140_v24, %v6135_v7  ;;  %v6134_v7 = vld [vmem:[%s11338_s25 + $0x6d8] sm:$0xff] }
 0x3c5   :  { %7112 = vmatpush1.bf16.msra.mxu1 %v7111_v6  ;;  %v6105_v6 = vld [vmem:[%s11338_s25 + $0x5f0] sm:$0xff] }
 0x3c6   :  { %7169 = vmatpush1.bf16.msra.mxu0 %v7168_v57  ;;  %7114 = vmatprep.subr.bf16.mxu1 %v7113_v12  ;;  %v6107_v12 = vld [vmem:[%s11338_s25 + $0x600] sm:$0xff] }
 0x3c7   :  { %7170 = vmatprep.subr.bf16.mxu0 %v11305_v0 }
 0x3c9   :  { %7116 = vmatpush1.bf16.msra.mxu1 %v7115_v21  ;;  %v6118_v21 = vld [vmem:[%s11338_s25 + $0x658] sm:$0xff] }
 0x3ca   :  { %7172 = vmatpush1.bf16.msra.mxu0 %v7171_v16  ;;  %2626 = vmatprep.subr.mxu1 %v2170_v17  ;;  %v6123_v16 = vld [vmem:[%s11338_s25 + $0x680] sm:$0xff]  ;;  %v7215_v17 = vpack.c.bf16 %v6112_v2, %v6107_v12 }
 0x3cb   :  { %2816 = vmatprep.subr.mxu0 %v11307_v1  ;;  %v6147_v12 = vld [vmem:[%s11338_s25 + $0x740] sm:$0xff] }
 0x3cd   :  { %2627 = vmatpush1.msra.mxu1 %v2169_v33  ;;  %v7217_v33 = vpack.c.bf16 %v6123_v16, %v6118_v21  ;;  %v6163_v21 = vld [vmem:[%s11338_s25 + $0x7c0] sm:$0xff] }
 0x3ce   :  { %2817 = vmatpush1.msra.mxu0 %v2173_v54  ;;  %2659 = vmatmul.mubr.f32.vlgmr.msra.gmra.mrb[72].mxu1 %v9596_v59  ;;  %v6128_v54 = vld [vmem:[%s11338_s25 + $0x6a8] sm:$0xff] }
 0x3cf   :  { %2849 = vmatmul.mubr.f32.vlgmr.msra.gmra.mrb[56].mxu0 %v9596_v59  ;;  %7174 = vmatprep.subr.bf16.mxu1 %v7173_v48  ;;  %v6111_v59 = vld [vmem:[%s11338_s25 + $0x620] sm:$0xff]  ;;  %v6133_v48 = vld [vmem:[%s11338_s25 + $0x6d0] sm:$0xff] }
 0x3d0   :  { %7206 = vmatprep.subr.bf16.mxu0 %v7205_v42  ;;  %6071 = vmatprep.mubr.msk.f32.mxu1 %vm2293_vm8, %v9621_v28  ;;  %v7181_v57 = vpack.c.bf16 %v6111_v59, %v6106_v23  ;;  %v6127_v42 = vld [vmem:[%s11338_s25 + $0x6a0] sm:$0xff]  ;;  %v7221_v26 = vpack.c.bf16 %v6133_v48, %v6128_v54  ;;  %v6142_v23 = vld [vmem:[%s11338_s25 + $0x718] sm:$0xff]  ;;  %v6168_v54 = vld [vmem:[%s11338_s25 + $0x7e8] sm:$0xff] }
 0x3d1   :  { %6081 = vmatprep.mubr.msk.f32.mxu0 %vm2293_vm8, %v9621_v28  ;;  %7176 = vmatpush1.bf16.msra.mxu1 %v7175_v45  ;;  %v6110_v28 = vld [vmem:[%s11338_s25 + $0x618] sm:$0xff]  ;;  %v6136_v45 = vld [vmem:[%s11338_s25 + $0x6e8] sm:$0xff]  ;;  %v7223_v50 = vpack.c.bf16 %v6132_v43, %v6127_v42  ;;  %v6165_v48 = vld [vmem:[%s11338_s25 + $0x7d0] sm:$0xff] }
 0x3d2   :  { %7208 = vmatpush1.bf16.msra.mxu0 %v7207_v19  ;;  %2665 = vmatmul.mubr.f32.gmra.mrb[74].mxu1 %v9606_v38  ;;  %v7183_v30 = vpack.c.bf16 %v6110_v28, %v6105_v6  ;;  %v6143_v19 = vld [vmem:[%s11338_s25 + $0x720] sm:$0xff]  ;;  %v6146_v59 = vld [vmem:[%s11338_s25 + $0x738] sm:$0xff]  ;;  %v6145_v28 = vld [vmem:[%s11338_s25 + $0x730] sm:$0xff] }
 0x3d3   :  { %2854 = vmatmul.mubr.f32.gmra.mrb[58].mxu0 %v9606_v38  ;;  %7178 = vmatprep.subr.bf16.mxu1 %v7177_v4  ;;  %v6121_v38 = vld [vmem:[%s11338_s25 + $0x670] sm:$0xff]  ;;  %v7193_v4 = vpack.c.bf16 %v6141_v8, %v6136_v45  ;;  %v6104_v43 = vld [vmem:[%s11338_s25 + $0x5e8] sm:$0xff] }
 0x3d4   :  { %7210 = vmatprep.subr.bf16.mxu0 %v7209_v18  ;;  %6072 = vmatprep.mubr.msk.f32.mxu1 %vm2293_vm8, %v9656_v63  ;;  %v7185_v39 = vpack.c.bf16 %v6121_v38, %v6116_v13  ;;  %v6137_v18 = vld [vmem:[%s11338_s25 + $0x6f0] sm:$0xff]  ;;  %v6156_v13 = vld [vmem:[%s11338_s25 + $0x788] sm:$0xff] }
 0x3d5   :  { %6082 = vmatprep.mubr.msk.f32.mxu0 %vm2293_vm8, %v9656_v63  ;;  %7180 = vmatpush1.bf16.msra.mxu1 %v7179_v56  ;;  %v6120_v63 = vld [vmem:[%s11338_s25 + $0x668] sm:$0xff]  ;;  %v6151_v56 = vld [vmem:[%s11338_s25 + $0x760] sm:$0xff]  ;;  %v6161_v38 = vld [vmem:[%s11338_s25 + $0x7b0] sm:$0xff] }
 0x3d6   :  { %7212 = vmatpush1.bf16.msra.mxu0 %v7211_v60  ;;  %2671 = vmatmul.mubr.f32.gmra.mrb[76].mxu1 %v9642_v22  ;;  %v7187_v9 = vpack.c.bf16 %v6120_v63, %v6115_v35  ;;  %v7227_v60 = vpack.c.bf16 %v6142_v23, %v6137_v18  ;;  %v7197_v6 = vpack.c.bf16 %v6151_v56, %v6146_v59  ;;  %v6155_v63 = vld [vmem:[%s11338_s25 + $0x780] sm:$0xff]  ;;  %v6109_v8 = vld [vmem:[%s11338_s25 + $0x610] sm:$0xff]  ;;  %v6154_v56 = vld [vmem:[%s11338_s25 + $0x778] sm:$0xff] }
 0x3d7   :  { %2859 = vmatmul.mubr.f32.gmra.mrb[60].mxu0 %v9642_v22  ;;  %7182 = vmatprep.subr.bf16.mxu1 %v7181_v57  ;;  %v6131_v22 = vld [vmem:[%s11338_s25 + $0x6c0] sm:$0xff]  ;;  %v6150_v57 = vld [vmem:[%s11338_s25 + $0x758] sm:$0xff]  ;;  %v7201_v35 = vpack.c.bf16 %v6161_v38, %v6156_v13  ;;  %v6149_v59 = vld [vmem:[%s11338_s25 + $0x750] sm:$0xff] }
 0x3d8   :  { %7214 = vmatprep.subr.bf16.mxu0 %v7213_v3  ;;  %6073 = vmatprep.mubr.msk.f32.mxu1 %vm2293_vm8, %v9701_v20  ;;  %v7189_v52 = vpack.c.bf16 %v6131_v22, %v6126_v55  ;;  %v6152_v3 = vld [vmem:[%s11338_s25 + $0x768] sm:$0xff]  ;;  %v7199_v16 = vpack.c.bf16 %v6150_v57, %v6145_v28  ;;  %v6139_v18 = vld [vmem:[%s11338_s25 + $0x700] sm:$0xff]  ;;  %v6169_v57 = vld [vmem:[%s11338_s25 + $0x7f0] sm:$0xff] }
 0x3d9   :  { %6083 = vmatprep.mubr.msk.f32.mxu0 %vm2293_vm8, %v9701_v20  ;;  %7184 = vmatpush1.bf16.msra.mxu1 %v7183_v30  ;;  %v6130_v20 = vld [vmem:[%s11338_s25 + $0x6b8] sm:$0xff]  ;;  %v4037_v28 = vld [vmem:[#allocation5 + $0x8] sm:$0xff]  ;;  %v3601_v13 = vld [vmem:[#allocation2 + $0x10] sm:$0xff] }
 0x3da   :  { %7216 = vmatpush1.bf16.msra.mxu0 %v7215_v17  ;;  %2677 = vmatmul.mubr.f32.gmra.mrb[78].mxu1 %v9686_v40  ;;  %v7191_v31 = vpack.c.bf16 %v6130_v20, %v6125_v29  ;;  %v6158_v30 = vld [vmem:[%s11338_s25 + $0x798] sm:$0xff]  ;;  %v7231_v17 = vpack.c.bf16 %v6152_v3, %v6147_v12  ;;  %v6167_v20 = vld [vmem:[%s11338_s25 + $0x7e0] sm:$0xff] }
 0x3db   :  { %2864 = vmatmul.mubr.f32.gmra.mrb[62].mxu0 %v9686_v40  ;;  %7186 = vmatprep.subr.bf16.mxu1 %v7185_v39  ;;  %v6138_v40 = vld [vmem:[%s11338_s25 + $0x6f8] sm:$0xff]  ;;  %v6160_v39 = vld [vmem:[%s11338_s25 + $0x7a8] sm:$0xff]  ;;  %v7233_v11 = vpack.c.bf16 %v6163_v21, %v6158_v30  ;;  %v3599_v3 = vld [vmem:[#allocation2] sm:$0xff] }
 0x3dc   :  { %7218 = vmatprep.subr.bf16.mxu0 %v7217_v33  ;;  %6074 = vmatprep.mubr.msk.f32.mxu1 %vm2293_vm8, %v9752_v36  ;;  %v6162_v33 = vld [vmem:[%s11338_s25 + $0x7b8] sm:$0xff]  ;;  %v7203_v55 = vpack.c.bf16 %v6160_v39, %v6155_v63  ;;  %v7263_v38 = vpack.c.bf16 %v3601_v13, %v3599_v3  ;;  %v4036_v30 = vld [vmem:[#allocation5] sm:$0xff]  ;;  %v4038_v21 = vld [vmem:[#allocation5 + $0x10] sm:$0xff] }
 0x3dd   :  { %6084 = vmatprep.mubr.msk.f32.mxu0 %vm2293_vm8, %v9752_v36  ;;  %7188 = vmatpush1.bf16.msra.mxu1 %v7187_v9  ;;  %v7225_v36 = vpack.c.bf16 %v6143_v19, %v6138_v40  ;;  %v7235_v22 = vpack.c.bf16 %v6162_v33, %v6157_v58  ;;  %v6166_v9 = vld [vmem:[%s11338_s25 + $0x7d8] sm:$0xff]  ;;  %v6119_v19 = vld [vmem:[%s11338_s25 + $0x660] sm:$0xff]  ;;  %v4041_v63 = vld [vmem:[#allocation5 + $0x28] sm:$0xff] }
 0x3de   :  { %7220 = vmatpush1.bf16.msra.mxu0 %v7219_v62  ;;  %2683 = vmatmul.mubr.f32.gmra.mrb[80].mxu1 %v9731_v10  ;;  %v6089_v62 = vld [vmem:[%s11338_s25 + $0x570] sm:$0xff]  ;;  %v6094_v29 = vld [vmem:[%s11338_s25 + $0x598] sm:$0xff]  ;;  %v3603_v33 = vld [vmem:[#allocation2 + $0x20] sm:$0xff] }
 0x3df   :  { %2869 = vmatmul.mubr.f32.gmra.mrb[64].mxu0 %v9731_v10  ;;  %7190 = vmatprep.subr.bf16.mxu1 %v7189_v52  ;;  %v6148_v10 = vld [vmem:[%s11338_s25 + $0x748] sm:$0xff]  ;;  %v7238_v42 = vpack.c.bf16 %v6094_v29, %v6089_v62  ;;  %v6099_v52 = vld [vmem:[%s11338_s25 + $0x5c0] sm:$0xff]  ;;  %v4043_v39 = vld [vmem:[#allocation5 + $0x38] sm:$0xff] }
 0x3e0   :  { %7222 = vmatprep.subr.bf16.mxu0 %v7221_v26  ;;  %6170 = vmatprep.mubr.msk.f32.mxu1 %vm2293_vm8, %v9654_v15  ;;  %v7229_v2 = vpack.c.bf16 %v6153_v14, %v6148_v10  ;;  %v7241_v45 = vpack.c.bf16 %v6104_v43, %v6099_v52  ;;  %v6114_v26 = vld [vmem:[%s11338_s25 + $0x638] sm:$0xff]  ;;  %v7256_v10 = vpack.c.bf16 %v6154_v56, %v6149_v59  ;;  %v6164_v14 = vld [vmem:[%s11338_s25 + $0x7c8] sm:$0xff]  ;;  %v3607_v43 = vld [vmem:[#allocation2 + $0x40] sm:$0xff] }
 0x3e1   :  { %7192 = vmatpush1.bf16.msra.mxu1 %v7191_v31  ;;  %6175 = vmatprep.mubr.msk.f32.mxu0 %vm2293_vm8, %v9654_v15  ;;  %v7244_v40 = vpack.c.bf16 %v6114_v26, %v6109_v8  ;;  %v6124_v31 = vld [vmem:[%s11338_s25 + $0x688] sm:$0xff]  ;;  %v3610_v29 = vld [vmem:[#allocation2 + $0x58] sm:$0xff] }
 0x3e2   :  { %7224 = vmatpush1.bf16.msra.mxu0 %v7223_v50  ;;  %7194 = vmatprep.subr.bf16.mxu1 %v7193_v4  ;;  %v7247_v50 = vpack.c.bf16 %v6124_v31, %v6119_v19  ;;  %v6129_v4 = vld [vmem:[%s11338_s25 + $0x6b0] sm:$0xff]  ;;  %v3608_v62 = vld [vmem:[#allocation2 + $0x48] sm:$0xff]  ;;  %v4047_v52 = vld [vmem:[#allocation5 + $0x58] sm:$0xff] }
 0x3e3   :  { %7226 = vmatprep.subr.bf16.mxu0 %v7225_v36  ;;  %v7250_v24 = vpack.c.bf16 %v6134_v7, %v6129_v4  ;;  %v6144_v36 = vld [vmem:[%s11338_s25 + $0x728] sm:$0xff]  ;;  %v4044_v19 = vld [vmem:[#allocation5 + $0x40] sm:$0xff]  ;;  %v4046_v31 = vld [vmem:[#allocation5 + $0x50] sm:$0xff] }
 0x3e4   :  { %v7253_v23 = vpack.c.bf16 %v6144_v36, %v6139_v18  ;;  %v3611_v7 = vld [vmem:[#allocation2 + $0x60] sm:$0xff]  ;;  %v3618_v59 = vld [vmem:[#allocation2 + $0x98] sm:$0xff] }
 0x3e5   :  { %7196 = vmatpush1.bf16.msra.mxu1 %v7195_v61  ;;  %v4059_v13 = vld [vmem:[#allocation5 + $0xb8] sm:$0xff] }
 0x3e6   :  { %7228 = vmatpush1.bf16.msra.mxu0 %v7227_v60  ;;  %7198 = vmatprep.subr.bf16.mxu1 %v7197_v6  ;;  %v3600_v60 = vld [vmem:[#allocation2 + $0x8] sm:$0xff]  ;;  %v3602_v6 = vld [vmem:[#allocation2 + $0x18] sm:$0xff] }
 0x3e7   :  { %7230 = vmatprep.subr.bf16.mxu0 %v7229_v2  ;;  %v7261_v12 = vpack.c.bf16 %v3602_v6, %v3600_v60  ;;  %v4039_v2 = vld [vmem:[#allocation5 + $0x18] sm:$0xff]  ;;  %v4052_v6 = vld [vmem:[#allocation5 + $0x80] sm:$0xff] }
 0x3e9   :  { %7200 = vmatpush1.bf16.msra.mxu1 %v7199_v16  ;;  %v3604_v16 = vld [vmem:[#allocation2 + $0x28] sm:$0xff] }
 0x3ea   :  { %7232 = vmatpush1.bf16.msra.mxu0 %v7231_v17  ;;  %7202 = vmatprep.subr.bf16.mxu1 %v7201_v35  ;;  %v7397_v17 = vpack.c.bf16 %v4039_v2, %v4037_v28  ;;  %v3606_v35 = vld [vmem:[#allocation2 + $0x38] sm:$0xff]  ;;  %v4054_v28 = vld [vmem:[#allocation5 + $0x90] sm:$0xff]  ;;  %v4057_v2 = vld [vmem:[#allocation5 + $0xa8] sm:$0xff] }
 0x3eb   :  { %7234 = vmatprep.subr.bf16.mxu0 %v7233_v11  ;;  %v7399_v11 = vpack.c.bf16 %v4038_v21, %v4036_v30  ;;  %v7265_v58 = vpack.c.bf16 %v3606_v35, %v3604_v16  ;;  %v3621_v30 = vld [vmem:[#allocation2 + $0xb0] sm:$0xff]  ;;  %v7417_v21 = vpack.c.bf16 %v4059_v13, %v4057_v2  ;;  %v3642_v2 = vld [vmem:[#allocation2 + $0x158] sm:$0xff] }
 0x3ec   :  { %v4058_v35 = vld [vmem:[#allocation5 + $0xb0] sm:$0xff] }
 0x3ed   :  { %7204 = vmatpush1.bf16.msra.mxu1 %v7203_v55  ;;  %v3605_v55 = vld [vmem:[#allocation2 + $0x30] sm:$0xff] }
 0x3ee   :  { %7236 = vmatpush1.bf16.msra.mxu0 %v7235_v22  ;;  %3025 = vmatprep.subr.mxu1 %v6166_v9  ;;  %v4040_v22 = vld [vmem:[#allocation5 + $0x20] sm:$0xff]  ;;  %v7401_v9 = vpack.c.bf16 %v4043_v39, %v4041_v63  ;;  %v3624_v39 = vld [vmem:[#allocation2 + $0xc8] sm:$0xff] }
 0x3ef   :  { %3120 = vmatprep.subr.mxu0 %v6168_v54  ;;  %v7267_v54 = vpack.c.bf16 %v3605_v55, %v3603_v33  ;;  %v4063_v55 = vld [vmem:[#allocation5 + $0xd8] sm:$0xff] }
 0x3f1   :  { %3026 = vmatpush1.msra.mxu1 %v6165_v48  ;;  %v4042_v48 = vld [vmem:[#allocation5 + $0x30] sm:$0xff] }
 0x3f2   :  { %3121 = vmatpush1.msra.mxu0 %v6167_v20  ;;  %3058 = vmatmul.mubr.f32.vlgmr.msra.gmra.mrb[72].mxu1 %v9640_v5  ;;  %v7269_v20 = vpack.c.bf16 %v3610_v29, %v3608_v62  ;;  %v7403_v8 = vpack.c.bf16 %v4042_v48, %v4040_v22  ;;  %v3623_v22 = vld [vmem:[#allocation2 + $0xc0] sm:$0xff]  ;;  %v4062_v29 = vld [vmem:[#allocation5 + $0xd0] sm:$0xff] }
 0x3f3   :  { %3153 = vmatmul.mubr.f32.vlgmr.msra.gmra.mrb[46].mxu0 %v9640_v5  ;;  %7237 = vmatprep.subr.bf16.mxu1 %v11305_v0  ;;  %v4060_v62 = vld [vmem:[#allocation5 + $0xc0] sm:$0xff] }
 0x3f4   :  { %6171 = vmatprep.mubr.msk.f32.mxu1 %vm2293_vm8, %v9699_v27  ;;  %6176 = vmatprep.mubr.msk.f32.mxu0 %vm2293_vm8, %v9699_v27 }
 0x3f5   :  { %7239 = vmatpush1.bf16.msra.mxu1 %v7238_v42  ;;  %7262 = vmatprep.subr.bf16.mxu0 %v7261_v12  ;;  %v4045_v42 = vld [vmem:[#allocation5 + $0x48] sm:$0xff]  ;;  %v3622_v12 = vld [vmem:[#allocation2 + $0xb8] sm:$0xff] }
 0x3f6   :  { %3064 = vmatmul.mubr.f32.gmra.mrb[74].mxu1 %v9684_v32  ;;  %7240 = vmatprep.subr.bf16.mxu1 %v11305_v0  ;;  %v7405_v26 = vpack.c.bf16 %v4047_v52, %v4045_v42  ;;  %v3628_v42 = vld [vmem:[#allocation2 + $0xe8] sm:$0xff]  ;;  %v3630_v52 = vld [vmem:[#allocation2 + $0xf8] sm:$0xff] }
 0x3f7   :  { %3159 = vmatmul.mubr.f32.gmra.mrb[48].mxu0 %v9684_v32  ;;  %6172 = vmatprep.mubr.msk.f32.mxu1 %vm2293_vm8, %v9744_v47 }
 0x3f8   :  { %6177 = vmatprep.mubr.msk.f32.mxu0 %vm2293_vm8, %v9744_v47  ;;  %7264 = vmatpush1.bf16.msra.mxu0 %v7263_v38  ;;  %v3619_v38 = vld [vmem:[#allocation2 + $0xa0] sm:$0xff] }
 0x3f9   :  { %7242 = vmatpush1.bf16.msra.mxu1 %v7241_v45  ;;  %7266 = vmatprep.subr.bf16.mxu0 %v7265_v58  ;;  %v3609_v45 = vld [vmem:[#allocation2 + $0x50] sm:$0xff]  ;;  %v7283_v16 = vpack.c.bf16 %v3621_v30, %v3619_v38  ;;  %v4061_v58 = vld [vmem:[#allocation5 + $0xc8] sm:$0xff]  ;;  %v4079_v30 = vld [vmem:[#allocation5 + $0x158] sm:$0xff] }
 0x3fa   :  { %3070 = vmatmul.mubr.f32.gmra.mrb[76].mxu1 %v9729_v44  ;;  %7243 = vmatprep.subr.bf16.mxu1 %v11305_v0 }
 0x3fb   :  { %3165 = vmatmul.mubr.f32.gmra.mrb[50].mxu0 %v9729_v44  ;;  %6173 = vmatprep.mubr.msk.f32.mxu1 %vm2293_vm8, %v9799_v37 }
 0x3fc   :  { %6178 = vmatprep.mubr.msk.f32.mxu0 %vm2293_vm8, %v9799_v37  ;;  %7268 = vmatpush1.bf16.msra.mxu0 %v7267_v54  ;;  %v7421_v54 = vpack.c.bf16 %v4063_v55, %v4061_v58  ;;  %v4081_v58 = vld [vmem:[#allocation5 + $0x168] sm:$0xff] }
 0x3fd   :  { %7245 = vmatpush1.bf16.msra.mxu1 %v7244_v40  ;;  %v7271_v40 = vpack.c.bf16 %v3609_v45, %v3607_v43  ;;  %7270 = vmatprep.subr.bf16.mxu0 %v7269_v20  ;;  %v7423_v20 = vpack.c.bf16 %v4062_v29, %v4060_v62  ;;  %v4065_v43 = vld [vmem:[#allocation5 + $0xe8] sm:$0xff]  ;;  %v7289_v45 = vpack.c.bf16 %v3630_v52, %v3628_v42  ;;  %v3645_v62 = vld [vmem:[#allocation2 + $0x170] sm:$0xff]  ;;  %v4080_v29 = vld [vmem:[#allocation5 + $0x160] sm:$0xff] }
 0x3fe   :  { %3076 = vmatmul.mubr.f32.gmra.mrb[78].mxu1 %v9781_v53  ;;  %7246 = vmatprep.subr.bf16.mxu1 %v11305_v0  ;;  %v4082_v42 = vld [vmem:[#allocation5 + $0x170] sm:$0xff]  ;;  %v3648_v52 = vld [vmem:[#allocation2 + $0x188] sm:$0xff] }
 0x3ff   :  { %3171 = vmatmul.mubr.f32.gmra.mrb[52].mxu0 %v9781_v53  ;;  %6174 = vmatprep.mubr.msk.f32.mxu1 %vm2293_vm8, %v9762_v49 }
 0x400   :  { %6179 = vmatprep.mubr.msk.f32.mxu0 %vm2293_vm8, %v9762_v49  ;;  %7272 = vmatpush1.bf16.msra.mxu0 %v7271_v40  ;;  %v3629_v40 = vld [vmem:[#allocation2 + $0xf0] sm:$0xff] }
 0x401   :  { %7248 = vmatpush1.bf16.msra.mxu1 %v7247_v50  ;;  %v4049_v50 = vld [vmem:[#allocation5 + $0x68] sm:$0xff] }
 0x402   :  { %3082 = vmatmul.mubr.f32.gmra.mrb[80].mxu1 %v9750_v51  ;;  %7249 = vmatprep.subr.bf16.mxu1 %v11305_v0 }
 0x403   :  { %3177 = vmatmul.mubr.f32.gmra.mrb[54].mxu0 %v9750_v51  ;;  %6180 = vmatprep.mubr.msk.f32.mxu1 %vm2293_vm8, %v9654_v15  ;;  %v6159_v15 = vld [vmem:[%s11338_s25 + $0x7a0] sm:$0xff] }
 0x404   :  { %v7259_v61 = vpack.c.bf16 %v6164_v14, %v6159_v15  ;;  %v3615_v15 = vld [vmem:[#allocation2 + $0x80] sm:$0xff]  ;;  %v3617_v14 = vld [vmem:[#allocation2 + $0x90] sm:$0xff] }
 0x405   :  { %7251 = vmatpush1.bf16.msra.mxu1 %v7250_v24  ;;  %v3613_v24 = vld [vmem:[#allocation2 + $0x70] sm:$0xff]  ;;  %v7279_v60 = vpack.c.bf16 %v3617_v14, %v3615_v15  ;;  %v4073_v15 = vld [vmem:[#allocation5 + $0x128] sm:$0xff]  ;;  %v4075_v14 = vld [vmem:[#allocation5 + $0x138] sm:$0xff] }
 0x406   :  { %7252 = vmatprep.subr.bf16.mxu1 %v11305_v0  ;;  %v7275_v36 = vpack.c.bf16 %v3613_v24, %v3611_v7  ;;  %v4071_v7 = vld [vmem:[#allocation5 + $0x118] sm:$0xff] }
 0x409   :  { %7254 = vmatpush1.bf16.msra.mxu1 %v7253_v23  ;;  %v4048_v23 = vld [vmem:[#allocation5 + $0x60] sm:$0xff] }
 0x40a   :  { %7255 = vmatprep.subr.bf16.mxu1 %v11305_v0 }
 0x40d   :  { %7257 = vmatpush1.bf16.msra.mxu1 %v7256_v10  ;;  %v4055_v10 = vld [vmem:[#allocation5 + $0x98] sm:$0xff] }
 0x40e   :  { %7258 = vmatprep.subr.bf16.mxu1 %v11305_v0 }
 0x411   :  { %7260 = vmatpush1.bf16.msra.mxu1 %v7259_v61 }
 0x412   :  { %3215 = vmatprep.subr.mxu1 %v11307_v1  ;;  %v10549_v1 = vld [vmem:[#allocation2 + $0x268] sm:$0xff] }
 0x413   :  { %11352 = vst [vmem:[#allocation24_spill] sm:$0xff] %v10549_v1 }
 0x415   :  { %3216 = vmatpush1.msra.mxu1 %v6169_v57  ;;  %v7415_v57 = vpack.c.bf16 %v4054_v28, %v4052_v6  ;;  %v3637_v6 = vld [vmem:[#allocation2 + $0x130] sm:$0xff]  ;;  %v4072_v28 = vld [vmem:[#allocation5 + $0x120] sm:$0xff] }
 0x416   :  { %3248 = vmatmul.mubr.f32.vlgmr.msra.gmra.mrb[92].mxu1 %v9640_v5  ;;  %7398 = vmatprep.subr.bf16.mxu1 %v7397_v17  ;;  %v7407_v5 = vpack.c.bf16 %v4046_v31, %v4044_v19  ;;  %v4056_v17 = vld [vmem:[#allocation5 + $0xa0] sm:$0xff] }
 0x417   :  { %6181 = vmatprep.mubr.msk.f32.mxu1 %vm2293_vm8, %v9699_v27  ;;  %7400 = vmatpush1.bf16.msra.mxu1 %v7399_v11  ;;  %v3612_v27 = vld [vmem:[#allocation2 + $0x68] sm:$0xff]  ;;  %v7419_v63 = vpack.c.bf16 %v4058_v35, %v4056_v17  ;;  %v3626_v11 = vld [vmem:[#allocation2 + $0xd8] sm:$0xff]  ;;  %v4076_v35 = vld [vmem:[#allocation5 + $0x140] sm:$0xff] }
 0x418   :  { %7402 = vmatprep.subr.bf16.mxu1 %v7401_v9  ;;  %v7285_v33 = vpack.c.bf16 %v3626_v11, %v3624_v39  ;;  %v3625_v9 = vld [vmem:[#allocation2 + $0xd0] sm:$0xff]  ;;  %v3644_v39 = vld [vmem:[#allocation2 + $0x168] sm:$0xff]  ;;  %v3646_v11 = vld [vmem:[#allocation2 + $0x178] sm:$0xff] }
 0x419   :  { %v7287_v48 = vpack.c.bf16 %v3625_v9, %v3623_v22  ;;  %v7305_v9 = vpack.c.bf16 %v3646_v11, %v3644_v39  ;;  %v4096_v11 = vld [vmem:[#allocation5 + $0x1e0] sm:$0xff] }
 0x41a   :  { %3253 = vmatmul.mubr.f32.gmra.mrb[94].mxu1 %v9684_v32  ;;  %v3614_v32 = vld [vmem:[#allocation2 + $0x78] sm:$0xff] }
 0x41b   :  { %6182 = vmatprep.mubr.msk.f32.mxu1 %vm2293_vm8, %v9744_v47  ;;  %7404 = vmatpush1.bf16.msra.mxu1 %v7403_v8  ;;  %v7273_v4 = vpack.c.bf16 %v3614_v32, %v3612_v27  ;;  %v4051_v47 = vld [vmem:[#allocation5 + $0x78] sm:$0xff]  ;;  %v4066_v27 = vld [vmem:[#allocation5 + $0xf0] sm:$0xff]  ;;  %v3632_v32 = vld [vmem:[#allocation2 + $0x108] sm:$0xff] }
 0x41c   :  { %7406 = vmatprep.subr.bf16.mxu1 %v7405_v26  ;;  %v7409_v18 = vpack.c.bf16 %v4051_v47, %v4049_v50  ;;  %v4067_v8 = vld [vmem:[#allocation5 + $0xf8] sm:$0xff]  ;;  %v3627_v26 = vld [vmem:[#allocation2 + $0xe0] sm:$0xff]  ;;  %v4069_v47 = vld [vmem:[#allocation5 + $0x108] sm:$0xff] }
 0x41d   :  { %7274 = vmatprep.subr.bf16.mxu0 %v7273_v4  ;;  %v7425_v19 = vpack.c.bf16 %v4067_v8, %v4065_v43  ;;  %v7291_v31 = vpack.c.bf16 %v3629_v40, %v3627_v26  ;;  %v3634_v4 = vld [vmem:[#allocation2 + $0x118] sm:$0xff]  ;;  %v4085_v8 = vld [vmem:[#allocation5 + $0x188] sm:$0xff] }
 0x41e   :  { %3258 = vmatmul.mubr.f32.gmra.mrb[96].mxu1 %v9729_v44  ;;  %v4050_v44 = vld [vmem:[#allocation5 + $0x70] sm:$0xff]  ;;  %7276 = vmatpush1.bf16.msra.mxu0 %v7275_v36  ;;  %v7293_v24 = vpack.c.bf16 %v3634_v4, %v3632_v32  ;;  %v3631_v36 = vld [vmem:[#allocation2 + $0x100] sm:$0xff]  ;;  %v3650_v43 = vld [vmem:[#allocation2 + $0x198] sm:$0xff] }
 0x41f   :  { %6183 = vmatprep.mubr.msk.f32.mxu1 %vm2293_vm8, %v9799_v37  ;;  %7408 = vmatpush1.bf16.msra.mxu1 %v7407_v5  ;;  %v7411_v37 = vpack.c.bf16 %v4050_v44, %v4048_v23  ;;  %v4064_v5 = vld [vmem:[#allocation5 + $0xe0] sm:$0xff]  ;;  %v3633_v23 = vld [vmem:[#allocation2 + $0x110] sm:$0xff]  ;;  %v4087_v26 = vld [vmem:[#allocation5 + $0x198] sm:$0xff]  ;;  %v7309_v40 = vpack.c.bf16 %v3650_v43, %v3648_v52 }
 0x420   :  { %7410 = vmatprep.subr.bf16.mxu1 %v7409_v18  ;;  %v7427_v50 = vpack.c.bf16 %v4066_v27, %v4064_v5  ;;  %v7429_v18 = vpack.c.bf16 %v4071_v7, %v4069_v47  ;;  %v4068_v44 = vld [vmem:[#allocation5 + $0x100] sm:$0xff]  ;;  %v3649_v5 = vld [vmem:[#allocation2 + $0x190] sm:$0xff]  ;;  %v3652_v47 = vld [vmem:[#allocation2 + $0x1a8] sm:$0xff] }
 0x421   :  { %v4084_v27 = vld [vmem:[#allocation5 + $0x180] sm:$0xff]  ;;  %v3654_v7 = vld [vmem:[#allocation2 + $0x1b8] sm:$0xff] }
 0x422   :  { %3263 = vmatmul.mubr.f32.gmra.mrb[98].mxu1 %v9781_v53  ;;  %v3616_v53 = vld [vmem:[#allocation2 + $0x88] sm:$0xff] }
 0x423   :  { %6184 = vmatprep.mubr.msk.f32.mxu1 %vm2293_vm8, %v9762_v49  ;;  %v4053_v49 = vld [vmem:[#allocation5 + $0x88] sm:$0xff]  ;;  %7412 = vmatpush1.bf16.msra.mxu1 %v7411_v37  ;;  %v7277_v56 = vpack.c.bf16 %v3618_v59, %v3616_v53  ;;  %v7295_v37 = vpack.c.bf16 %v3633_v23, %v3631_v36  ;;  %v4070_v53 = vld [vmem:[#allocation5 + $0x110] sm:$0xff]  ;;  %v4091_v36 = vld [vmem:[#allocation5 + $0x1b8] sm:$0xff] }
 0x424   :  { %v7413_v61 = vpack.c.bf16 %v4055_v10, %v4053_v49  ;;  %v3636_v59 = vld [vmem:[#allocation2 + $0x128] sm:$0xff]  ;;  %v3638_v49 = vld [vmem:[#allocation2 + $0x138] sm:$0xff] }
 0x425   :  { %7278 = vmatprep.subr.bf16.mxu0 %v7277_v56  ;;  %v7431_v56 = vpack.c.bf16 %v4070_v53, %v4068_v44  ;;  %v7297_v10 = vpack.c.bf16 %v3638_v49, %v3636_v59  ;;  %v3651_v44 = vld [vmem:[#allocation2 + $0x1a0] sm:$0xff]  ;;  %v4090_v49 = vld [vmem:[#allocation5 + $0x1b0] sm:$0xff] }
 0x426   :  { %3268 = vmatmul.mubr.f32.gmra.mrb[100].mxu1 %v9750_v51  ;;  %7414 = vmatprep.subr.bf16.mxu1 %v7413_v61  ;;  %v3620_v51 = vld [vmem:[#allocation2 + $0xa8] sm:$0xff]  ;;  %v3635_v61 = vld [vmem:[#allocation2 + $0x120] sm:$0xff] }
 0x427   :  { %7280 = vmatpush1.bf16.msra.mxu0 %v7279_v60  ;;  %7416 = vmatpush1.bf16.msra.mxu1 %v7415_v57  ;;  %v7281_v3 = vpack.c.bf16 %v3622_v12, %v3620_v51  ;;  %v7433_v60 = vpack.c.bf16 %v4075_v14, %v4073_v15  ;;  %v4074_v57 = vld [vmem:[#allocation5 + $0x130] sm:$0xff]  ;;  %v7299_v51 = vpack.c.bf16 %v3637_v6, %v3635_v61  ;;  %v3640_v12 = vld [vmem:[#allocation2 + $0x148] sm:$0xff]  ;;  %v4088_v53 = vld [vmem:[#allocation5 + $0x1a0] sm:$0xff] }
 0x428   :  { %7418 = vmatprep.subr.bf16.mxu1 %v7417_v21  ;;  %v7435_v13 = vpack.c.bf16 %v4074_v57, %v4072_v28  ;;  %v7301_v38 = vpack.c.bf16 %v3642_v2, %v3640_v12  ;;  %v3639_v21 = vld [vmem:[#allocation2 + $0x140] sm:$0xff]  ;;  %v3658_v15 = vld [vmem:[#allocation2 + $0x1d8] sm:$0xff]  ;;  %v4093_v14 = vld [vmem:[#allocation5 + $0x1c8] sm:$0xff] }
 0x429   :  { %7282 = vmatprep.subr.bf16.mxu0 %v7281_v3  ;;  %v4077_v3 = vld [vmem:[#allocation5 + $0x148] sm:$0xff]  ;;  %v3655_v6 = vld [vmem:[#allocation2 + $0x1c0] sm:$0xff]  ;;  %v3657_v28 = vld [vmem:[#allocation2 + $0x1d0] sm:$0xff] }
 0x42a   :  { %v7437_v17 = vpack.c.bf16 %v4079_v30, %v4077_v3  ;;  %v4092_v12 = vld [vmem:[#allocation5 + $0x1c0] sm:$0xff]  ;;  %v4094_v2 = vld [vmem:[#allocation5 + $0x1d0] sm:$0xff]  ;;  %v4097_v30 = vld [vmem:[#allocation5 + $0x1e8] sm:$0xff] }
 0x42b   :  { %7284 = vmatpush1.bf16.msra.mxu0 %v7283_v16  ;;  %7420 = vmatpush1.bf16.msra.mxu1 %v7419_v63  ;;  %v3641_v16 = vld [vmem:[#allocation2 + $0x150] sm:$0xff]  ;;  %v7455_v3 = vpack.c.bf16 %v4094_v2, %v4092_v12 }
 0x42c   :  { %7286 = vmatprep.subr.bf16.mxu0 %v7285_v33  ;;  %7422 = vmatprep.subr.bf16.mxu1 %v7421_v54  ;;  %v4078_v63 = vld [vmem:[#allocation5 + $0x150] sm:$0xff]  ;;  %v4083_v33 = vld [vmem:[#allocation5 + $0x178] sm:$0xff]  ;;  %v7303_v55 = vpack.c.bf16 %v3641_v16, %v3639_v21 }
 0x42d   :  { %v7439_v22 = vpack.c.bf16 %v4078_v63, %v4076_v35  ;;  %v7441_v54 = vpack.c.bf16 %v4083_v33, %v4081_v58  ;;  %v4099_v16 = vld [vmem:[#allocation5 + $0x1f8] sm:$0xff]  ;;  %v3661_v35 = vld [vmem:[#allocation2 + $0x1f0] sm:$0xff] }
 0x42e   :  { %v7457_v63 = vpack.c.bf16 %v4099_v16, %v4097_v30  ;;  %v4098_v58 = vld [vmem:[#allocation5 + $0x1f0] sm:$0xff] }
 0x42f   :  { %7288 = vmatpush1.bf16.msra.mxu0 %v7287_v48  ;;  %7424 = vmatpush1.bf16.msra.mxu1 %v7423_v20  ;;  %v3643_v48 = vld [vmem:[#allocation2 + $0x160] sm:$0xff]  ;;  %v7459_v33 = vpack.c.bf16 %v4098_v58, %v4096_v11 }
 0x430   :  { %7290 = vmatprep.subr.bf16.mxu0 %v7289_v45  ;;  %7426 = vmatprep.subr.bf16.mxu1 %v7425_v19  ;;  %v7307_v20 = vpack.c.bf16 %v3645_v62, %v3643_v48  ;;  %v7443_v45 = vpack.c.bf16 %v4082_v42, %v4080_v29  ;;  %v7445_v19 = vpack.c.bf16 %v4087_v26, %v4085_v8  ;;  %v4103_v48 = vld [vmem:[#allocation5 + $0x218] sm:$0xff] }
 0x433   :  { %7292 = vmatpush1.bf16.msra.mxu0 %v7291_v31  ;;  %7428 = vmatpush1.bf16.msra.mxu1 %v7427_v50  ;;  %v3647_v31 = vld [vmem:[#allocation2 + $0x180] sm:$0xff]  ;;  %v4086_v50 = vld [vmem:[#allocation5 + $0x190] sm:$0xff] }
 0x434   :  { %7294 = vmatprep.subr.bf16.mxu0 %v7293_v24  ;;  %7430 = vmatprep.subr.bf16.mxu1 %v7429_v18  ;;  %v7311_v32 = vpack.c.bf16 %v3649_v5, %v3647_v31  ;;  %v7447_v4 = vpack.c.bf16 %v4086_v50, %v4084_v27  ;;  %v4089_v24 = vld [vmem:[#allocation5 + $0x1a8] sm:$0xff]  ;;  %v7313_v18 = vpack.c.bf16 %v3654_v7, %v3652_v47 }
 0x435   :  { %v7449_v23 = vpack.c.bf16 %v4091_v36, %v4089_v24 }
 0x437   :  { %7296 = vmatpush1.bf16.msra.mxu0 %v7295_v37  ;;  %7432 = vmatpush1.bf16.msra.mxu1 %v7431_v56  ;;  %v3653_v37 = vld [vmem:[#allocation2 + $0x1b0] sm:$0xff]  ;;  %v7451_v56 = vpack.c.bf16 %v4090_v49, %v4088_v53  ;;  %v10430_v49 = vld [vmem:[%s11284_s10] sm:$0x1f]  ;;  %s8012_s10 = smov [#allocation8]  }
 0x438   :  { %7298 = vmatprep.subr.bf16.mxu0 %v7297_v10  ;;  %7434 = vmatprep.subr.bf16.mxu1 %v7433_v60  ;;  %v7315_v59 = vpack.c.bf16 %v3653_v37, %v3651_v44  ;;  %v3656_v10 = vld [vmem:[#allocation2 + $0x1c8] sm:$0xff]  ;;  %v4095_v60 = vld [vmem:[#allocation5 + $0x1d8] sm:$0xff]  ;;  %11345 = vst [vmem:[#allocation17_spill] sm:$0xff] %v10430_v49 }
 0x439   :  { %v7317_v61 = vpack.c.bf16 %v3658_v15, %v3656_v10  ;;  %v7453_v57 = vpack.c.bf16 %v4095_v60, %v4093_v14  ;;  %v3314_v10 = vsub.s32 3, %v9000_v41  ;;  %v10438_v15 = vld [vmem:[#allocation2 + $0x200] sm:$0xff]  ;;  %v10440_v14 = vld [vmem:[#allocation2 + $0x210] sm:$0xff] }
 0x43b   :  { %7300 = vmatpush1.bf16.msra.mxu0 %v7299_v51  ;;  %7436 = vmatpush1.bf16.msra.mxu1 %v7435_v13  ;;  %v7319_v51 = vpack.c.bf16 %v3657_v28, %v3655_v6  ;;  %v3660_v13 = vld [vmem:[#allocation2 + $0x1e8] sm:$0xff]  ;;  %v10448_v6 = vld [vmem:[#allocation5 + $0x210] sm:$0xff] }
 0x43c   :  { %7302 = vmatprep.subr.bf16.mxu0 %v7301_v38  ;;  %7438 = vmatprep.subr.bf16.mxu1 %v7437_v17  ;;  %v3662_v38 = vld [vmem:[#allocation2 + $0x1f8] sm:$0xff]  ;;  %v3659_v17 = vld [vmem:[#allocation2 + $0x1e0] sm:$0xff]  ;;  %v10450_v28 = vld [vmem:[#allocation2 + $0x228] sm:$0xff] }
 0x43d   :  { %v7321_v21 = vpack.c.bf16 %v3662_v38, %v3660_v13  ;;  %v7323_v39 = vpack.c.bf16 %v3661_v35, %v3659_v17  ;;  %v10468_v13 = vld [vmem:[#allocation5 + $0x238] sm:$0xff]  ;;  %v10470_v38 = vld [vmem:[#allocation2 + $0x220] sm:$0xff]  ;;  %v10487_v35 = vld [vmem:[#allocation2 + $0x230] sm:$0xff] }
 0x43f   :  { %7304 = vmatpush1.bf16.msra.mxu0 %v7303_v55  ;;  %7440 = vmatpush1.bf16.msra.mxu1 %v7439_v22  ;;  %v3664_v55 = vld [vmem:[#allocation2 + $0x208] sm:$0xff]  ;;  %v3666_v22 = vld [vmem:[#allocation2 + $0x218] sm:$0xff] }
 0x440   :  { %7306 = vmatprep.subr.bf16.mxu0 %v7305_v9  ;;  %7442 = vmatprep.subr.bf16.mxu1 %v7441_v54  ;;  %v4101_v9 = vld [vmem:[#allocation5 + $0x208] sm:$0xff]  ;;  %v7325_v54 = vpack.c.bf16 %v3666_v22, %v3664_v55  ;;  %v10509_v22 = vld [vmem:[#allocation2 + $0x258] sm:$0xff] }
 0x441   :  { %v7461_v62 = vpack.c.bf16 %v4103_v48, %v4101_v9  ;;  %v10507_v55 = vld [vmem:[#allocation2 + $0x248] sm:$0xff] }
 0x442   :  { %v10511_v9 = vld [vmem:[#allocation5 + $0x248] sm:$0xff] }
 0x443   :  { %7308 = vmatpush1.bf16.msra.mxu0 %v7307_v20  ;;  %7444 = vmatpush1.bf16.msra.mxu1 %v7443_v45  ;;  %11347 = vst [vmem:[#allocation19_spill] sm:$0xff] %v10511_v9 }
 0x444   :  { %7310 = vmatprep.subr.bf16.mxu0 %v7309_v40  ;;  %7446 = vmatprep.subr.bf16.mxu1 %v7445_v19 }
 0x447   :  { %7312 = vmatpush1.bf16.msra.mxu0 %v7311_v32  ;;  %7448 = vmatpush1.bf16.msra.mxu1 %v7447_v4 }
 0x448   :  { %7314 = vmatprep.subr.bf16.mxu0 %v7313_v18  ;;  %7450 = vmatprep.subr.bf16.mxu1 %v7449_v23 }
 0x44b   :  { %7316 = vmatpush1.bf16.msra.mxu0 %v7315_v59  ;;  %7452 = vmatpush1.bf16.msra.mxu1 %v7451_v56  ;;  %v10425_v59 = vld [vmem:[%s11283_s9] sm:$0x1f] }
 0x44c   :  { %7318 = vmatprep.subr.bf16.mxu0 %v7317_v61  ;;  %7454 = vmatprep.subr.bf16.mxu1 %v7453_v57  ;;  %v10435_v56 = vld [vmem:[%s11285_s11] sm:$0x1f]  ;;  %v10446_v60 = vrot.slane %v10425_v59, %v9005_v46  ;;  %v10452_v57 = vld [vmem:[#allocation2 + $0x238] sm:$0xff]  ;;  %v10460_v12 = vrot.slane %v10425_v59, %v9014_v34  ;;  %v10464_v2 = vrot.slane %v10425_v59, %v9011_v25  ;;  %s5842_s11 = sshll.u32 %s8012_s10, 4  ;;  %s5843_s11 = int_to_ptr.vmem [resolvable:$true] %s5842_s11 }
 0x44d   :  { %11346 = vst [vmem:[#allocation18_spill] sm:$0xff] %v10435_v56  ;;  %v10442_v61 = vld [vmem:[#allocation5 + $0x200] sm:$0xff]  ;;  %v10474_v30 = vrot.slane %v10435_v56, %v9005_v46  ;;  %v10482_v16 = vrot.slane %v10435_v56, %v9014_v34  ;;  %v10485_v17 = vrot.slane %v10425_v59, %v3314_v10  ;;  %v10499_v58 = vrot.slane %v10435_v56, %v9011_v25  ;;  %s7974_s13 = scalar_lea.vmem %s5843_s11, 32  ;;  %p7979_p11 = scmp.lt.s32.totalorder %s5843_s11, %s5843_s11 }
 0x44e   :  { %p7975_p10 = scmp.ne.s32.totalorder %s5843_s11, %s7974_s13  ;;  %p7980_p12 = scmp.lt.s32.totalorder %s7974_s13, %s7974_s13 }
 0x44f   :  { %7320 = vmatpush1.bf16.msra.mxu0 %v7319_v51  ;;  %7456 = vmatpush1.bf16.msra.mxu1 %v7455_v3  ;;  %v10456_v51 = vrot.slane %v10430_v49, %v9005_v46  ;;  %v10466_v3 = vld [vmem:[#allocation5 + $0x228] sm:$0xff]  ;;  %v10495_v46 = vrot.slane %v10430_v49, %v9011_v25 }
 0x450   :  { %7322 = vmatprep.subr.bf16.mxu0 %v7321_v21  ;;  %7458 = vmatprep.subr.bf16.mxu1 %v7457_v63  ;;  %v10478_v21 = vrot.slane %v10430_v49, %v9014_v34  ;;  %v10489_v63 = vld [vmem:[#allocation5 + $0x220] sm:$0xff]  ;;  %v10502_v34 = vrot.slane %v10430_v49, %v3314_v10  ;;  %p7981_p13 = por %p7980_p12, %p7979_p11 }
 0x452   :  { %p7982_p0 = pnand %p7981_p13, %p7975_p10 }
 0x453   :  { %7324 = vmatpush1.bf16.msra.mxu0 %v7323_v39  ;;  %7460 = vmatpush1.bf16.msra.mxu1 %v7459_v33  ;;  %v10491_v39 = vld [vmem:[#allocation5 + $0x230] sm:$0xff]  ;;  %v10505_v33 = vrot.slane %v10435_v56, %v3314_v10 }
 0x454   :  { %7326 = vmatprep.subr.bf16.mxu0 %v7325_v54  ;;  %7462 = vmatprep.subr.bf16.mxu1 %v7461_v62 }
 0x47e   :  { %v2560_v29 = vpop.f32.mrb[82].mxu1 }
 0x47f   :  { %v2562_v20 = vpop.f32.mrb[83].mxu1 }
 0x482   :  { %v2565_v42 = vpop.f32.mrb[84].mxu1 }
 0x483   :  { %v2567_v52 = vpop.f32.mrb[85].mxu1 }
 0x484   :  { %v10522_v52 = vld [vmem:[#allocation2 + $0x240] sm:$0xff] }
 0x485   :  { %11348 = vst [vmem:[#allocation20_spill] sm:$0xff] %v10522_v52 }
 0x486   :  { %v2570_v43 = vpop.f32.mrb[86].mxu1 }
 0x487   :  { %v2572_v45 = vpop.f32.mrb[87].mxu1 }
 0x48a   :  { %v2575_v8 = vpop.f32.mrb[88].mxu1 }
 0x48b   :  { %v2577_v26 = vpop.f32.mrb[89].mxu1 }
 0x48e   :  { %v2580_v40 = vpop.f32.mrb[90].mxu1 }
 0x48f   :  { %v2582_v19 = vpop.f32.mrb[91].mxu1 }
 0x4a2   :  { %v2850_v31 = vpop.f32.mrb[56].mxu0 }
 0x4a3   :  { %v10412_v5 = vadd.f32 %v2850_v31, %v2560_v29  ;;  %v2852_v27 = vpop.f32.mrb[57].mxu0  ;;  %v10532_v31 = vld [vmem:[#allocation5 + $0x240] sm:$0xff] }
 0x4a4   :  { %11350 = vst [vmem:[#allocation22_spill] sm:$0xff] %v10532_v31  ;;  %v10534_v27 = vld [vmem:[#allocation5 + $0x250] sm:$0xff] }
 0x4a5   :  { %11340 = vst [vmem:[#allocation12_spill] sm:$0xff] %v10412_v5  ;;  %11351 = vst [vmem:[#allocation23_spill] sm:$0xff] %v10534_v27 }
 0x4a6   :  { %v2855_v32 = vpop.f32.mrb[58].mxu0 }
 0x4a7   :  { %v10414_v50 = vadd.f32 %v2855_v32, %v2565_v42  ;;  %v2857_v4 = vpop.f32.mrb[59].mxu0  ;;  %v10520_v42 = vld [vmem:[#allocation5 + $0x258] sm:$0xff] }
 0x4a9   :  { %11341 = vst [vmem:[#allocation13_spill] sm:$0xff] %v10414_v50 }
 0x4aa   :  { %v2860_v47 = vpop.f32.mrb[60].mxu0 }
 0x4ab   :  { %v10416_v7 = vadd.f32 %v2860_v47, %v2570_v43  ;;  %v2862_v24 = vpop.f32.mrb[61].mxu0  ;;  %v10524_v43 = vld [vmem:[#allocation2 + $0x250] sm:$0xff] }
 0x4ac   :  { %11349 = vst [vmem:[#allocation21_spill] sm:$0xff] %v10524_v43  ;;  %v10557_v24 = vld [vmem:[#allocation5 + $0x268] sm:$0xff] }
 0x4ad   :  { %11342 = vst [vmem:[#allocation14_spill] sm:$0xff] %v10416_v7  ;;  %11354 = vst [vmem:[#allocation26_spill] sm:$0xff] %v10557_v24 }
 0x4ae   :  { %v2865_v18 = vpop.f32.mrb[62].mxu0 }
 0x4af   :  { %v10418_v36 = vadd.f32 %v2865_v18, %v2575_v8  ;;  %v2867_v23 = vpop.f32.mrb[63].mxu0 }
 0x4b1   :  { %11343 = vst [vmem:[#allocation15_spill] sm:$0xff] %v10418_v36 }
 0x4b2   :  { %v2870_v44 = vpop.f32.mrb[64].mxu0 }
 0x4b3   :  { %v10420_v37 = vadd.f32 %v2870_v44, %v2580_v40  ;;  %v2872_v53 = vpop.f32.mrb[65].mxu0 }
 0x4b5   :  { %11344 = vst [vmem:[#allocation16_spill] sm:$0xff] %v10420_v37 }
 0x4c5   :  { %v3059_v11 = vpop.f32.mrb[72].mxu1 }
 0x4c6   :  { %v3325_v54 = vadd.f32 %v10446_v60, %v3059_v11  ;;  %v3154_v48 = vpop.f32.mrb[46].mxu0  ;;  %v3061_v62 = vpop.f32.mrb[73].mxu1 }
 0x4c7   :  { %v3327_v45 = vadd.f32 %v10460_v12, %v3154_v48  ;;  %v3326_v8 = vadd.f32 %v10464_v2, %v3061_v62  ;;  %v3156_v26 = vpop.f32.mrb[47].mxu0 }
 0x4c8   :  { %v3350_v32 = vmax.f32 %v3325_v54, 0.0  ;;  %v3328_v4 = vadd.f32 %v10485_v17, %v3156_v26 }
 0x4c9   :  { %v3352_v18 = vmax.f32 %v3327_v45, 0.0  ;;  %v3351_v23 = vmax.f32 %v3326_v8, 0.0  ;;  %v3065_v44 = vpop.f32.mrb[74].mxu1  ;;  %v10551_v45 = vld [vmem:[#allocation2 + $0x278] sm:$0xff] }
 0x4ca   :  { %v3402_v11 = vmul.f32 %v10456_v51, %v3350_v32  ;;  %v3353_v54 = vmax.f32 %v3328_v4, 0.0  ;;  %v3330_v48 = vadd.f32 %v10446_v60, %v3065_v44  ;;  %v3160_v62 = vpop.f32.mrb[48].mxu0  ;;  %v3067_v26 = vpop.f32.mrb[75].mxu1  ;;  %11353 = vst [vmem:[#allocation25_spill] sm:$0xff] %v10551_v45  ;;  %v10559_v44 = vld [vmem:[#allocation5 + $0x278] sm:$0xff] }
 0x4cb   :  { %v3404_v8 = vmul.f32 %v10478_v21, %v3352_v18  ;;  %v3403_v53 = vmul.f32 %v10495_v46, %v3351_v23  ;;  %v3332_v10 = vadd.f32 %v10460_v12, %v3160_v62  ;;  %v3331_v32 = vadd.f32 %v10464_v2, %v3067_v26  ;;  %v3162_v4 = vpop.f32.mrb[49].mxu0  ;;  %11355 = vst [vmem:[#allocation27_spill] sm:$0xff] %v10559_v44 }
 0x4cc   :  { %v10562_v47 = vadd.f32 %v10474_v30, %v3402_v11  ;;  %v3405_v0 = vmul.f32 %v10502_v34, %v3353_v54  ;;  %v3355_v19 = vmax.f32 %v3330_v48, 0.0  ;;  %v3333_v40 = vadd.f32 %v10485_v17, %v3162_v4 }
 0x4cd   :  { %v10567_v18 = vadd.f32 %v10482_v16, %v3404_v8  ;;  %v3357_v23 = vmax.f32 %v3332_v10, 0.0  ;;  %v3356_v62 = vmax.f32 %v3331_v32, 0.0  ;;  %v3071_v20 = vpop.f32.mrb[76].mxu1  ;;  %v10572_v29 = vadd.f32 %v10499_v58, %v3403_v53 }
 0x4ce   :  { %v3407_v11 = vmul.f32 %v10456_v51, %v3355_v19  ;;  %v3358_v25 = vmax.f32 %v3333_v40, 0.0  ;;  %v3166_v37 = vpop.f32.mrb[50].mxu0  ;;  %v3073_v54 = vpop.f32.mrb[77].mxu1  ;;  %v3504_v8 = vrot.slane %v10562_v47, 1  ;;  %v10581_v26 = vsub.s32 4, %v9000_v41 }
 0x4cf   :  { %v3409_v10 = vmul.f32 %v10478_v21, %v3357_v23  ;;  %v3408_v32 = vmul.f32 %v10495_v46, %v3356_v62  ;;  %v3168_v4 = vpop.f32.mrb[51].mxu0  ;;  %v10584_v53 = vadd.f32 %v10505_v33, %v3405_v0  ;;  %v3335_v48 = vadd.f32 %v10446_v60, %v3071_v20 }
 0x4d0   :  { %v10587_v40 = vadd.f32 %v10474_v30, %v3407_v11  ;;  %v3410_v19 = vmul.f32 %v10502_v34, %v3358_v25  ;;  %v3510_v36 = vrot.slane %v10567_v18, 1  ;;  %v3337_v62 = vadd.f32 %v10460_v12, %v3166_v37 }
 0x4d1   :  { %v10593_v23 = vadd.f32 %v10482_v16, %v3409_v10  ;;  %v3336_v41 = vadd.f32 %v10464_v2, %v3073_v54  ;;  %v3077_v7 = vpop.f32.mrb[78].mxu1  ;;  %v3360_v11 = vmax.f32 %v3335_v48, 0.0  ;;  %v3338_v24 = vadd.f32 %v10485_v17, %v3168_v4 }
 0x4d2   :  { %v11315_v50 = vrot.slane %v10587_v40, 1  ;;  %v3172_v25 = vpop.f32.mrb[52].mxu0  ;;  %v3079_v44 = vpop.f32.mrb[79].mxu1  ;;  %v10602_v56 = vadd.f32 %v10499_v58, %v3408_v32  ;;  %v3362_v10 = vmax.f32 %v3337_v62, 0.0  ;;  %v10608_v0 = vadd.f32 %v10505_v33, %v3410_v19 }
 0x4d3   :  { %v11317_v20 = vrot.slane %v10593_v23, 1  ;;  %v3361_v1 = vmax.f32 %v3336_v41, 0.0  ;;  %v3174_v37 = vpop.f32.mrb[53].mxu0  ;;  %v3412_v48 = vmul.f32 %v10456_v51, %v3360_v11  ;;  %v3363_v4 = vmax.f32 %v3338_v24, 0.0 }
 0x4d4   :  { %v3506_v54 = vsel %vm168_vm3, %v3504_v8, %v11315_v50  ;;  %v3414_v32 = vmul.f32 %v10478_v21, %v3362_v10  ;;  %v3340_v41 = vadd.f32 %v10446_v60, %v3077_v7  ;;  %v3342_v11 = vadd.f32 %v10460_v12, %v3172_v25 }
 0x4d5   :  { %v10614_v45 = vsel %vm168_vm3, %v3510_v36, %v11317_v20  ;;  %v3413_v62 = vmul.f32 %v10495_v46, %v3361_v1  ;;  %v3083_v49 = vpop.f32.mrb[80].mxu1  ;;  %v10620_v8 = vadd.f32 %v10474_v30, %v3412_v48  ;;  %v3415_v19 = vmul.f32 %v10502_v34, %v3363_v4 }
 0x4d6   :  { %v3341_v24 = vadd.f32 %v10464_v2, %v3079_v44  ;;  %v3178_v50 = vpop.f32.mrb[54].mxu0  ;;  %v3085_v31 = vpop.f32.mrb[81].mxu1  ;;  %v10627_v10 = vadd.f32 %v10482_v16, %v3414_v32  ;;  %v3365_v1 = vmax.f32 %v3340_v41, 0.0  ;;  %v3343_v7 = vadd.f32 %v10485_v17, %v3174_v37 }
 0x4d7   :  { %v3180_v20 = vpop.f32.mrb[55].mxu0  ;;  %v3508_v48 = vrot.slane %v10602_v56, 1  ;;  %v3367_v4 = vmax.f32 %v3342_v11, 0.0  ;;  %v3519_v25 = vrot.slane %v10620_v8, 1  ;;  %v3465_v44 = vadd.f32 %v10499_v58, %v3413_v62 }
 0x4d8   :  { %v3366_v52 = vmax.f32 %v3341_v24, 0.0  ;;  %v3417_v43 = vmul.f32 %v10456_v51, %v3365_v1  ;;  %v3368_v36 = vmax.f32 %v3343_v7, 0.0  ;;  %v10636_v32 = vadd.f32 %v10505_v33, %v3415_v19 }
 0x4d9   :  { %v3419_v41 = vmul.f32 %v10478_v21, %v3367_v4  ;;  %v3345_v5 = vadd.f32 %v10446_v60, %v3083_v49  ;;  %v3347_v24 = vadd.f32 %v10460_v12, %v3178_v50  ;;  %v3346_v62 = vadd.f32 %v10464_v2, %v3085_v31 }
 0x4da   :  { %v3418_v37 = vmul.f32 %v10495_v46, %v3366_v52  ;;  %v3469_v27 = vadd.f32 %v10474_v30, %v3417_v43  ;;  %v3420_v11 = vmul.f32 %v10502_v34, %v3368_v36  ;;  %v3348_v4 = vadd.f32 %v10485_v17, %v3180_v20 }
 0x4db   :  { %v10646_v1 = vadd.f32 %v10482_v16, %v3419_v41  ;;  %v3370_v7 = vmax.f32 %v3345_v5, 0.0  ;;  %v3523_v52 = vrot.slane %v10627_v10, 1  ;;  %v3521_v9 = vrot.slane %v3465_v44, 1 }
 0x4dc   :  { %v3470_v19 = vadd.f32 %v10499_v58, %v3418_v37  ;;  %v3372_v49 = vmax.f32 %v3347_v24, 0.0  ;;  %v3371_v60 = vmax.f32 %v3346_v62, 0.0  ;;  %v3529_v43 = vrot.slane %v3469_v27, 1 }
 0x4dd   :  { %v10652_v36 = vadd.f32 %v10505_v33, %v3420_v11  ;;  %v3422_v50 = vmul.f32 %v10456_v51, %v3370_v7  ;;  %v3373_v12 = vmax.f32 %v3348_v4, 0.0  ;;  %v11356_v5 = vrot.slane %v10572_v29, 1 }
 0x4de   :  { %v3531_v2 = vrot.slane %v3470_v19, 1  ;;  %v3424_v31 = vmul.f32 %v10478_v21, %v3372_v49  ;;  %v3423_v41 = vmul.f32 %v10495_v46, %v3371_v60  ;;  %v3574_v24 = vmax.f32 %v10562_v47, %v3506_v54  ;;  %v10682_v47 = vld [vmem:[#allocation2 + $0x260] sm:$0xff] }
 0x4df   :  { %v3509_v17 = vsel %vm168_vm3, %v11356_v5, %v3508_v48  ;;  %v10661_v20 = vadd.f32 %v10474_v30, %v3422_v50  ;;  %v3425_v37 = vmul.f32 %v10502_v34, %v3373_v12  ;;  %v3522_v46 = vsel %vm168_vm3, %v3508_v48, %v3521_v9  ;;  %v4112_v5 = vld [vmem:[#allocation5 + $0x260] sm:$0xff] }
 0x4e0   :  { %v3575_v11 = vmax.f32 %v10572_v29, %v3509_v17  ;;  %v10667_v51 = vadd.f32 %v10482_v16, %v3424_v31  ;;  %v10670_v21 = vadd.f32 %v10499_v58, %v3423_v41  ;;  %v11357_v62 = vrot.slane %v10587_v40, 1  ;;  %v10684_v58 = vld [vmem:[#allocation2 + $0x270] sm:$0xff] }
 0x4e1   :  { %v3539_v30 = vrot.slane %v10661_v20, 1  ;;  %v10678_v34 = vadd.f32 %v10505_v33, %v3425_v37  ;;  %v3580_v29 = vmax.f32 %v10602_v56, %v3522_v46  ;;  %v3525_v54 = vrot.slane %v10636_v32, 1  ;;  %v4114_v17 = vld [vmem:[#allocation5 + $0x270] sm:$0xff]  ;;  %v11371_v46 = vld [vmem:[#allocation12_spill] sm:$0xff] }
 0x4e2   :  { %v3520_v7 = vsel %vm168_vm3, %v11357_v62, %v3519_v25  ;;  %3815 = vmatprep.mubr.f32.mxu0 %v3575_v11  ;;  %4236 = vmatprep.mubr.f32.mxu1 %v3575_v11  ;;  %v3541_v48 = vrot.slane %v10670_v21, 1  ;;  %v3532_v4 = vsel %vm168_vm3, %v3521_v9, %v3531_v2  ;;  %v3530_v33 = vsel %vm168_vm3, %v3519_v25, %v3529_v43  ;;  %v11369_v11 = vld [vmem:[#allocation19_spill] sm:$0xff] }
 0x4e3   :  { %v3579_v16 = vmax.f32 %v10587_v40, %v3520_v7  ;;  %3816 = vmatmul.mubr.f32.vlgmr.msra.gmra.mrb[66].mxu0 %v3574_v24  ;;  %4237 = vmatmul.mubr.f32.vlgmr.msra.gmra.mrb[102].mxu1 %v3574_v24  ;;  %v3535_v49 = vrot.slane %v10652_v36, 1  ;;  %v11358_v56 = vpack.c.bf16 %v10440_v14, %v10438_v15  ;;  %v11359_v40 = vpack.c.bf16 %v10448_v6, %v10442_v61 }
 0x4e4   :  { %v3585_v60 = vmax.f32 %v3465_v44, %v3532_v4  ;;  %v3584_v50 = vmax.f32 %v10620_v8, %v3530_v33  ;;  %v3540_v12 = vsel %vm168_vm3, %v3529_v43, %v3539_v30  ;;  %v3533_v9 = vrot.slane %v10646_v1, 1  ;;  %3821 = vmatprep.mubr.f32.mxu0 %v3580_v29  ;;  %4242 = vmatprep.mubr.f32.mxu1 %v3580_v29  ;;  %v4117_v29 = vld [vmem:[#allocation5 + $0x288] sm:$0xff] }
 0x4e5   :  { %7328 = vmatpush1.bf16.msra.mxu0 %v11358_v56  ;;  %7464 = vmatpush1.bf16.msra.mxu1 %v11359_v40  ;;  %v11360_v25 = vpack.c.bf16 %v10452_v57, %v10450_v28  ;;  %v3542_v15 = vsel %vm168_vm3, %v3531_v2, %v3541_v48  ;;  %v10708_v14 = vmax.f32 %v3469_v27, %v3540_v12  ;;  %v3545_v6 = vrot.slane %v10678_v34, 1  ;;  %v11372_v4 = vld [vmem:[#allocation21_spill] sm:$0xff]  ;;  %v11375_v56 = vld [vmem:[#allocation23_spill] sm:$0xff]  ;;  %v11376_v40 = vld [vmem:[#allocation22_spill] sm:$0xff] }
 0x4e6   :  { %v7339_v61 = vpack.c.bf16 %v10684_v58, %v10682_v47  ;;  %v11361_v8 = vpack.c.bf16 %v10468_v13, %v10466_v3  ;;  %v3590_v44 = vmax.f32 %v3470_v19, %v3542_v15  ;;  %v10718_v28 = vrot.slane %v10425_v59, %v10581_v26  ;;  %v3688_v47 = vld [vmem:[#allocation2 + $0x2c8] sm:$0xff] }
 0x4e7   :  { %7330 = vmatprep.subr.bf16.mxu0 %v11360_v25  ;;  %v11362_v57 = vrot.slane %v10608_v0, 1  ;;  %v11363_v27 = vrot.slane %v10584_v53, 1  ;;  %v3543_v2 = vrot.slane %v10667_v51, 1  ;;  %3822 = vmatmul.mubr.f32.gmra.mrb[68].mxu0 %v3579_v16  ;;  %v10731_v3 = vmax.f32 %v10567_v18, %v10614_v45  ;;  %v3681_v25 = vld [vmem:[#allocation2 + $0x290] sm:$0xff] }
 0x4e8   :  { %7466 = vmatprep.subr.bf16.mxu1 %v11361_v8  ;;  %4243 = vmatmul.mubr.f32.gmra.mrb[104].mxu1 %v3579_v16  ;;  %v11365_v19 = vpack.c.bf16 %v10487_v35, %v10470_v38  ;;  %v11366_v41 = vpack.c.bf16 %v10491_v39, %v10489_v63  ;;  %v11367_v45 = vrot.slane %v10593_v23, 1  ;;  %v3536_v37 = vsel %vm168_vm3, %v3525_v54, %v3535_v49  ;;  %v4119_v16 = vld [vmem:[#allocation5 + $0x298] sm:$0xff]  ;;  %v11380_v8 = vld [vmem:[#allocation24_spill] sm:$0xff] }
 0x4e9   :  { %v3515_v43 = vsel %vm168_vm3, %v11363_v27, %v11362_v57  ;;  %v11364_v59 = vmov %v11362_v57  ;;  %3827 = vmatprep.mubr.f32.mxu0 %v3585_v60  ;;  %v11368_v38 = vpack.c.bf16 %v10509_v22, %v10507_v55  ;;  %v3249_v35 = vpop.f32.mrb[92].mxu1  ;;  %v10758_v39 = vmax.f32 %v10636_v32, %v3536_v37  ;;  %4248 = vmatprep.mubr.f32.mxu1 %v3585_v60  ;;  %v3680_v22 = vld [vmem:[#allocation2 + $0x288] sm:$0xff]  ;;  %v11382_v27 = vld [vmem:[#allocation18_spill] sm:$0xff] }
 0x4ea   :  { %v10727_v31 = vmax.f32 %v10584_v53, %v3515_v43  ;;  %v3526_v13 = vsel %vm168_vm3, %v11364_v59, %v3525_v54  ;;  %7332 = vmatpush1.bf16.msra.mxu0 %v11365_v19  ;;  %7468 = vmatpush1.bf16.msra.mxu1 %v11366_v41  ;;  %v3524_v18 = vsel %vm168_vm3, %v11367_v45, %v3523_v52  ;;  %v3251_v55 = vpop.f32.mrb[93].mxu1  ;;  %v4116_v59 = vld [vmem:[#allocation5 + $0x280] sm:$0xff]  ;;  %v11386_v37 = vld [vmem:[#allocation13_spill] sm:$0xff] }
 0x4eb   :  { %v10743_v53 = vmax.f32 %v10608_v0, %v3526_v13  ;;  %7334 = vmatprep.subr.bf16.mxu0 %v11368_v38  ;;  %v10755_v63 = vmax.f32 %v10593_v23, %v3524_v18  ;;  %v3534_v0 = vsel %vm168_vm3, %v3523_v52, %v3533_v9  ;;  %v11370_v24 = vpack.c.bf16 %v10520_v42, %v11369_v11  ;;  %v3682_v52 = vld [vmem:[#allocation2 + $0x298] sm:$0xff]  ;;  %v4118_v13 = vld [vmem:[#allocation5 + $0x290] sm:$0xff] }
 0x4ec   :  { %v3277_v62 = vadd.f32 %v3249_v35, %v11371_v46  ;;  %v10768_v7 = vmax.f32 %v10627_v10, %v3534_v0  ;;  %v3546_v23 = vsel %vm168_vm3, %v3535_v49, %v3545_v6  ;;  %3828 = vmatmul.mubr.f32.gmra.mrb[70].mxu0 %v3584_v50  ;;  %4249 = vmatmul.mubr.f32.gmra.mrb[106].mxu1 %v3584_v50  ;;  %v11373_v10 = vld [vmem:[#allocation20_spill] sm:$0xff]  ;;  %v11378_v50 = vld [vmem:[#allocation17_spill] sm:$0xff]  ;;  %v11383_v41 = vld [vmem:[#allocation27_spill] sm:$0xff] }
 0x4ed   :  { %7470 = vmatprep.subr.bf16.mxu1 %v11370_v24  ;;  %v7475_v32 = vpack.c.bf16 %v4114_v17, %v4112_v5  ;;  %v10774_v42 = vmax.f32 %v10652_v36, %v3546_v23  ;;  %v3544_v54 = vsel %vm168_vm3, %v3533_v9, %v3543_v2  ;;  %v11374_v33 = vpack.c.bf16 %v11372_v4, %v11373_v10  ;;  %v3679_v36 = vld [vmem:[#allocation2 + $0x280] sm:$0xff]  ;;  %v11379_v9 = vld [vmem:[#allocation25_spill] sm:$0xff]  ;;  %v3254_v19 = vpop.f32.mrb[94].mxu1  ;;  %v11384_v5 = vld [vmem:[#allocation26_spill] sm:$0xff] }
 0x4ee   :  { %v11377_v49 = vpack.c.bf16 %v11375_v56, %v11376_v40  ;;  %v3329_v60 = vadd.f32 %v10718_v28, %v3277_v62  ;;  %v10788_v12 = vrot.slane %v11378_v50, %v10581_v26  ;;  %v10791_v15 = vmax.f32 %v10646_v1, %v3544_v54  ;;  %3833 = vmatprep.mubr.f32.mxu0 %v3590_v44  ;;  %v3256_v35 = vpop.f32.mrb[95].mxu1  ;;  %v3684_v0 = vld [vmem:[#allocation2 + $0x2a8] sm:$0xff]  ;;  %v3686_v11 = vld [vmem:[#allocation2 + $0x2b8] sm:$0xff]  ;;  %v3683_v23 = vld [vmem:[#allocation2 + $0x2a0] sm:$0xff] }
 0x4ef   :  { %7336 = vmatpush1.bf16.msra.mxu0 %v11374_v33  ;;  %v11381_v57 = vpack.c.bf16 %v11379_v9, %v11380_v8  ;;  %v10798_v43 = vrot.slane %v11382_v27, %v10581_v26  ;;  %4254 = vmatprep.mubr.f32.mxu1 %v3590_v44  ;;  %v11385_v17 = vpack.c.bf16 %v11383_v41, %v11384_v5  ;;  %v4121_v24 = vld [vmem:[#allocation5 + $0x2a8] sm:$0xff]  ;;  %v4123_v46 = vld [vmem:[#allocation5 + $0x2b8] sm:$0xff]  ;;  %v4126_v9 = vld [vmem:[#allocation5 + $0x2d0] sm:$0xff] }
 0x4f0   :  { %7472 = vmatpush1.bf16.msra.mxu1 %v11377_v49  ;;  %v3354_v45 = vmax.f32 %v3329_v60, 0.0  ;;  %v7341_v1 = vpack.c.bf16 %v3682_v52, %v3680_v22  ;;  %v7477_v18 = vpack.c.bf16 %v4119_v16, %v4117_v29  ;;  %v3282_v38 = vadd.f32 %v3254_v19, %v11386_v37  ;;  %3834 = vmatmul.mubr.f32.gmra.mrb[72].mxu0 %v10708_v14  ;;  %v3685_v52 = vld [vmem:[#allocation2 + $0x2b0] sm:$0xff]  ;;  %v3690_v33 = vld [vmem:[#allocation2 + $0x2d8] sm:$0xff]  ;;  %v4125_v56 = vld [vmem:[#allocation5 + $0x2c8] sm:$0xff] }
 0x4f1   :  { %7338 = vmatprep.subr.bf16.mxu0 %v11381_v57  ;;  %7474 = vmatprep.subr.bf16.mxu1 %v11385_v17  ;;  %v3595_v26 = vmax.f32 %v10670_v21, %v3541_v48  ;;  %v7343_v44 = vpack.c.bf16 %v3681_v25, %v3679_v36  ;;  %v7479_v55 = vpack.c.bf16 %v4118_v13, %v4116_v59  ;;  %v4122_v29 = vld [vmem:[#allocation5 + $0x2b0] sm:$0xff]  ;;  %v3259_v16 = vpop.f32.mrb[96].mxu1  ;;  %v4127_v40 = vld [vmem:[#allocation5 + $0x2d8] sm:$0xff]  ;;  %v4124_v25 = vld [vmem:[#allocation5 + $0x2c0] sm:$0xff] }
 0x4f2   :  { %4255 = vmatmul.mubr.f32.gmra.mrb[108].mxu1 %v10708_v14  ;;  %v3406_v62 = vmul.f32 %v10788_v12, %v3354_v45  ;;  %v3334_v22 = vadd.f32 %v10718_v28, %v3282_v38  ;;  %v3594_v21 = vmax.f32 %v10661_v20, %v3539_v30  ;;  %v7345_v48 = vpack.c.bf16 %v3686_v11, %v3684_v0  ;;  %v4120_v14 = vld [vmem:[#allocation5 + $0x2a0] sm:$0xff]  ;;  %v11387_v54 = vld [vmem:[#allocation14_spill] sm:$0xff]  ;;  %v3261_v10 = vpop.f32.mrb[97].mxu1  ;;  %v3692_v59 = vld [vmem:[#allocation2 + $0x2e8] sm:$0xff] }
 0x4f3   :  { %7340 = vmatpush1.bf16.msra.mxu0 %v7339_v61  ;;  %3839 = vmatprep.mubr.f32.mxu0 %v3595_v26  ;;  %v3287_v4 = vadd.f32 %v3259_v16, %v11387_v54  ;;  %v7347_v20 = vpack.c.bf16 %v3685_v52, %v3683_v23  ;;  %v3687_v30 = vld [vmem:[#allocation2 + $0x2c0] sm:$0xff]  ;;  %v7483_v60 = vpack.c.bf16 %v4122_v29, %v4120_v14  ;;  %v3689_v36 = vld [vmem:[#allocation2 + $0x2d0] sm:$0xff]  ;;  %v3694_v45 = vld [vmem:[#allocation2 + $0x2f8] sm:$0xff] }
 0x4f4   :  { %7476 = vmatpush1.bf16.msra.mxu1 %v7475_v32  ;;  %4260 = vmatprep.mubr.f32.mxu1 %v3595_v26  ;;  %v10818_v58 = vadd.f32 %v10798_v43, %v3406_v62  ;;  %v3359_v61 = vmax.f32 %v3334_v22, 0.0  ;;  %v7481_v32 = vpack.c.bf16 %v4123_v46, %v4121_v24  ;;  %v7349_v8 = vpack.c.bf16 %v3690_v33, %v3688_v47  ;;  %v11388_v41 = vld [vmem:[#allocation15_spill] sm:$0xff]  ;;  %v3696_v23 = vld [vmem:[#allocation2 + $0x308] sm:$0xff] }
 0x4f5   :  { %7342 = vmatprep.subr.bf16.mxu0 %v7341_v1  ;;  %7478 = vmatprep.subr.bf16.mxu1 %v7477_v18  ;;  %v3339_v50 = vadd.f32 %v10718_v28, %v3287_v4  ;;  %v7485_v57 = vpack.c.bf16 %v4127_v40, %v4125_v56  ;;  %v3264_v27 = vpop.f32.mrb[98].mxu1  ;;  %v4129_v1 = vld [vmem:[#allocation5 + $0x2e8] sm:$0xff]  ;;  %v4131_v18 = vld [vmem:[#allocation5 + $0x2f8] sm:$0xff]  ;;  %v7351_v37 = vpack.c.bf16 %v3689_v36, %v3687_v30  ;;  %v3691_v26 = vld [vmem:[#allocation2 + $0x2e0] sm:$0xff] }
 0x4f6   :  { %3840 = vmatmul.mubr.f32.gmra.mrb[74].mxu0 %v3594_v21  ;;  %4261 = vmatmul.mubr.f32.gmra.mrb[110].mxu1 %v3594_v21  ;;  %v3411_v49 = vmul.f32 %v10788_v12, %v3359_v61  ;;  %v3292_v5 = vadd.f32 %v3264_v27, %v11388_v41  ;;  %v3266_v17 = vpop.f32.mrb[99].mxu1  ;;  %v7487_v38 = vpack.c.bf16 %v4126_v9, %v4124_v25  ;;  %v3516_v35 = vrot.slane %v10818_v58, 1  ;;  %v4128_v62 = vld [vmem:[#allocation5 + $0x2e0] sm:$0xff]  ;;  %v3698_v47 = vld [vmem:[#allocation2 + $0x318] sm:$0xff]  ;;  %v4133_v61 = vld [vmem:[#allocation5 + $0x308] sm:$0xff] }
 0x4f7   :  { %7344 = vmatpush1.bf16.msra.mxu0 %v7343_v44  ;;  %3910 = vmatprep.mubr.f32.mxu0 %v10727_v31  ;;  %v3364_v19 = vmax.f32 %v3339_v50, 0.0  ;;  %v3693_v44 = vld [vmem:[#allocation2 + $0x2f0] sm:$0xff]  ;;  %v7353_v24 = vpack.c.bf16 %v3694_v45, %v3692_v59  ;;  %v7489_v46 = vpack.c.bf16 %v4131_v18, %v4129_v1  ;;  %v11389_v14 = vld [vmem:[#allocation16_spill] sm:$0xff]  ;;  %v4139_v27 = vld [vmem:[#allocation5 + $0x338] sm:$0xff] }
 0x4f8   :  { %7480 = vmatpush1.bf16.msra.mxu1 %v7479_v55  ;;  %4331 = vmatprep.mubr.f32.mxu1 %v10727_v31  ;;  %v3463_v13 = vadd.f32 %v10798_v43, %v3411_v49  ;;  %v3344_v11 = vadd.f32 %v10718_v28, %v3292_v5  ;;  %v4130_v55 = vld [vmem:[#allocation5 + $0x2f0] sm:$0xff]  ;;  %v7355_v4 = vpack.c.bf16 %v3693_v44, %v3691_v26  ;;  %v4132_v50 = vld [vmem:[#allocation5 + $0x300] sm:$0xff]  ;;  %v3700_v25 = vld [vmem:[#allocation2 + $0x328] sm:$0xff] }
 0x4f9   :  { %7346 = vmatprep.subr.bf16.mxu0 %v7345_v48  ;;  %7482 = vmatprep.subr.bf16.mxu1 %v7481_v32  ;;  %v3416_v0 = vmul.f32 %v10788_v12, %v3364_v19  ;;  %v3269_v22 = vpop.f32.mrb[100].mxu1  ;;  %v4135_v32 = vld [vmem:[#allocation5 + $0x318] sm:$0xff]  ;;  %v7491_v56 = vpack.c.bf16 %v4130_v55, %v4128_v62  ;;  %v3697_v30 = vld [vmem:[#allocation2 + $0x310] sm:$0xff]  ;;  %v7357_v49 = vpack.c.bf16 %v3698_v47, %v3696_v23  ;;  %v3699_v45 = vld [vmem:[#allocation2 + $0x320] sm:$0xff] }
 0x4fa   :  { %v3517_v31 = vrot.slane %v3463_v13, 1  ;;  %v3369_v48 = vmax.f32 %v3344_v11, 0.0  ;;  %v3297_v29 = vadd.f32 %v3269_v22, %v11389_v14  ;;  %v3271_v16 = vpop.f32.mrb[101].mxu1  ;;  %v4134_v36 = vld [vmem:[#allocation5 + $0x310] sm:$0xff]  ;;  %v4141_v11 = vld [vmem:[#allocation5 + $0x348] sm:$0xff]  ;;  %v4143_v26 = vld [vmem:[#allocation5 + $0x358] sm:$0xff] }
 0x4fb   :  { %7348 = vmatpush1.bf16.msra.mxu0 %v7347_v20  ;;  %v3468_v21 = vadd.f32 %v10798_v43, %v3416_v0  ;;  %v3695_v20 = vld [vmem:[#allocation2 + $0x300] sm:$0xff]  ;;  %v7495_v17 = vpack.c.bf16 %v4134_v36, %v4132_v50  ;;  %v3701_v1 = vld [vmem:[#allocation2 + $0x330] sm:$0xff]  ;;  %v3704_v0 = vld [vmem:[#allocation2 + $0x348] sm:$0xff] }
 0x4fc   :  { %7484 = vmatpush1.bf16.msra.mxu1 %v7483_v60  ;;  %7350 = vmatprep.subr.bf16.mxu0 %v7349_v8  ;;  %v3518_v52 = vsel %vm168_vm3, %v3516_v35, %v3517_v31  ;;  %v3421_v33 = vmul.f32 %v10788_v12, %v3369_v48  ;;  %v3349_v40 = vadd.f32 %v10718_v28, %v3297_v29  ;;  %v3702_v8 = vld [vmem:[#allocation2 + $0x338] sm:$0xff]  ;;  %v4138_v35 = vld [vmem:[#allocation5 + $0x330] sm:$0xff]  ;;  %v3703_v55 = vld [vmem:[#allocation2 + $0x340] sm:$0xff] }
 0x4fd   :  { %7486 = vmatprep.subr.bf16.mxu1 %v7485_v57  ;;  %v10834_v54 = vmax.f32 %v10818_v58, %v3518_v52  ;;  %v3527_v10 = vrot.slane %v3468_v21, 1  ;;  %v7493_v60 = vpack.c.bf16 %v4135_v32, %v4133_v61  ;;  %v4137_v57 = vld [vmem:[#allocation5 + $0x328] sm:$0xff]  ;;  %v7359_v5 = vpack.c.bf16 %v3697_v30, %v3695_v20  ;;  %v3705_v22 = vld [vmem:[#allocation2 + $0x350] sm:$0xff]  ;;  %v4140_v52 = vld [vmem:[#allocation5 + $0x340] sm:$0xff] }
 0x4fe   :  { %v3473_v58 = vadd.f32 %v10798_v43, %v3421_v33  ;;  %v3374_v9 = vmax.f32 %v3349_v40, 0.0  ;;  %v7361_v18 = vpack.c.bf16 %v3702_v8, %v3700_v25  ;;  %v4142_v48 = vld [vmem:[#allocation5 + $0x350] sm:$0xff]  ;;  %v3708_v14 = vld [vmem:[#allocation2 + $0x368] sm:$0xff]  ;;  %v3710_v29 = vld [vmem:[#allocation2 + $0x378] sm:$0xff]  ;;  %v7367_v32 = vpack.c.bf16 %v3705_v22, %v3703_v55 }
 0x4ff   :  { %7352 = vmatpush1.bf16.msra.mxu0 %v7351_v37  ;;  %v3528_v59 = vsel %vm168_vm3, %v3517_v31, %v3527_v10  ;;  %v7497_v37 = vpack.c.bf16 %v4139_v27, %v4137_v57  ;;  %v4145_v16 = vld [vmem:[#allocation5 + $0x368] sm:$0xff]  ;;  %v4147_v47 = vld [vmem:[#allocation5 + $0x378] sm:$0xff]  ;;  %v3709_v33 = vld [vmem:[#allocation2 + $0x370] sm:$0xff] }
 0x500   :  { %7488 = vmatpush1.bf16.msra.mxu1 %v7487_v38  ;;  %7354 = vmatprep.subr.bf16.mxu0 %v7353_v24  ;;  %v10840_v19 = vmax.f32 %v3463_v13, %v3528_v59  ;;  %v3537_v28 = vrot.slane %v3473_v58, 1  ;;  %v3426_v41 = vmul.f32 %v10788_v12, %v3374_v9  ;;  %v4136_v38 = vld [vmem:[#allocation5 + $0x320] sm:$0xff]  ;;  %v3706_v13 = vld [vmem:[#allocation2 + $0x358] sm:$0xff]  ;;  %v7505_v40 = vpack.c.bf16 %v4147_v47, %v4145_v16  ;;  %v4146_v30 = vld [vmem:[#allocation5 + $0x370] sm:$0xff] }
 0x501   :  { %7490 = vmatprep.subr.bf16.mxu1 %v7489_v46  ;;  %v7363_v46 = vpack.c.bf16 %v3701_v1, %v3699_v45  ;;  %v7499_v62 = vpack.c.bf16 %v4138_v35, %v4136_v38  ;;  %v7365_v23 = vpack.c.bf16 %v3706_v13, %v3704_v0  ;;  %v4144_v20 = vld [vmem:[#allocation5 + $0x360] sm:$0xff]  ;;  %v4149_v50 = vld [vmem:[#allocation5 + $0x388] sm:$0xff]  ;;  %v4151_v36 = vld [vmem:[#allocation5 + $0x398] sm:$0xff] }
 0x502   :  { %v10844_v31 = vadd.f32 %v10798_v43, %v3426_v41  ;;  %v3538_v44 = vsel %vm168_vm3, %v3527_v10, %v3537_v28  ;;  %v7501_v43 = vpack.c.bf16 %v4143_v26, %v4141_v11  ;;  %v3707_v10 = vld [vmem:[#allocation2 + $0x360] sm:$0xff]  ;;  %v3713_v8 = vld [vmem:[#allocation2 + $0x390] sm:$0xff]  ;;  %v7509_v27 = vpack.c.bf16 %v4151_v36, %v4149_v50  ;;  %v3716_v41 = vld [vmem:[#allocation2 + $0x3a8] sm:$0xff] }
 0x503   :  { %7356 = vmatpush1.bf16.msra.mxu0 %v7355_v4  ;;  %v10847_v12 = vmax.f32 %v3468_v21, %v3538_v44  ;;  %v7503_v4 = vpack.c.bf16 %v4142_v48, %v4140_v52  ;;  %v7371_v25 = vpack.c.bf16 %v3709_v33, %v3707_v10  ;;  %v3711_v9 = vld [vmem:[#allocation2 + $0x380] sm:$0xff]  ;;  %v4155_v45 = vld [vmem:[#allocation5 + $0x3b8] sm:$0xff]  ;;  %v3717_v38 = vld [vmem:[#allocation2 + $0x3b0] sm:$0xff] }
 0x504   :  { %7492 = vmatpush1.bf16.msra.mxu1 %v7491_v56  ;;  %7358 = vmatprep.subr.bf16.mxu0 %v7357_v49  ;;  %v3547_v24 = vrot.slane %v10844_v31, 1  ;;  %v7369_v56 = vpack.c.bf16 %v3710_v29, %v3708_v14  ;;  %v3712_v49 = vld [vmem:[#allocation2 + $0x388] sm:$0xff]  ;;  %v4148_v59 = vld [vmem:[#allocation5 + $0x380] sm:$0xff]  ;;  %v7375_v1 = vpack.c.bf16 %v3713_v8, %v3711_v9  ;;  %v4154_v11 = vld [vmem:[#allocation5 + $0x3b0] sm:$0xff] }
 0x505   :  { %7494 = vmatprep.subr.bf16.mxu1 %v7493_v60  ;;  %v3714_v60 = vld [vmem:[#allocation2 + $0x398] sm:$0xff]  ;;  %v4152_v13 = vld [vmem:[#allocation5 + $0x3a0] sm:$0xff]  ;;  %v3720_v26 = vld [vmem:[#allocation2 + $0x3c8] sm:$0xff] }
 0x506   :  { %v3548_v21 = vsel %vm168_vm3, %v3537_v28, %v3547_v24  ;;  %v7373_v57 = vpack.c.bf16 %v3714_v60, %v3712_v49  ;;  %v4150_v28 = vld [vmem:[#allocation5 + $0x390] sm:$0xff]  ;;  %v3722_v44 = vld [vmem:[#allocation2 + $0x3d8] sm:$0xff]  ;;  %v7515_v22 = vpack.c.bf16 %v4154_v11, %v4152_v13  ;;  %v4156_v14 = vld [vmem:[#allocation5 + $0x3c0] sm:$0xff] }
 0x507   :  { %7360 = vmatpush1.bf16.msra.mxu0 %v7359_v5  ;;  %v10853_v61 = vmax.f32 %v3473_v58, %v3548_v21  ;;  %v7507_v58 = vpack.c.bf16 %v4146_v30, %v4144_v20  ;;  %v3718_v5 = vld [vmem:[#allocation2 + $0x3b8] sm:$0xff]  ;;  %v7381_v52 = vpack.c.bf16 %v3722_v44, %v3720_v26  ;;  %v4158_v29 = vld [vmem:[#allocation5 + $0x3d0] sm:$0xff]  ;;  %v3724_v16 = vld [vmem:[#allocation2 + $0x3e8] sm:$0xff] }
 0x508   :  { %7496 = vmatpush1.bf16.msra.mxu1 %v7495_v17  ;;  %7362 = vmatprep.subr.bf16.mxu0 %v7361_v18  ;;  %v4153_v17 = vld [vmem:[#allocation5 + $0x3a8] sm:$0xff]  ;;  %v7511_v18 = vpack.c.bf16 %v4150_v28, %v4148_v59  ;;  %v7377_v35 = vpack.c.bf16 %v3718_v5, %v3716_v41  ;;  %v3726_v47 = vld [vmem:[#allocation2 + $0x3f8] sm:$0xff]  ;;  %v7519_v10 = vpack.c.bf16 %v4158_v29, %v4156_v14  ;;  %v3723_v33 = vld [vmem:[#allocation2 + $0x3e0] sm:$0xff] }
 0x509   :  { %7498 = vmatprep.subr.bf16.mxu1 %v7497_v37  ;;  %v3715_v37 = vld [vmem:[#allocation2 + $0x3a0] sm:$0xff]  ;;  %v7513_v0 = vpack.c.bf16 %v4155_v45, %v4153_v17  ;;  %v4161_v21 = vld [vmem:[#allocation5 + $0x3e8] sm:$0xff]  ;;  %v4162_v49 = vld [vmem:[#allocation5 + $0x3f0] sm:$0xff] }
 0x50a   :  { %v7379_v55 = vpack.c.bf16 %v3717_v38, %v3715_v37  ;;  %v4160_v30 = vld [vmem:[#allocation5 + $0x3e0] sm:$0xff]  ;;  %v3728_v60 = vld [vmem:[#allocation2 + $0x408] sm:$0xff]  ;;  %v3730_v50 = vld [vmem:[#allocation2 + $0x418] sm:$0xff] }
 0x50b   :  { %7364 = vmatpush1.bf16.msra.mxu0 %v7363_v46  ;;  %v4157_v46 = vld [vmem:[#allocation5 + $0x3c8] sm:$0xff]  ;;  %v7523_v9 = vpack.c.bf16 %v4162_v49, %v4160_v30  ;;  %v7389_v8 = vpack.c.bf16 %v3730_v50, %v3728_v60  ;;  %v3729_v59 = vld [vmem:[#allocation2 + $0x410] sm:$0xff]  ;;  %v4164_v28 = vld [vmem:[#allocation5 + $0x400] sm:$0xff] }
 0x50c   :  { %7500 = vmatpush1.bf16.msra.mxu1 %v7499_v62  ;;  %7366 = vmatprep.subr.bf16.mxu0 %v7365_v23  ;;  %v4159_v62 = vld [vmem:[#allocation5 + $0x3d8] sm:$0xff]  ;;  %v3719_v23 = vld [vmem:[#allocation2 + $0x3c0] sm:$0xff]  ;;  %v4165_v36 = vld [vmem:[#allocation5 + $0x408] sm:$0xff] }
 0x50d   :  { %7502 = vmatprep.subr.bf16.mxu1 %v7501_v43  ;;  %v3721_v43 = vld [vmem:[#allocation2 + $0x3d0] sm:$0xff]  ;;  %v7517_v48 = vpack.c.bf16 %v4159_v62, %v4157_v46  ;;  %v3732_v5 = vld [vmem:[#allocation2 + $0x428] sm:$0xff]  ;;  %v3734_v17 = vld [vmem:[#allocation2 + $0x438] sm:$0xff] }
 0x50e   :  { %v4166_v41 = vld [vmem:[#allocation5 + $0x410] sm:$0xff]  ;;  %v4169_v45 = vld [vmem:[#allocation5 + $0x428] sm:$0xff]  ;;  %v3731_v38 = vld [vmem:[#allocation2 + $0x420] sm:$0xff] }
 0x50f   :  { %7368 = vmatpush1.bf16.msra.mxu0 %v7367_v32  ;;  %v4163_v32 = vld [vmem:[#allocation5 + $0x3f8] sm:$0xff]  ;;  %v7527_v37 = vpack.c.bf16 %v4166_v41, %v4164_v28  ;;  %v3733_v13 = vld [vmem:[#allocation2 + $0x430] sm:$0xff]  ;;  %v4168_v11 = vld [vmem:[#allocation5 + $0x420] sm:$0xff] }
 0x510   :  { %7504 = vmatpush1.bf16.msra.mxu1 %v7503_v4  ;;  %7370 = vmatprep.subr.bf16.mxu0 %v7369_v56  ;;  %v7383_v4 = vpack.c.bf16 %v3721_v43, %v3719_v23  ;;  %v3725_v56 = vld [vmem:[#allocation2 + $0x3f0] sm:$0xff]  ;;  %v7521_v20 = vpack.c.bf16 %v4163_v32, %v4161_v21  ;;  %v7395_v44 = vpack.c.bf16 %v3733_v13, %v3731_v38  ;;  %v4624_v62 = vld [vmem:[#allocation7 + $0x1a8] sm:$0xff]  ;;  %v4614_v60 = vld [vmem:[#allocation7 + $0x158] sm:$0xff] }
 0x511   :  { %7506 = vmatprep.subr.bf16.mxu1 %v7505_v40  ;;  %v7385_v40 = vpack.c.bf16 %v3726_v47, %v3724_v16  ;;  %v4170_v26 = vld [vmem:[#allocation5 + $0x430] sm:$0xff]  ;;  %v4608_v23 = vld [vmem:[#allocation7 + $0x128] sm:$0xff]  ;;  %v4610_v16 = vld [vmem:[#allocation7 + $0x138] sm:$0xff] }
 0x512   :  { %v7531_v46 = vpack.c.bf16 %v4170_v26, %v4168_v11  ;;  %v4625_v43 = vld [vmem:[#allocation7 + $0x1b0] sm:$0xff]  ;;  %v4627_v47 = vld [vmem:[#allocation7 + $0x1c0] sm:$0xff]  ;;  %v4628_v21 = vld [vmem:[#allocation7 + $0x1c8] sm:$0xff] }
 0x513   :  { %7372 = vmatpush1.bf16.msra.mxu0 %v7371_v25  ;;  %v4167_v25 = vld [vmem:[#allocation5 + $0x418] sm:$0xff]  ;;  %v4609_v29 = vld [vmem:[#allocation7 + $0x130] sm:$0xff] }
 0x514   :  { %7508 = vmatpush1.bf16.msra.mxu1 %v7507_v58  ;;  %7374 = vmatprep.subr.bf16.mxu0 %v7373_v57  ;;  %v7387_v58 = vpack.c.bf16 %v3725_v56, %v3723_v33  ;;  %v7525_v57 = vpack.c.bf16 %v4167_v25, %v4165_v36  ;;  %v7555_v32 = vpack.c.bf16 %v4610_v16, %v4609_v29  ;;  %v4612_v33 = vld [vmem:[#allocation7 + $0x148] sm:$0xff]  ;;  %v4629_v56 = vld [vmem:[#allocation7 + $0x1d0] sm:$0xff] }
 0x515   :  { %7510 = vmatprep.subr.bf16.mxu1 %v7509_v27  ;;  %v3727_v27 = vld [vmem:[#allocation2 + $0x400] sm:$0xff]  ;;  %v4613_v49 = vld [vmem:[#allocation7 + $0x150] sm:$0xff]  ;;  %v4468_v29 = vld [vmem:[%s11288_s14 + $0x8] sm:$0xff] }
 0x516   :  { %v7563_v50 = vpack.c.bf16 %v4614_v60, %v4613_v49  ;;  %v4594_v49 = vld [vmem:[#allocation7 + $0xc0] sm:$0xff]  ;;  %v4595_v60 = vld [vmem:[#allocation7 + $0xc8] sm:$0xff] }
 0x517   :  { %7376 = vmatpush1.bf16.msra.mxu0 %v7375_v1  ;;  %v4171_v1 = vld [vmem:[#allocation5 + $0x438] sm:$0xff] }
 0x518   :  { %7512 = vmatpush1.bf16.msra.mxu1 %v7511_v18  ;;  %7378 = vmatprep.subr.bf16.mxu0 %v7377_v35  ;;  %v7391_v18 = vpack.c.bf16 %v3729_v59, %v3727_v27  ;;  %v7393_v35 = vpack.c.bf16 %v3734_v17, %v3732_v5 }
 0x519   :  { %7514 = vmatprep.subr.bf16.mxu1 %v7513_v0  ;;  %v7529_v0 = vpack.c.bf16 %v4171_v1, %v4169_v45 }
 0x51b   :  { %7380 = vmatpush1.bf16.msra.mxu0 %v7379_v55  ;;  %v4607_v55 = vld [vmem:[#allocation7 + $0x120] sm:$0xff] }
 0x51c   :  { %7516 = vmatpush1.bf16.msra.mxu1 %v7515_v22  ;;  %7382 = vmatprep.subr.bf16.mxu0 %v7381_v52  ;;  %v7551_v52 = vpack.c.bf16 %v4608_v23, %v4607_v55  ;;  %v4467_v55 = vld [vmem:[%s11288_s14] sm:$0xff] }
 0x51d   :  { %7518 = vmatprep.subr.bf16.mxu1 %v7517_v48  ;;  %v4626_v48 = vld [vmem:[#allocation7 + $0x1b8] sm:$0xff] }
 0x51e   :  { %v7553_v14 = vpack.c.bf16 %v4626_v48, %v4625_v43  ;;  %v4572_v43 = vld [vmem:[#allocation7 + $0x10] sm:$0xff]  ;;  %v4590_v48 = vld [vmem:[#allocation7 + $0xa0] sm:$0xff] }
 0x51f   :  { %7384 = vmatpush1.bf16.msra.mxu0 %v7383_v4  ;;  %v7557_v4 = vpack.c.bf16 %v4628_v21, %v4627_v47  ;;  %v4574_v21 = vld [vmem:[#allocation7 + $0x20] sm:$0xff] }
 0x520   :  { %7520 = vmatpush1.bf16.msra.mxu1 %v7519_v10  ;;  %7386 = vmatprep.subr.bf16.mxu0 %v7385_v40  ;;  %v4611_v10 = vld [vmem:[#allocation7 + $0x140] sm:$0xff]  ;;  %v4630_v40 = vld [vmem:[#allocation7 + $0x1d8] sm:$0xff] }
 0x521   :  { %7522 = vmatprep.subr.bf16.mxu1 %v7521_v20  ;;  %v7559_v20 = vpack.c.bf16 %v4612_v33, %v4611_v10  ;;  %v7561_v30 = vpack.c.bf16 %v4630_v40, %v4629_v56  ;;  %v4593_v10 = vld [vmem:[#allocation7 + $0xb8] sm:$0xff]  ;;  %v4469_v33 = vld [vmem:[%s11288_s14 + $0x10] sm:$0xf] }
 0x523   :  { %7388 = vmatpush1.bf16.msra.mxu0 %v7387_v58 }
 0x524   :  { %7524 = vmatpush1.bf16.msra.mxu1 %v7523_v9  ;;  %7390 = vmatprep.subr.bf16.mxu0 %v7389_v8 }
 0x525   :  { %7526 = vmatprep.subr.bf16.mxu1 %v7525_v57 }
 0x526   :  { %3911 = vmatmul.mubr.f32.vlgmr.msra.gmra.mrb[66].mxu0 %v10731_v3 }
 0x527   :  { %4332 = vmatmul.mubr.f32.vlgmr.msra.gmra.mrb[102].mxu1 %v10731_v3  ;;  %3916 = vmatprep.mubr.f32.mxu0 %v10743_v53  ;;  %v3597_v3 = vmax.f32 %v10678_v34, %v3545_v6  ;;  %v4619_v34 = vld [vmem:[#allocation7 + $0x180] sm:$0xff]  ;;  %v4620_v6 = vld [vmem:[#allocation7 + $0x188] sm:$0xff] }
 0x528   :  { %4337 = vmatprep.mubr.f32.mxu1 %v10743_v53  ;;  %7392 = vmatpush1.bf16.msra.mxu0 %v7391_v18  ;;  %v3596_v53 = vmax.f32 %v10667_v51, %v3543_v2  ;;  %v3598_v51 = vmax.f32 %v10844_v31, %v3547_v24  ;;  %v4603_v2 = vld [vmem:[#allocation7 + $0x100] sm:$0xff] }
 0x529   :  { %7528 = vmatpush1.bf16.msra.mxu1 %v7527_v37  ;;  %7394 = vmatprep.subr.bf16.mxu0 %v7393_v35  ;;  %v4623_v24 = vld [vmem:[#allocation7 + $0x1a0] sm:$0xff] }
 0x52a   :  { %7530 = vmatprep.subr.bf16.mxu1 %v7529_v0  ;;  %3917 = vmatmul.mubr.f32.gmra.mrb[68].mxu0 %v10755_v63  ;;  %v7549_v22 = vpack.c.bf16 %v4624_v62, %v4623_v24  ;;  %v4589_v24 = vld [vmem:[#allocation7 + $0x98] sm:$0xff] }
 0x52b   :  { %4338 = vmatmul.mubr.f32.gmra.mrb[104].mxu1 %v10755_v63  ;;  %3922 = vmatprep.mubr.f32.mxu0 %v10758_v39  ;;  %v11390_v63 = vmov 0.0  }
 0x52c   :  { %4343 = vmatprep.mubr.f32.mxu1 %v10758_v39  ;;  %7396 = vmatpush1.bf16.msra.mxu0 %v7395_v44  ;;  %v4604_v39 = vld [vmem:[#allocation7 + $0x108] sm:$0xff] }
 0x52d   :  { %7532 = vmatpush1.bf16.msra.mxu1 %v7531_v46 }
 0x52e   :  { %3923 = vmatmul.mubr.f32.gmra.mrb[70].mxu0 %v10768_v7 }
 0x52f   :  { %4344 = vmatmul.mubr.f32.gmra.mrb[106].mxu1 %v10768_v7  ;;  %3928 = vmatprep.mubr.f32.mxu0 %v10774_v42  ;;  %v7541_v7 = vpack.c.bf16 %v4620_v6, %v4619_v34 }
 0x530   :  { %4349 = vmatprep.mubr.f32.mxu1 %v10774_v42  ;;  %v7543_v42 = vpack.c.bf16 %v4604_v39, %v4603_v2 }
 0x531   :  { %7542 = vmatprep.subr.bf16.mxu1 %v7541_v7 }
 0x532   :  { %3929 = vmatmul.mubr.f32.gmra.mrb[72].mxu0 %v10791_v15 }
 0x533   :  { %4350 = vmatmul.mubr.f32.gmra.mrb[108].mxu1 %v10791_v15  ;;  %3934 = vmatprep.mubr.f32.mxu0 %v3597_v3  ;;  %v4621_v15 = vld [vmem:[#allocation7 + $0x190] sm:$0xff] }
 0x534   :  { %4355 = vmatprep.mubr.f32.mxu1 %v3597_v3 }
 0x536   :  { %3935 = vmatmul.mubr.f32.gmra.mrb[74].mxu0 %v3596_v53 }
 0x537   :  { %4356 = vmatmul.mubr.f32.gmra.mrb[110].mxu1 %v3596_v53  ;;  %4005 = vmatprep.mubr.f32.mxu0 %v11390_v63 }
 0x538   :  { %4426 = vmatprep.mubr.f32.mxu1 %v11390_v63 }
 0x53a   :  { %6185 = vmatmul.mubr.msk.f32.vlgmr.msra.gmra.mrb[66].mxu0 %vm3735_vm9, %v10834_v54 }
 0x53b   :  { %6190 = vmatmul.mubr.msk.f32.vlgmr.msra.gmra.mrb[102].mxu1 %vm3735_vm9, %v10834_v54  ;;  %4011 = vmatprep.mubr.f32.mxu0 %v11390_v63  ;;  %v4622_v54 = vld [vmem:[#allocation7 + $0x198] sm:$0xff] }
 0x53c   :  { %4432 = vmatprep.mubr.f32.mxu1 %v11390_v63  ;;  %7544 = vmatpush3.bf16.msra.mxu1 %v7543_v42 }
 0x53e   :  { %6186 = vmatmul.mubr.msk.f32.gmra.mrb[68].mxu0 %vm3735_vm9, %v10840_v19 }
 0x53f   :  { %6191 = vmatmul.mubr.msk.f32.gmra.mrb[104].mxu1 %vm3735_vm9, %v10840_v19  ;;  %4017 = vmatprep.mubr.f32.mxu0 %v11390_v63  ;;  %v7545_v19 = vpack.c.bf16 %v4622_v54, %v4621_v15  ;;  %v4586_v15 = vld [vmem:[#allocation7 + $0x80] sm:$0xff]  ;;  %v4587_v54 = vld [vmem:[#allocation7 + $0x88] sm:$0xff] }
 0x540   :  { %4438 = vmatprep.mubr.f32.mxu1 %v11390_v63  ;;  %v7573_v62 = vpack.c.bf16 %v4587_v54, %v4586_v15  ;;  %v4618_v15 = vld [vmem:[#allocation7 + $0x178] sm:$0xff] }
 0x541   :  { %7546 = vmatprep.subr.bf16.mxu1 %v7545_v19 }
 0x542   :  { %6187 = vmatmul.mubr.msk.f32.gmra.mrb[70].mxu0 %vm3735_vm9, %v10847_v12 }
 0x543   :  { %6192 = vmatmul.mubr.msk.f32.gmra.mrb[106].mxu1 %vm3735_vm9, %v10847_v12  ;;  %4023 = vmatprep.mubr.f32.mxu0 %v11390_v63  ;;  %v4605_v12 = vld [vmem:[#allocation7 + $0x110] sm:$0xff] }
 0x544   :  { %4444 = vmatprep.mubr.f32.mxu1 %v11390_v63 }
 0x546   :  { %6188 = vmatmul.mubr.msk.f32.gmra.mrb[72].mxu0 %vm3735_vm9, %v10853_v61 }
 0x547   :  { %6193 = vmatmul.mubr.msk.f32.gmra.mrb[108].mxu1 %vm3735_vm9, %v10853_v61  ;;  %4029 = vmatprep.mubr.f32.mxu0 %v11390_v63  ;;  %v4606_v61 = vld [vmem:[#allocation7 + $0x118] sm:$0xff] }
 0x548   :  { %4450 = vmatprep.mubr.f32.mxu1 %v11390_v63  ;;  %v7547_v31 = vpack.c.bf16 %v4606_v61, %v4605_v12  ;;  %v4570_v12 = vld [vmem:[#allocation7] sm:$0xff]  ;;  %v4571_v61 = vld [vmem:[#allocation7 + $0x8] sm:$0xff] }
 0x54a   :  { %6189 = vmatmul.mubr.msk.f32.gmra.mrb[74].mxu0 %vm3735_vm9, %v3598_v51  ;;  %7548 = vmatpush3.bf16.msra.mxu1 %v7547_v31  ;;  %v4588_v31 = vld [vmem:[#allocation7 + $0x90] sm:$0xff] }
 0x54b   :  { %6194 = vmatmul.mubr.msk.f32.gmra.mrb[110].mxu1 %vm3735_vm9, %v3598_v51  ;;  %4551 = vmatprep.mubr.f32.mxu0 %v11390_v63  ;;  %v7577_v23 = vpack.c.bf16 %v4589_v24, %v4588_v31 }
 0x54c   :  { %7550 = vmatprep.subr.bf16.mxu1 %v7549_v22  ;;  %v7575_v22 = vpack.c.bf16 %v4571_v61, %v4570_v12  ;;  %v4835_v12 = vld [vmem:[#allocation7 + $0x288] sm:$0xff] }
 0x54e   :  { %7552 = vmatpush3.bf16.msra.mxu1 %v7551_v52  ;;  %v4573_v52 = vld [vmem:[#allocation7 + $0x18] sm:$0xff] }
 0x54f   :  { %7554 = vmatprep.subr.bf16.mxu1 %v7553_v14  ;;  %v4591_v14 = vld [vmem:[#allocation7 + $0xa8] sm:$0xff]  ;;  %v7579_v16 = vpack.c.bf16 %v4573_v52, %v4572_v43 }
 0x550   :  { %v7581_v47 = vpack.c.bf16 %v4591_v14, %v4590_v48 }
 0x552   :  { %7556 = vmatpush3.bf16.msra.mxu1 %v7555_v32  ;;  %v4575_v32 = vld [vmem:[#allocation7 + $0x28] sm:$0xff] }
 0x553   :  { %7558 = vmatprep.subr.bf16.mxu1 %v7557_v4  ;;  %v4592_v4 = vld [vmem:[#allocation7 + $0xb0] sm:$0xff]  ;;  %v7583_v56 = vpack.c.bf16 %v4575_v32, %v4574_v21 }
 0x554   :  { %v7585_v40 = vpack.c.bf16 %v4593_v10, %v4592_v4 }
 0x556   :  { %7560 = vmatpush3.bf16.msra.mxu1 %v7559_v20  ;;  %v4576_v20 = vld [vmem:[#allocation7 + $0x30] sm:$0xff] }
 0x557   :  { %7562 = vmatprep.subr.bf16.mxu1 %v7561_v30  ;;  %v4577_v30 = vld [vmem:[#allocation7 + $0x38] sm:$0xff] }
 0x55a   :  { %7564 = vmatpush3.bf16.msra.mxu1 %v7563_v50  ;;  %v7587_v50 = vpack.c.bf16 %v4577_v30, %v4576_v20 }
 0x60d   :  { %v4007_v36 = vpop.f32.mrb[66].mxu0 }
 0x60e   :  { %v4428_v25 = vpop.f32.mrb[102].mxu1  ;;  %v4009_v9 = vpop.f32.mrb[67].mxu0 }
 0x60f   :  { %v4457_v58 = vmax.f32 %v4007_v36, %v4428_v25  ;;  %v4430_v8 = vpop.f32.mrb[103].mxu1  ;;  %v7589_v36 = vpack.c.bf16 %v4595_v60, %v4594_v49  ;;  %v4578_v25 = vld [vmem:[#allocation7 + $0x40] sm:$0xff]  ;;  %v4820_v49 = vld [vmem:[#allocation7 + $0x210] sm:$0xff]  ;;  %v4821_v60 = vld [vmem:[#allocation7 + $0x218] sm:$0xff] }
 0x610   :  { %v4458_v57 = vmax.f32 %v4009_v9, %v4430_v8  ;;  %v4596_v9 = vld [vmem:[#allocation7 + $0xd0] sm:$0xff]  ;;  %v4597_v8 = vld [vmem:[#allocation7 + $0xd8] sm:$0xff] }
 0x611   :  { %v4013_v27 = vpop.f32.mrb[68].mxu0 }
 0x612   :  { %v4434_v59 = vpop.f32.mrb[104].mxu1  ;;  %v4015_v41 = vpop.f32.mrb[69].mxu0 }
 0x613   :  { %v4459_v28 = vmax.f32 %v4013_v27, %v4434_v59  ;;  %v4436_v5 = vpop.f32.mrb[105].mxu1  ;;  %v7593_v27 = vpack.c.bf16 %v4597_v8, %v4596_v9  ;;  %v4580_v59 = vld [vmem:[#allocation7 + $0x50] sm:$0xff]  ;;  %v4838_v9 = vld [vmem:[#allocation7 + $0x2a0] sm:$0xff]  ;;  %v4839_v8 = vld [vmem:[#allocation7 + $0x2a8] sm:$0xff] }
 0x614   :  { %v4460_v17 = vmax.f32 %v4015_v41, %v4436_v5  ;;  %v4598_v41 = vld [vmem:[#allocation7 + $0xe0] sm:$0xff]  ;;  %v4599_v5 = vld [vmem:[#allocation7 + $0xe8] sm:$0xff] }
 0x615   :  { %v7535_v45 = vpack.c.bf16 %v4459_v28, %v4457_v58  ;;  %v4019_v18 = vpop.f32.mrb[70].mxu0  ;;  %v4579_v58 = vld [vmem:[#allocation7 + $0x48] sm:$0xff]  ;;  %v4581_v28 = vld [vmem:[#allocation7 + $0x58] sm:$0xff] }
 0x616   :  { %v7533_v1 = vpack.c.bf16 %v4460_v17, %v4458_v57  ;;  %v4440_v37 = vpop.f32.mrb[106].mxu1  ;;  %v4021_v35 = vpop.f32.mrb[71].mxu0  ;;  %v7591_v57 = vpack.c.bf16 %v4579_v58, %v4578_v25  ;;  %v7595_v17 = vpack.c.bf16 %v4581_v28, %v4580_v59  ;;  %v7611_v28 = vpack.c.bf16 %v4821_v60, %v4820_v49  ;;  %v5001_v49 = vld [vmem:[%s11293_s19 + $0x28] sm:$0xff]  ;;  %v5096_v60 = vld [vmem:[%s11294_s20 + $0x20] sm:$0xff] }
 0x617   :  { %v4461_v38 = vmax.f32 %v4019_v18, %v4440_v37  ;;  %v4442_v0 = vpop.f32.mrb[107].mxu1  ;;  %v4583_v18 = vld [vmem:[#allocation7 + $0x68] sm:$0xff]  ;;  %v4600_v37 = vld [vmem:[#allocation7 + $0xf0] sm:$0xff] }
 0x618   :  { %v4462_v13 = vmax.f32 %v4021_v35, %v4442_v0  ;;  %7534 = vmatprep.subr.bf16.mxu0 %v7533_v1  ;;  %v4582_v1 = vld [vmem:[#allocation7 + $0x60] sm:$0xff] }
 0x619   :  { %7536 = vmatpush1.bf16.msra.mxu0 %v7535_v45  ;;  %v4025_v11 = vpop.f32.mrb[72].mxu0  ;;  %v7597_v45 = vpack.c.bf16 %v4599_v5, %v4598_v41  ;;  %v7599_v35 = vpack.c.bf16 %v4583_v18, %v4582_v1  ;;  %v4823_v1 = vld [vmem:[#allocation7 + $0x228] sm:$0xff] }
 0x61a   :  { %v4446_v26 = vpop.f32.mrb[108].mxu1  ;;  %v4027_v46 = vpop.f32.mrb[73].mxu0 }
 0x61b   :  { %v4463_v44 = vmax.f32 %v4025_v11, %v4446_v26  ;;  %v4448_v3 = vpop.f32.mrb[109].mxu1  ;;  %v4585_v11 = vld [vmem:[#allocation7 + $0x78] sm:$0xff] }
 0x61c   :  { %v4464_v53 = vmax.f32 %v4027_v46, %v4448_v3  ;;  %v4632_v46 = vld [vmem:[#allocation7 + $0x1e8] sm:$0xff]  ;;  %v4615_v3 = vld [vmem:[#allocation7 + $0x160] sm:$0xff] }
 0x61d   :  { %v7539_v51 = vpack.c.bf16 %v4463_v44, %v4461_v38  ;;  %v4031_v6 = vpop.f32.mrb[74].mxu0  ;;  %v4601_v38 = vld [vmem:[#allocation7 + $0xf8] sm:$0xff]  ;;  %v4631_v44 = vld [vmem:[#allocation7 + $0x1e0] sm:$0xff] }
 0x61e   :  { %v7537_v34 = vpack.c.bf16 %v4464_v53, %v4462_v13  ;;  %v4452_v2 = vpop.f32.mrb[110].mxu1  ;;  %v4033_v7 = vpop.f32.mrb[75].mxu0  ;;  %v7601_v0 = vpack.c.bf16 %v4601_v38, %v4600_v37  ;;  %v4584_v13 = vld [vmem:[#allocation7 + $0x70] sm:$0xff]  ;;  %v7565_v53 = vpack.c.bf16 %v4632_v46, %v4631_v44  ;;  %v4841_v38 = vld [vmem:[#allocation7 + $0x2b8] sm:$0xff]  ;;  %v4843_v44 = vld [vmem:[#allocation7 + $0x2c8] sm:$0xff] }
 0x61f   :  { %v4465_v39 = vmax.f32 %v4031_v6, %v4452_v2  ;;  %v4454_v42 = vpop.f32.mrb[111].mxu1  ;;  %v7603_v26 = vpack.c.bf16 %v4585_v11, %v4584_v13  ;;  %v11391_v6 = vmov 0.0|0.0   ;;  %v4633_v2 = vld [vmem:[#allocation7 + $0x1f0] sm:$0xff]  ;;  %v4825_v11 = vld [vmem:[#allocation7 + $0x238] sm:$0xff] }
 0x620   :  { %v4466_v19 = vmax.f32 %v4033_v7, %v4454_v42  ;;  %7538 = vmatprep.subr.bf16.mxu0 %v7537_v34  ;;  %7566 = vmatprep.subr.bf16.mxu1 %v7565_v53  ;;  %v4617_v7 = vld [vmem:[#allocation7 + $0x170] sm:$0xff]  ;;  %v4826_v53 = vld [vmem:[#allocation7 + $0x240] sm:$0xff] }
 0x621   :  { %7540 = vmatpush1.bf16.msra.mxu0 %v7539_v51  ;;  %v4616_v51 = vld [vmem:[#allocation7 + $0x168] sm:$0xff]  ;;  %v7571_v54 = vpack.c.bf16 %v4618_v15, %v4617_v7  ;;  %v4840_v37 = vld [vmem:[#allocation7 + $0x2b0] sm:$0xff]  ;;  %v4829_v15 = vld [vmem:[#allocation7 + $0x258] sm:$0xff] }
 0x622   :  { %6195 = vmatprep.subr.msk.mxu0 %vm4480_vm10, %v4466_v19  ;;  %v7567_v34 = vpack.c.bf16 %v4616_v51, %v4615_v3  ;;  %v4834_v19 = vld [vmem:[#allocation7 + $0x280] sm:$0xff]  ;;  %v4824_v13 = vld [vmem:[#allocation7 + $0x230] sm:$0xff]  ;;  %v4827_v51 = vld [vmem:[#allocation7 + $0x248] sm:$0xff] }
 0x623   :  { %v7605_v61 = vpack.c.bf16 %v4835_v12, %v4834_v19  ;;  %v7619_v46 = vpack.c.bf16 %v4825_v11, %v4824_v13  ;;  %v4847_v19 = vld [vmem:[#allocation7 + $0x2e8] sm:$0xff]  ;;  %v5008_v11 = vld [vmem:[%s11293_s19 + $0x60] sm:$0xff] }
 0x624   :  { %7568 = vmatpush3.bf16.msra.mxu1 %v7567_v34  ;;  %v4844_v34 = vld [vmem:[#allocation7 + $0x2d0] sm:$0xff] }
 0x625   :  { %6196 = vmatpush1.msk.msra.mxu0 %vm4480_vm10, %v4465_v39  ;;  %v4634_v39 = vld [vmem:[#allocation7 + $0x1f8] sm:$0xff] }
 0x626   :  { %6197 = vmatmul.mubr.msk.f32.vlgmr.msra.gmra.mrb[76].mxu0 %vm4470_vm11, %v4467_v55  ;;  %7574 = vmatprep.subr.bf16.mxu0 %v7573_v62  ;;  %v7569_v42 = vpack.c.bf16 %v4634_v39, %v4633_v2  ;;  %v4818_v55 = vld [vmem:[#allocation7 + $0x200] sm:$0xff]  ;;  %v4845_v2 = vld [vmem:[#allocation7 + $0x2d8] sm:$0xff]  ;;  %v7623_v39 = vpack.c.bf16 %v4827_v51, %v4826_v53  ;;  %v5010_v53 = vld [vmem:[%s11293_s19 + $0x70] sm:$0xff] }
 0x627   :  { %4557 = vmatprep.mubr.f32.mxu0 %v11390_v63  ;;  %7576 = vmatpush3.bf16.msra.mxu0 %v7575_v22  ;;  %v4819_v22 = vld [vmem:[#allocation7 + $0x208] sm:$0xff]  ;;  %v7625_v7 = vpack.c.bf16 %v4845_v2, %v4844_v34  ;;  %v5011_v51 = vld [vmem:[%s11293_s19 + $0x78] sm:$0xff]  ;;  %v5106_v2 = vld [vmem:[%s11294_s20 + $0x70] sm:$0xff] }
 0x628   :  { %7578 = vmatprep.subr.bf16.mxu0 %v7577_v23  ;;  %7570 = vmatprep.subr.bf16.mxu1 %v7569_v42  ;;  %v4836_v23 = vld [vmem:[#allocation7 + $0x290] sm:$0xff] }
 0x629   :  { %7572 = vmatpush3.bf16.msra.mxu1 %v7571_v54  ;;  %v4828_v42 = vld [vmem:[#allocation7 + $0x250] sm:$0xff]  ;;  %v4846_v54 = vld [vmem:[#allocation7 + $0x2e0] sm:$0xff] }
 0x62a   :  { %6198 = vmatmul.mubr.msk.f32.gmra.mrb[78].mxu0 %vm4470_vm11, %v4468_v29  ;;  %7606 = vmatprep.subr.bf16.mxu1 %v7605_v61  ;;  %v7627_v12 = vpack.c.bf16 %v4829_v15, %v4828_v42  ;;  %v7629_v61 = vpack.c.bf16 %v4847_v19, %v4846_v54 }
 0x62b   :  { %4563 = vmatprep.mubr.f32.mxu0 %v11390_v63  ;;  %7580 = vmatpush3.bf16.msra.mxu0 %v7579_v16  ;;  %v4837_v16 = vld [vmem:[#allocation7 + $0x298] sm:$0xff] }
 0x62c   :  { %7582 = vmatprep.subr.bf16.mxu0 %v7581_v47  ;;  %v7609_v30 = vpack.c.bf16 %v4837_v16, %v4836_v23  ;;  %v5092_v16 = vld [vmem:[%s11294_s20] sm:$0xff] }
 0x62e   :  { %6199 = vmatmul.mubr.msk.f32.gmra.mrb[80].mxu0 %vm4470_vm11, %v4469_v33  ;;  %v7607_v33 = vpack.c.bf16 %v4819_v22, %v4818_v55  ;;  %v4849_v55 = vld [vmem:[#allocation7 + $0x2f8] sm:$0xff] }
 0x62f   :  { %7584 = vmatpush3.bf16.msra.mxu0 %v7583_v56 }
 0x630   :  { %7586 = vmatprep.subr.bf16.mxu0 %v7585_v40 }
 0x633   :  { %7588 = vmatpush3.bf16.msra.mxu0 %v7587_v50 }
 0x634   :  { %7590 = vmatprep.subr.bf16.mxu0 %v7589_v36 }
 0x637   :  { %7592 = vmatpush3.bf16.msra.mxu0 %v7591_v57 }
 0x638   :  { %7594 = vmatprep.subr.bf16.mxu0 %v7593_v27 }
 0x63b   :  { %7596 = vmatpush3.bf16.msra.mxu0 %v7595_v17  ;;  %v7613_v17 = vpack.c.bf16 %v4839_v8, %v4838_v9  ;;  %v5003_v9 = vld [vmem:[%s11293_s19 + $0x38] sm:$0xff]  ;;  %v5098_v8 = vld [vmem:[%s11294_s20 + $0x30] sm:$0xff] }
 0x63c   :  { %7598 = vmatprep.subr.bf16.mxu0 %v7597_v45  ;;  %v4822_v45 = vld [vmem:[#allocation7 + $0x220] sm:$0xff] }
 0x63f   :  { %7600 = vmatpush3.bf16.msra.mxu0 %v7599_v35  ;;  %v7615_v35 = vpack.c.bf16 %v4823_v1, %v4822_v45  ;;  %v5101_v45 = vld [vmem:[%s11294_s20 + $0x48] sm:$0xff] }
 0x640   :  { %7602 = vmatprep.subr.bf16.mxu0 %v7601_v0  ;;  %v7617_v0 = vpack.c.bf16 %v4841_v38, %v4840_v37  ;;  %v5007_v37 = vld [vmem:[%s11293_s19 + $0x58] sm:$0xff]  ;;  %v5102_v38 = vld [vmem:[%s11294_s20 + $0x50] sm:$0xff] }
 0x643   :  { %7604 = vmatpush3.bf16.msra.mxu0 %v7603_v26  ;;  %v4842_v26 = vld [vmem:[#allocation7 + $0x2c0] sm:$0xff] }
 0x644   :  { %7637 = vmatprep.subr.bf16.mxu0 %v11391_v6  ;;  %v7621_v3 = vpack.c.bf16 %v4843_v44, %v4842_v26  ;;  %v5009_v26 = vld [vmem:[%s11293_s19 + $0x68] sm:$0xff]  ;;  %v5104_v44 = vld [vmem:[%s11294_s20 + $0x60] sm:$0xff] }
 0x6f9   :  { %v4553_v31 = vpop.f32.mrb[76].mxu0 }
 0x6fa   :  { %v4555_v24 = vpop.f32.mrb[77].mxu0  ;;  %v4641_v43 = vrot.slane %v4553_v31, 1  ;;  %v4850_v52 = vrot.slane %v4553_v31, 2 }
 0x6fb   :  { %4801 = vmatprep.mubr.f32.mxu0 %v4555_v24  ;;  %v4644_v47 = vrot.slane %v4555_v24, 1  ;;  %v4853_v21 = vrot.slane %v4555_v24, 2  ;;  %v4831_v24 = vld [vmem:[#allocation7 + $0x268] sm:$0xff] }
 0x6fc   :  { %4802 = vmatmul.mubr.f32.vlgmr.msra.gmra.mrb[82].mxu0 %v4553_v31  ;;  %v4830_v31 = vld [vmem:[#allocation7 + $0x260] sm:$0xff] }
 0x6fd   :  { %v4559_v62 = vpop.f32.mrb[78].mxu0  ;;  %v7631_v22 = vpack.c.bf16 %v4831_v24, %v4830_v31 }
 0x6fe   :  { %v4642_v48 = vrot.slane %v4559_v62, 1  ;;  %v4851_v14 = vrot.slane %v4559_v62, 2  ;;  %v4561_v29 = vpop.f32.mrb[79].mxu0 }
 0x6ff   :  { %v4645_v32 = vrot.slane %v4561_v29, 1  ;;  %v4854_v4 = vrot.slane %v4561_v29, 2  ;;  %4806 = vmatprep.mubr.f32.mxu0 %v4561_v29  ;;  %v4997_v29 = vld [vmem:[%s11293_s19 + $0x8] sm:$0xff] }
 0x700   :  { %4807 = vmatmul.mubr.f32.gmra.mrb[84].mxu0 %v4559_v62  ;;  %v4643_v10 = vsel %vm168_vm3, %v4641_v43, %v4642_v48  ;;  %v10926_v56 = vsel %vm716_vm2, %v4850_v52, %v4851_v14  ;;  %v4848_v62 = vld [vmem:[#allocation7 + $0x2f0] sm:$0xff]  ;;  %v4833_v52 = vld [vmem:[#allocation7 + $0x278] sm:$0xff] }
 0x701   :  { %v10928_v40 = vpop.f32.mrb[80].mxu0  ;;  %v4646_v20 = vsel %vm168_vm3, %v4644_v47, %v4645_v32  ;;  %v4855_v50 = vsel %vm716_vm2, %v4853_v21, %v4854_v4  ;;  %v7633_v23 = vpack.c.bf16 %v4849_v55, %v4848_v62  ;;  %v4832_v43 = vld [vmem:[#allocation7 + $0x270] sm:$0xff]  ;;  %v5093_v21 = vld [vmem:[%s11294_s20 + $0x8] sm:$0xff] }
 0x702   :  { %v4647_v36 = vrot.slane %v10928_v40, 1  ;;  %v4856_v25 = vrot.slane %v10928_v40, 2  ;;  %v10934_v58 = vpop.f32.mrb[81].mxu0  ;;  %4721 = vmatprep.mubr.f32.mxu1 %v4646_v20 }
 0x703   :  { %v4649_v57 = vrot.slane %v10934_v58, 1  ;;  %v4858_v27 = vrot.slane %v10934_v58, 2  ;;  %4722 = vmatmul.mubr.f32.vlgmr.msra.gmra.mrb[112].mxu1 %v4643_v10  ;;  %4811 = vmatprep.mubr.f32.mxu0 %v10934_v58  ;;  %v7662_v10 = vpack.c.bf16 %v5093_v21, %v5092_v16  ;;  %v5002_v58 = vld [vmem:[%s11293_s19 + $0x30] sm:$0xff] }
 0x704   :  { %7608 = vmatpush3.bf16.msra.mxu1 %v7607_v33  ;;  %v4648_v59 = vsel %vm168_vm3, %v4642_v48, %v4647_v36  ;;  %4812 = vmatmul.mubr.f32.gmra.mrb[86].mxu0 %v10928_v40  ;;  %v4857_v41 = vsel %vm716_vm2, %v4851_v14, %v4856_v25  ;;  %v7635_v48 = vpack.c.bf16 %v4833_v52, %v4832_v43  ;;  %v4996_v14 = vld [vmem:[%s11293_s19] sm:$0xff]  ;;  %v5094_v33 = vld [vmem:[%s11294_s20 + $0x10] sm:$0xff] }
 0x705   :  { %v4650_v5 = vsel %vm168_vm3, %v4645_v32, %v4649_v57  ;;  %7610 = vmatprep.subr.bf16.mxu1 %v7609_v30  ;;  %v4859_v18 = vsel %vm716_vm2, %v4854_v4, %v4858_v27  ;;  %6641 = vmatprep.mubr.msk.f32.mxu0 %vm8010_vm0, %v11390_v63  ;;  %v7638_v47 = vpack.c.bf16 %v4997_v29, %v4996_v14  ;;  %v4998_v32 = vld [vmem:[%s11293_s19 + $0x10] sm:$0xff]  ;;  %v4999_v4 = vld [vmem:[%s11293_s19 + $0x18] sm:$0xff]  ;;  %v5000_v30 = vld [vmem:[%s11293_s19 + $0x20] sm:$0xff] }
 0x706   :  { %4726 = vmatprep.mubr.f32.mxu1 %v4650_v5  ;;  %v7641_v40 = vpack.c.bf16 %v4999_v4, %v4998_v32  ;;  %v5100_v5 = vld [vmem:[%s11294_s20 + $0x40] sm:$0xff] }
 0x707   :  { %4727 = vmatmul.mubr.f32.gmra.mrb[114].mxu1 %v4648_v59  ;;  %7639 = vmatpush3.bf16.msra.mxu0 %v7638_v47  ;;  %v7674_v1 = vpack.c.bf16 %v5101_v45, %v5100_v5 }
 0x708   :  { %7612 = vmatpush3.bf16.msra.mxu1 %v7611_v28  ;;  %4731 = vmatprep.mubr.f32.mxu1 %v4649_v57  ;;  %v7647_v57 = vpack.c.bf16 %v5003_v9, %v5002_v58  ;;  %v5004_v28 = vld [vmem:[%s11293_s19 + $0x40] sm:$0xff] }
 0x709   :  { %7614 = vmatprep.subr.bf16.mxu1 %v7613_v17  ;;  %7640 = vmatprep.subr.bf16.mxu0 %v11391_v6 }
 0x70b   :  { %4732 = vmatmul.mubr.f32.gmra.mrb[116].mxu1 %v4647_v36  ;;  %7642 = vmatpush3.bf16.msra.mxu0 %v7641_v40  ;;  %v5097_v36 = vld [vmem:[%s11294_s20 + $0x28] sm:$0xff]  ;;  %v6200_v40 = vld [vmem:[%s11290_s16] ss:$0 sm:$0xff] }
 0x70c   :  { %7616 = vmatpush3.bf16.msra.mxu1 %v7615_v35  ;;  %4930 = vmatprep.mubr.f32.mxu1 %v4855_v50  ;;  %v7644_v50 = vpack.c.bf16 %v5001_v49, %v5000_v30 }
 0x70d   :  { %7618 = vmatprep.subr.bf16.mxu1 %v7617_v0  ;;  %7643 = vmatprep.subr.bf16.mxu0 %v11391_v6  ;;  %v5103_v0 = vld [vmem:[%s11294_s20 + $0x58] sm:$0xff] }
 0x70e   :  { %v7677_v13 = vpack.c.bf16 %v5103_v0, %v5102_v38 }
 0x70f   :  { %7645 = vmatpush3.bf16.msra.mxu0 %v7644_v50 }
 0x710   :  { %7620 = vmatpush3.bf16.msra.mxu1 %v7619_v46  ;;  %7646 = vmatprep.subr.bf16.mxu0 %v11391_v6  ;;  %v7656_v46 = vpack.c.bf16 %v5009_v26, %v5008_v11 }
 0x711   :  { %7622 = vmatprep.subr.bf16.mxu1 %v7621_v3  ;;  %v5105_v3 = vld [vmem:[%s11294_s20 + $0x68] sm:$0xff] }
 0x712   :  { %v7680_v34 = vpack.c.bf16 %v5105_v3, %v5104_v44 }
 0x713   :  { %7648 = vmatpush3.bf16.msra.mxu0 %v7647_v57 }
 0x714   :  { %7624 = vmatpush3.bf16.msra.mxu1 %v7623_v39  ;;  %7649 = vmatprep.subr.bf16.mxu0 %v11391_v6  ;;  %v5107_v39 = vld [vmem:[%s11294_s20 + $0x78] sm:$0xff] }
 0x715   :  { %7626 = vmatprep.subr.bf16.mxu1 %v7625_v7  ;;  %v7659_v7 = vpack.c.bf16 %v5011_v51, %v5010_v53  ;;  %v7683_v42 = vpack.c.bf16 %v5107_v39, %v5106_v2  ;;  %v6208_v51 = vld [vmem:[%s11296_s22 + $0x40] sm:$0xff]  ;;  %v6210_v39 = vld [vmem:[%s11296_s22 + $0x50] sm:$0xff] }
 0x718   :  { %7628 = vmatpush3.bf16.msra.mxu1 %v7627_v12 }
 0x719   :  { %7630 = vmatprep.subr.bf16.mxu1 %v7629_v61 }
 0x71c   :  { %7632 = vmatpush3.bf16.msra.mxu1 %v7631_v22 }
 0x71d   :  { %7634 = vmatprep.subr.bf16.mxu1 %v7633_v23 }
 0x720   :  { %7636 = vmatpush3.bf16.msra.mxu1 %v7635_v48 }
 0x721   :  { %7661 = vmatprep.subr.bf16.mxu1 %v11391_v6 }
 0x723   :  { %4931 = vmatmul.mubr.f32.vlgmr.msra.gmra.mrb[118].mxu1 %v10926_v56  ;;  %v5095_v56 = vld [vmem:[%s11294_s20 + $0x18] sm:$0xff] }
 0x724   :  { %4935 = vmatprep.mubr.f32.mxu1 %v4859_v18  ;;  %7663 = vmatpush3.bf16.msra.mxu1 %v7662_v10  ;;  %v7665_v20 = vpack.c.bf16 %v5095_v56, %v5094_v33  ;;  %v5006_v18 = vld [vmem:[%s11293_s19 + $0x50] sm:$0xff] }
 0x725   :  { %7664 = vmatprep.subr.bf16.mxu1 %v11391_v6  ;;  %v7653_v35 = vpack.c.bf16 %v5007_v37, %v5006_v18 }
 0x727   :  { %4936 = vmatmul.mubr.f32.gmra.mrb[120].mxu1 %v4857_v41  ;;  %v5005_v41 = vld [vmem:[%s11293_s19 + $0x48] sm:$0xff] }
 0x728   :  { %4940 = vmatprep.mubr.f32.mxu1 %v4858_v27  ;;  %7666 = vmatpush3.bf16.msra.mxu1 %v7665_v20  ;;  %v5099_v27 = vld [vmem:[%s11294_s20 + $0x38] sm:$0xff]  ;;  %v7650_v17 = vpack.c.bf16 %v5005_v41, %v5004_v28  ;;  %v6202_v28 = vld [vmem:[%s11292_s18] ss:$0 sm:$0xff] }
 0x729   :  { %7667 = vmatprep.subr.bf16.mxu1 %v11391_v6  ;;  %v7671_v59 = vpack.c.bf16 %v5099_v27, %v5098_v8 }
 0x72a   :  { %7651 = vmatpush3.bf16.msra.mxu0 %v7650_v17 }
 0x72b   :  { %4941 = vmatmul.mubr.f32.gmra.mrb[122].mxu1 %v4856_v25  ;;  %v7668_v25 = vpack.c.bf16 %v5097_v36, %v5096_v60  ;;  %7652 = vmatprep.subr.bf16.mxu0 %v11391_v6  ;;  %v6201_v36 = vld [vmem:[%s11291_s17] ss:$0 sm:$0xff] }
 0x72c   :  { %6682 = vmatprep.mubr.msk.f32.mxu1 %vm8010_vm0, %v11390_v63 }
 0x72d   :  { %7669 = vmatpush3.bf16.msra.mxu1 %v7668_v25 }
 0x72e   :  { %7670 = vmatprep.subr.bf16.mxu1 %v11391_v6  ;;  %7654 = vmatpush3.bf16.msra.mxu0 %v7653_v35 }
 0x72f   :  { %7655 = vmatprep.subr.bf16.mxu0 %v11391_v6 }
 0x731   :  { %7672 = vmatpush3.bf16.msra.mxu1 %v7671_v59 }
 0x732   :  { %7673 = vmatprep.subr.bf16.mxu1 %v11391_v6  ;;  %7657 = vmatpush3.bf16.msra.mxu0 %v7656_v46 }
 0x733   :  { %7658 = vmatprep.subr.bf16.mxu0 %v11391_v6 }
 0x735   :  { %7675 = vmatpush3.bf16.msra.mxu1 %v7674_v1 }
 0x736   :  { %7676 = vmatprep.subr.bf16.mxu1 %v11391_v6  ;;  %7660 = vmatpush3.bf16.msra.mxu0 %v7659_v7  ;;  %v6211_v7 = vld [vmem:[%s11296_s22 + $0x58] sm:$0xff] }
 0x737   :  { %7685 = vmatprep.subr.bf16.mxu0 %v11391_v6 }
 0x739   :  { %7678 = vmatpush3.bf16.msra.mxu1 %v7677_v13 }
 0x73a   :  { %7679 = vmatprep.subr.bf16.mxu1 %v11391_v6 }
 0x73d   :  { %7681 = vmatpush3.bf16.msra.mxu1 %v7680_v34  ;;  %v6209_v34 = vld [vmem:[%s11296_s22 + $0x48] sm:$0xff] }
 0x73e   :  { %7682 = vmatprep.subr.bf16.mxu1 %v11391_v6  ;;  %v7692_v2 = vpack.c.bf16 %v6209_v34, %v6208_v51  ;;  %v6227_v34 = vld [vmem:[%s11296_s22 + $0xb0] sm:$0xff] }
 0x741   :  { %7684 = vmatpush3.bf16.msra.mxu1 %v7683_v42  ;;  %v7695_v42 = vpack.c.bf16 %v6211_v7, %v6210_v39  ;;  %v6237_v7 = vld [vmem:[%s11296_s22 + $0xe0] sm:$0xff] }
 0x742   :  { %7691 = vmatprep.subr.bf16.mxu1 %v11391_v6 }
 0x7cf   :  { %v6358_v15 = vpop.f32.mrb[82].mxu0 }
 0x7d0   :  { %v6359_v54 = vpop.f32.mrb[83].mxu0 }
 0x7d1   :  { %v6360_v19 = vadd.f32 %v6359_v54, %v6358_v15  ;;  %v6212_v15 = vld [vmem:[%s11296_s22 + $0x60] sm:$0xff]  ;;  %v6213_v54 = vld [vmem:[%s11296_s22 + $0x68] sm:$0xff] }
 0x7d3   :  { %v6361_v12 = vpop.f32.mrb[84].mxu0 }
 0x7d4   :  { %v6362_v61 = vpop.f32.mrb[85].mxu0 }
 0x7d5   :  { %v6363_v31 = vadd.f32 %v6362_v61, %v6361_v12  ;;  %v6214_v12 = vld [vmem:[%s11296_s22 + $0x70] sm:$0xff]  ;;  %v6215_v61 = vld [vmem:[%s11296_s22 + $0x78] sm:$0xff] }
 0x7d6   :  { %v6317_v24 = vpop.f32.mrb[112].mxu1 }
 0x7d7   :  { %v6318_v62 = vpop.f32.mrb[113].mxu1  ;;  %v6364_v55 = vpop.f32.mrb[86].mxu0 }
 0x7d8   :  { %v6319_v22 = vadd.f32 %v6318_v62, %v6317_v24  ;;  %v6365_v23 = vpop.f32.mrb[87].mxu0 }
 0x7d9   :  { %v6366_v43 = vadd.f32 %v6365_v23, %v6364_v55 }
 0x7da   :  { %v4804_v52 = vadd.f32 %v6360_v19, %v6319_v22  ;;  %v6320_v48 = vpop.f32.mrb[114].mxu1  ;;  %v7698_v19 = vpack.c.bf16 %v6213_v54, %v6212_v15  ;;  %v6239_v15 = vld [vmem:[%s11296_s22 + $0xf0] sm:$0xff]  ;;  %v6240_v54 = vld [vmem:[%s11296_s22 + $0xf8] sm:$0xff] }
 0x7db   :  { %v6321_v14 = vpop.f32.mrb[115].mxu1 }
 0x7dc   :  { %v6322_v29 = vadd.f32 %v6321_v14, %v6320_v48 }
 0x7de   :  { %v4809_v16 = vadd.f32 %v6363_v31, %v6322_v29  ;;  %v6323_v47 = vpop.f32.mrb[116].mxu1  ;;  %v7701_v31 = vpack.c.bf16 %v6215_v61, %v6214_v12 }
 0x7df   :  { %v6324_v21 = vpop.f32.mrb[117].mxu1 }
 0x7e0   :  { %v6325_v32 = vadd.f32 %v6324_v21, %v6323_v47 }
 0x7e2   :  { %v4814_v4 = vadd.f32 %v6366_v43, %v6325_v32 }
 0x7f6   :  { %v6399_v10 = vpop.f32.mrb[118].mxu1 }
 0x7f7   :  { %v6400_v33 = vpop.f32.mrb[119].mxu1 }
 0x7f8   :  { %v6401_v56 = vadd.f32 %v6400_v33, %v6399_v10  ;;  %v5191_v33 = vld [vmem:[%s11295_s21] sm:$0x3] }
 0x7fa   :  { %v4946_v20 = vadd.f32 %v6401_v56, %v4804_v52  ;;  %v6402_v30 = vpop.f32.mrb[120].mxu1  ;;  %v5270_v56 = vld [vmem:[%s11296_s22] sm:$0xff] }
 0x7fb   :  { %v6403_v49 = vpop.f32.mrb[121].mxu1 }
 0x7fc   :  { %v4956_v60 = vadd.f32 %v6200_v40, %v4946_v20  ;;  %v6404_v50 = vadd.f32 %v6403_v49, %v6402_v30  ;;  %v6205_v20 = vld [vmem:[%s11295_s21 + $0x2] sm:$0x3]  ;;  %v5272_v49 = vld [vmem:[%s11296_s22 + $0x10] sm:$0xff] }
 0x7fe   :  { %v4959_v25 = vmax.f32 %v4956_v60, 0.0  ;;  %v4947_v58 = vadd.f32 %v6404_v50, %v4809_v16  ;;  %v6405_v9 = vpop.f32.mrb[122].mxu1  ;;  %v5273_v60 = vld [vmem:[%s11296_s22 + $0x18] sm:$0xff] }
 0x7ff   :  { %v6406_v8 = vpop.f32.mrb[123].mxu1  ;;  %v7707_v50 = vpack.c.bf16 %v5273_v60, %v5272_v49 }
 0x800   :  { %v4969_v57 = vmul.f32 %v6201_v36, %v4959_v25  ;;  %v4957_v27 = vadd.f32 %v6200_v40, %v4947_v58  ;;  %v6407_v59 = vadd.f32 %v6406_v8, %v6405_v9  ;;  %v5275_v25 = vld [vmem:[%s11296_s22 + $0x28] sm:$0xff]  ;;  %v5276_v9 = vld [vmem:[%s11296_s22 + $0x30] sm:$0xff]  ;;  %v5277_v8 = vld [vmem:[%s11296_s22 + $0x38] sm:$0xff] }
 0x802   :  { %v4960_v41 = vmax.f32 %v4957_v27, 0.0  ;;  %v4948_v5 = vadd.f32 %v6407_v59, %v4814_v4  ;;  %v4979_v17 = vadd.f32 %v6202_v28, %v4969_v57  ;;  %v7713_v57 = vpack.c.bf16 %v5277_v8, %v5276_v9  ;;  %v6221_v27 = vld [vmem:[%s11296_s22 + $0x80] sm:$0xff]  ;;  %v6222_v59 = vld [vmem:[%s11296_s22 + $0x88] sm:$0xff] }
 0x804   :  { %v4970_v45 = vmul.f32 %v6201_v36, %v4960_v41  ;;  %v4958_v1 = vadd.f32 %v6200_v40, %v4948_v5  ;;  %v4985_v38 = vrot.slane %v4979_v17, 1  ;;  %v5271_v40 = vld [vmem:[%s11296_s22 + $0x8] sm:$0xff]  ;;  %v6223_v41 = vld [vmem:[%s11296_s22 + $0x90] sm:$0xff]  ;;  %v6224_v5 = vld [vmem:[%s11296_s22 + $0x98] sm:$0xff] }
 0x805   :  { %v7704_v30 = vpack.c.bf16 %v5271_v40, %v5270_v56 }
 0x806   :  { %v4980_v18 = vadd.f32 %v6202_v28, %v4970_v45  ;;  %v4961_v37 = vmax.f32 %v4958_v1, 0.0  ;;  %v7722_v1 = vpack.c.bf16 %v6224_v5, %v6223_v41 }
 0x808   :  { %v4986_v35 = vrot.slane %v4980_v18, 1  ;;  %v4971_v0 = vmul.f32 %v6201_v36, %v4961_v37  ;;  %v5274_v36 = vld [vmem:[%s11296_s22 + $0x20] sm:$0xff]  ;;  %v6226_v37 = vld [vmem:[%s11296_s22 + $0xa8] sm:$0xff] }
 0x809   :  { %v7710_v58 = vpack.c.bf16 %v5275_v25, %v5274_v36 }
 0x80a   :  { %v4981_v13 = vadd.f32 %v6202_v28, %v4971_v0  ;;  %v4987_v11 = vsel %vm168_vm3, %v4985_v38, %v4986_v35  ;;  %v7719_v28 = vpack.c.bf16 %v6222_v59, %v6221_v27 }
 0x80b   :  { %v4993_v26 = vmax.f32 %v4979_v17, %v4987_v11  ;;  %v6233_v11 = vld [vmem:[%s11296_s22 + $0xc0] sm:$0xff] }
 0x80c   :  { %v4988_v44 = vrot.slane %v4981_v13, 1 }
 0x80d   :  { %6642 = vmatmul.mubr.f32.vlgmr.msra.gmra.mrb[88].mxu0 %v4993_v26  ;;  %6683 = vmatmul.mubr.f32.vlgmr.msra.gmra.mrb[124].mxu1 %v4993_v26  ;;  %v6234_v26 = vld [vmem:[%s11296_s22 + $0xc8] sm:$0xff] }
 0x80e   :  { %6644 = vmatprep.mubr.msk.f32.mxu0 %vm8010_vm0, %v11390_v63  ;;  %6685 = vmatprep.mubr.msk.f32.mxu1 %vm8010_vm0, %v11390_v63  ;;  %v4989_v46 = vsel %vm168_vm3, %v4986_v35, %v4988_v44  ;;  %v4995_v53 = vmax.f32 %v4981_v13, %v4988_v44  ;;  %v6218_v13 = vld [vmem:[%s11295_s21 + $0x4] sm:$0x3]  ;;  %v6230_v44 = vld [vmem:[%s11295_s21 + $0x6] sm:$0x3] }
 0x80f   :  { %v4994_v3 = vmax.f32 %v4980_v18, %v4989_v46  ;;  %7693 = vmatpush3.bf16.msra.mxu1 %v7692_v2  ;;  %v6225_v18 = vld [vmem:[%s11296_s22 + $0xa0] sm:$0xff]  ;;  %v7734_v46 = vpack.c.bf16 %v6234_v26, %v6233_v11  ;;  %v6228_v2 = vld [vmem:[%s11296_s22 + $0xb8] sm:$0xff] }
 0x810   :  { %7694 = vmatprep.subr.bf16.mxu1 %v11391_v6  ;;  %v7725_v35 = vpack.c.bf16 %v6226_v37, %v6225_v18  ;;  %v7728_v39 = vpack.c.bf16 %v6228_v2, %v6227_v34 }
 0x811   :  { %6645 = vmatmul.mubr.f32.gmra.mrb[90].mxu0 %v4994_v3  ;;  %6686 = vmatmul.mubr.f32.gmra.mrb[126].mxu1 %v4994_v3  ;;  %v6235_v3 = vld [vmem:[%s11296_s22 + $0xd0] sm:$0xff] }
 0x812   :  { %6647 = vmatprep.mubr.msk.f32.mxu0 %vm8010_vm0, %v11390_v63  ;;  %6688 = vmatprep.mubr.msk.f32.mxu1 %vm8010_vm0, %v11390_v63 }
 0x813   :  { %7696 = vmatpush3.bf16.msra.mxu1 %v7695_v42 }
 0x814   :  { %7697 = vmatprep.subr.bf16.mxu1 %v11391_v6 }
 0x815   :  { %6648 = vmatmul.mubr.f32.gmra.mrb[92].mxu0 %v4995_v53  ;;  %6689 = vmatmul.mubr.f32.gmra.mrb[128].mxu1 %v4995_v53  ;;  %v6236_v53 = vld [vmem:[%s11296_s22 + $0xd8] sm:$0xff] }
 0x816   :  { %6697 = vmatprep.mubr.msk.f32.mxu0 %vm8010_vm0, %v11390_v63  ;;  %6725 = vmatprep.mubr.msk.f32.mxu1 %vm8010_vm0, %v11390_v63  ;;  %v7737_v51 = vpack.c.bf16 %v6236_v53, %v6235_v3 }
 0x817   :  { %7699 = vmatpush3.bf16.msra.mxu1 %v7698_v19  ;;  %v7743_v19 = vpack.c.bf16 %v6240_v54, %v6239_v15 }
 0x818   :  { %7700 = vmatprep.subr.bf16.mxu1 %v11391_v6 }
 0x81b   :  { %7702 = vmatpush3.bf16.msra.mxu1 %v7701_v31 }
 0x81c   :  { %7715 = vmatprep.subr.bf16.mxu1 %v11391_v6 }
 0x8e0   :  { %v5078_v24 = vpop.f32.mrb[88].mxu0  ;;  %v5174_v62 = vpop.f32.mrb[124].mxu1 }
 0x8e1   :  { %v5188_v55 = vmax.f32 %v5078_v24, %v5174_v62  ;;  %v6643_v22 = vpop.f32.mrb[89].mxu0  ;;  %v6684_v23 = vpop.f32.mrb[125].mxu1 }
 0x8e4   :  { %v5083_v43 = vpop.f32.mrb[90].mxu0  ;;  %v5179_v52 = vpop.f32.mrb[126].mxu1 }
 0x8e5   :  { %v5189_v48 = vmax.f32 %v5083_v43, %v5179_v52  ;;  %v6646_v14 = vpop.f32.mrb[91].mxu0  ;;  %v6687_v29 = vpop.f32.mrb[127].mxu1 }
 0x8e7   :  { %v11121_v16 = vpack.c.bf16 %v5189_v48, %v5188_v55 }
 0x8e8   :  { %v5088_v47 = vpop.f32.mrb[92].mxu0  ;;  %v5184_v21 = vpop.f32.mrb[128].mxu1 }
 0x8e9   :  { %v11123_v32 = vmax.f32 %v5088_v47, %v5184_v21  ;;  %v6649_v4 = vpop.f32.mrb[93].mxu0  ;;  %v6690_v10 = vpop.f32.mrb[129].mxu1  ;;  %7687 = vmatpush3.bf16.msra.mxu0 %v11121_v16 }
 0x8ea   :  { %6695 = vmatprep.subr.mxu0 %v11390_v63 }
 0x8ed   :  { %6696 = vmatpush3.msk.msra.mxu0 %vm5196_vm12, %v11123_v32 }
 0x8ee   :  { %7688 = vmatprep.subr.bf16.mxu0 %v11391_v6  ;;  %6698 = vmatmul.mubr.msk.f32.vlgmr.msra.gmra.mrb[94].mxu0 %vm5192_vm13, %v5191_v33 }
 0x8ef   :  { %7690 = vmatpush3.bf16.msra.mxu0 %v11121_v16  ;;  %6706 = vmatprep.mubr.msk.f32.mxu0 %vm8010_vm0, %v11390_v63 }
 0x8f0   :  { %6704 = vmatprep.subr.mxu0 %v11390_v63 }
 0x8f3   :  { %6705 = vmatpush3.msk.msra.mxu0 %vm5196_vm12, %v11123_v32 }
 0x8f4   :  { %6707 = vmatmul.mubr.msk.f32.vlgmr.msra.gmra.mrb[96].mxu0 %vm5192_vm13, %v6205_v20  ;;  %7703 = vmatprep.subr.bf16.mxu0 %v11391_v6 }
 0x8f5   :  { %7705 = vmatpush3.bf16.msra.mxu0 %v7704_v30  ;;  %6744 = vmatprep.mubr.msk.f32.mxu0 %vm8010_vm0, %v11390_v63 }
 0x8f6   :  { %7706 = vmatprep.subr.bf16.mxu0 %v11391_v6 }
 0x8f9   :  { %7708 = vmatpush3.bf16.msra.mxu0 %v7707_v50 }
 0x8fa   :  { %7709 = vmatprep.subr.bf16.mxu0 %v11391_v6 }
 0x8fd   :  { %7711 = vmatpush3.bf16.msra.mxu0 %v7710_v58 }
 0x8fe   :  { %7712 = vmatprep.subr.bf16.mxu0 %v11391_v6 }
 0x901   :  { %7714 = vmatpush3.bf16.msra.mxu0 %v7713_v57 }
 0x902   :  { %7718 = vmatprep.subr.bf16.mxu0 %v11391_v6 }
 0x9c1   :  { %v5266_v17 = vpop.f32.mrb[94].mxu0 }
 0x9c2   :  { %v6699_v45 = vpop.f32.mrb[95].mxu0  ;;  %6745 = vmatmul.mubr.msk.f32.vlgmr.msra.gmra.mrb[98].mxu0 %vm5362_vm14, %v5266_v17 }
 0x9c3   :  { %7720 = vmatpush3.bf16.msra.mxu0 %v7719_v28  ;;  %6772 = vmatprep.mubr.msk.f32.mxu0 %vm8010_vm0, %v11390_v63 }
 0x9c4   :  { %7721 = vmatprep.subr.bf16.mxu0 %v11391_v6 }
 0x9c7   :  { %v5349_v38 = vpop.f32.mrb[96].mxu0  ;;  %7723 = vmatpush3.bf16.msra.mxu0 %v7722_v1 }
 0x9c8   :  { %6726 = vmatmul.mubr.msk.f32.vlgmr.msra.gmra.mrb[130].mxu1 %vm5362_vm14, %v5349_v38  ;;  %v6708_v0 = vpop.f32.mrb[97].mxu0  ;;  %7724 = vmatprep.subr.bf16.mxu0 %v11391_v6 }
 0x9c9   :  { %7717 = vmatpush3.bf16.msra.mxu1 %v11121_v16  ;;  %6753 = vmatprep.mubr.msk.f32.mxu1 %vm8010_vm0, %v11390_v63 }
 0x9ca   :  { %6751 = vmatprep.subr.mxu1 %v11390_v63 }
 0x9cb   :  { %7726 = vmatpush3.bf16.msra.mxu0 %v7725_v35 }
 0x9cc   :  { %7727 = vmatprep.subr.bf16.mxu0 %v11391_v6 }
 0x9cd   :  { %6752 = vmatpush3.msk.msra.mxu1 %vm5196_vm12, %v11123_v32 }
 0x9ce   :  { %6754 = vmatmul.mubr.msk.f32.vlgmr.msra.gmra.mrb[132].mxu1 %vm5192_vm13, %v6218_v13  ;;  %7730 = vmatprep.subr.bf16.mxu1 %v11391_v6 }
 0x9cf   :  { %7732 = vmatpush3.bf16.msra.mxu1 %v11121_v16  ;;  %6781 = vmatprep.mubr.msk.f32.mxu1 %vm8010_vm0, %v11390_v63 }
 0x9d0   :  { %6779 = vmatprep.subr.mxu1 %v11390_v63  ;;  %7729 = vmatpush3.bf16.msra.mxu0 %v7728_v39 }
 0x9d3   :  { %6780 = vmatpush3.msk.msra.mxu1 %vm5196_vm12, %v11123_v32 }
 0x9d4   :  { %6782 = vmatmul.mubr.msk.f32.vlgmr.msra.gmra.mrb[134].mxu1 %vm5192_vm13, %v6230_v44  ;;  %7733 = vmatprep.subr.bf16.mxu1 %v11391_v6 }
 0x9d5   :  { %7735 = vmatpush3.bf16.msra.mxu1 %v7734_v46  ;;  %6800 = vmatprep.mubr.msk.f32.mxu1 %vm8010_vm0, %v11390_v63  ;;  %v6238_v63 = vld [vmem:[%s11296_s22 + $0xe8] sm:$0xff] }
 0x9d6   :  { %7736 = vmatprep.subr.bf16.mxu1 %v11391_v6  ;;  %v7740_v42 = vpack.c.bf16 %v6238_v63, %v6237_v7 }
 0x9d9   :  { %7738 = vmatpush3.bf16.msra.mxu1 %v7737_v51 }
 0x9da   :  { %7739 = vmatprep.subr.bf16.mxu1 %v11391_v6 }
 0x9dd   :  { %7741 = vmatpush3.bf16.msra.mxu1 %v7740_v42 }
 0x9de   :  { %7742 = vmatprep.subr.bf16.mxu1 %v11391_v6  ;;  %v6242_v6 = vld [vmem:[%s11297_s23] ss:$0 sm:$0xff] }
 0x9e1   :  { %7744 = vmatpush3.bf16.msra.mxu1 %v7743_v19 }
 0xa95   :  { %v5505_v12 = vpop.f32.mrb[98].mxu0 }
 0xa96   :  { %v6746_v61 = vpop.f32.mrb[99].mxu0 }
 0xa9b   :  { %v5432_v31 = vpop.f32.mrb[130].mxu1 }
 0xa9c   :  { %v5506_v24 = vadd.f32 %v5505_v12, %v5432_v31  ;;  %v6727_v62 = vpop.f32.mrb[131].mxu1 }
 0xaa1   :  { %v5580_v55 = vpop.f32.mrb[132].mxu1 }
 0xaa2   :  { %6773 = vmatmul.mubr.msk.f32.vlgmr.msra.gmra.mrb[100].mxu0 %vm5362_vm14, %v5580_v55  ;;  %v6755_v22 = vpop.f32.mrb[133].mxu1 }
 0xaa7   :  { %v5738_v23 = vpop.f32.mrb[134].mxu1 }
 0xaa8   :  { %6801 = vmatmul.mubr.msk.f32.vlgmr.msra.gmra.mrb[136].mxu1 %vm5362_vm14, %v5738_v23  ;;  %v6783_v43 = vpop.f32.mrb[135].mxu1 }
 0xb75   :  { %v5662_v52 = vpop.f32.mrb[100].mxu0 }
 0xb76   :  { %v5666_v48 = vadd.f32 %v5662_v52, %v5506_v24  ;;  %v6774_v14 = vpop.f32.mrb[101].mxu0 }
 0xb7b   :  { %v5820_v29 = vpop.f32.mrb[136].mxu1 }
 0xb7c   :  { %v5824_v16 = vadd.f32 %v5820_v29, %v5666_v48  ;;  %v6802_v47 = vpop.f32.mrb[137].mxu1 }
 0xb7e   :  { %v5832_v21 = vadd.f32 %v6242_v6, %v5824_v16 }
 0xb80   :  { %v5833_v32 = vmax.f32 %v5832_v21, 0.0 }
 0xb82   :  { %5835 = vst.msk [vmem:[#allocation8] sm:$0x3] %vm5834_vm15, %v5833_v32 }
 0xb83   :  { %7985 = shalt.err (!%p7982_p0)
}
 0xb84   :  { %s7986_s23 = scalar_lea.hbm %s11298_s24, 32 }
 0xb85   :  { %p7987_p1 = scmp.ne.s32.totalorder %s11298_s24, %s7986_s23  ;;  %p7990_p2 = scmp.lt.u32.totalorder %s7986_s23, %s11298_s24 }
 0xb87   :  { %p7992_p3 = pnand %p7990_p2, %p7987_p1 }
 0xb89   :  { %7995 = shalt.err (!%p7992_p3)
}
 0xb8a   :  { %5845 = dma.vmem_to_hbm [thread:$0]  %s5843_s11, 32, %s11298_s24, [#allocation4]  }
 0xb8b   :  { %8000 = dma.done.wait [#allocation4], 32  }
 0xb8c   :  { %8001 = vsyncadd [#allocation4], 4294967264 }
 0xb8d   :  { %5849 = vsyncpa [#allocation3], 1 }
 0xb8e   :  { %5850 = vsyncpa [#allocation6], 1 }
 0xb8f   :  { %5851 = vsyncpa [#allocation4], 1 }

</bundles_post_ra>
